<compile_context>
chip_gen: v6e
topology: v6e:2x2x1
jax: 0.10.0
libtpu: 0.0.40
codegen_flags: <defaults>
</compile_context>

<pallas_src>
import functools

import jax
import jax.numpy as jnp
from jax.experimental import pallas as pl
from jax.experimental.pallas import tpu as pltpu


def _round_up(n, m):
    return ((n + m - 1) // m) * m


def _vmem_limit(bytes_needed):
    # Explicit VMEM bound: generous headroom, but capped at 48 MiB so large
    # blocks that are fine on v5e/v6e (128 MiB physical) stay safe on v7x
    # (64 MiB physical per TensorCore).
    return int(min(48 << 20, max(32 << 20, 2 * bytes_needed)))


# ---------------------------------------------------------------------------
# Kernel 1: row-tiled fused matmul + bias + optional ReLU.
# Used for conv1x1+bn1+relu, im2col(conv3x3)+bn2+relu, conv1x1+bn3.
# ---------------------------------------------------------------------------
def _matmul_bias_act_kernel(x_ref, w_ref, b_ref, o_ref, *, relu):
    y = jnp.dot(x_ref[...], w_ref[...], preferred_element_type=jnp.float32)
    y = y + b_ref[...]
    if relu:
        y = jnp.maximum(y, 0.0)
    o_ref[...] = y.astype(o_ref.dtype)


def matmul_bias_act(x2d, w, b, *, relu, tm=128):
    """(M, Cin) @ (Cin, Cout) + b [, ReLU], row-tiled over M (lane dim = Cout)."""
    M, Cin = x2d.shape
    Cout = w.shape[1]
    tm = min(tm, _round_up(M, 8))
    grid = (pl.cdiv(M, tm),)
    needed = (2 * tm * (Cin + Cout) * x2d.dtype.itemsize
              + 2 * (Cin + 1) * Cout * w.dtype.itemsize)
    return pl.pallas_call(
        functools.partial(_matmul_bias_act_kernel, relu=relu),
        out_shape=jax.ShapeDtypeStruct((M, Cout), x2d.dtype),
        grid_spec=pltpu.PrefetchScalarGridSpec(
            num_scalar_prefetch=0,
            grid=grid,
            in_specs=[
                pl.BlockSpec((tm, Cin), lambda i: (i, 0)),
                pl.BlockSpec((Cin, Cout), lambda i: (0, 0)),   # resident weight
                pl.BlockSpec((1, Cout), lambda i: (0, 0)),     # resident bias
            ],
            out_specs=pl.BlockSpec((tm, Cout), lambda i: (i, 0)),
        ),
        compiler_params=pltpu.CompilerParams(
            dimension_semantics=("parallel",),
            vmem_limit_bytes=_vmem_limit(needed),
        ),
    )(x2d, w, b.reshape(1, Cout))


# ---------------------------------------------------------------------------
# Kernel 2: fused SE (global-avg-pool -> FC -> ReLU -> FC -> sigmoid -> scale)
#           + residual add + final ReLU.  Channels-last (B, H*W, C) blocks.
# ---------------------------------------------------------------------------
def _se_residual_relu_kernel(x_ref, res_ref, w1_ref, w2_ref, o_ref):
    # x_ref / res_ref / o_ref: (Bt, HW, C); w1: (C, Cr) pre-scaled by 1/(H*W);
    # w2: (Cr, C).  Compute in f32 even for bf16 I/O (v5e-safe).
    x = x_ref[...].astype(jnp.float32)
    pooled = jnp.sum(x, axis=1)                                    # (Bt, C)
    h = jnp.maximum(
        jnp.dot(pooled, w1_ref[...], preferred_element_type=jnp.float32), 0.0)
    s = jax.nn.sigmoid(
        jnp.dot(h, w2_ref[...], preferred_element_type=jnp.float32))  # (Bt, C)
    out = x * s[:, None, :] + res_ref[...].astype(jnp.float32)
    o_ref[...] = jnp.maximum(out, 0.0).astype(o_ref.dtype)


def se_residual_relu(x, residual, w1_scaled, w2):
    """x, residual: (B, HW, C) channels-last.  Returns relu(x * SE(x) + residual)."""
    B, HW, C = x.shape
    Cr = w1_scaled.shape[1]
    per_image = HW * C * x.dtype.itemsize
    # Batch several images per grid step at small spatial sizes (amortize the
    # per-step overhead), keep >= 2 grid steps for megacore, bound VMEM.
    bt = max(1, min(8, (24 << 20) // (6 * per_image)))
    bt = min(bt, max(1, B // 2))
    while B % bt:
        bt -= 1
    needed = 6 * bt * per_image + 4 * (C * Cr + Cr * C) * w2.dtype.itemsize
    grid = (B // bt,)
    return pl.pallas_call(
        _se_residual_relu_kernel,
        out_shape=jax.ShapeDtypeStruct((B, HW, C), x.dtype),
        grid_spec=pltpu.PrefetchScalarGridSpec(
            num_scalar_prefetch=0,
            grid=grid,
            in_specs=[
                pl.BlockSpec((bt, HW, C), lambda i: (i, 0, 0)),   # conv3+bn3 out
                pl.BlockSpec((bt, HW, C), lambda i: (i, 0, 0)),   # residual
                pl.BlockSpec((C, Cr), lambda i: (0, 0)),          # resident w1/HW
                pl.BlockSpec((Cr, C), lambda i: (0, 0)),          # resident w2
            ],
            out_specs=pl.BlockSpec((bt, HW, C), lambda i: (i, 0, 0)),
        ),
        input_output_aliases={0: 0},   # x is dead after this op -> reuse buffer
        compiler_params=pltpu.CompilerParams(
            dimension_semantics=("parallel",),
            vmem_limit_bytes=_vmem_limit(needed),
        ),
    )(x, residual, w1_scaled, w2)


# ---------------------------------------------------------------------------
# Host-side plumbing: im2col for the 3x3 conv, BN folding, full forward.
# ---------------------------------------------------------------------------
def _im2col_3x3(x_nhwc, stride):
    """3x3 / pad=1 patches of an NHWC tensor -> (B, Ho, Wo, 9*C), plus Ho, Wo."""
    B, H, W, C = x_nhwc.shape
    ho = (H + 2 - 3) // stride + 1
    wo = (W + 2 - 3) // stride + 1
    xp = jnp.pad(x_nhwc, ((0, 0), (1, 1), (1, 1), (0, 0)))
    cols = []
    for dh in range(3):
        for dw in range(3):
            cols.append(xp[:, dh:dh + stride * ho:stride,
                           dw:dw + stride * wo:stride, :])
    return jnp.concatenate(cols, axis=-1), ho, wo


def fold_params(raw, eps=1e-5):
    """Fold BatchNorm (running stats) into matmul-layout conv weights/biases."""
    def bn_fold(gamma, beta, mean, var):
        inv = gamma / jnp.sqrt(var + eps)
        return inv, beta - mean * inv

    inv1, b1 = bn_fold(*raw["bn1"])
    inv2, b2 = bn_fold(*raw["bn2"])
    inv3, b3 = bn_fold(*raw["bn3"])
    o2 = raw["conv2_w"].shape[0]
    w1 = raw["conv1_w"][:, :, 0, 0].T * inv1[None, :]                  # (Cin, planes)
    w2 = (jnp.transpose(raw["conv2_w"], (2, 3, 1, 0)).reshape(-1, o2)  # (9*planes, planes)
          * inv2[None, :])
    w3 = raw["conv3_w"][:, :, 0, 0].T * inv3[None, :]                  # (planes, 4*planes)
    return dict(w1=w1, b1=b1, w2=w2, b2=b2, w3=w3, b3=b3,
                se_w1=raw["se_w1"], se_w2=raw["se_w2"])


def se_bottleneck_forward(x_nchw, p, *, stride=1):
    """Inference forward of SEBottleneck (identity residual path)."""
    B, Cin, H, W = x_nchw.shape
    planes = p["w1"].shape[1]
    cout = p["w3"].shape[1]
    # TODO(synk): the optional `downsample` submodule (supplied by the ResNet
    # builder) is not modeled; identity residual requires stride=1, Cin==4*planes.
    assert stride == 1 and Cin == cout, "identity residual path only"

    x = jnp.transpose(x_nchw, (0, 2, 3, 1))                # NHWC, lane dim = C

    # conv1 (1x1) + bn1 + relu
    out = matmul_bias_act(x.reshape(B * H * W, Cin), p["w1"], p["b1"], relu=True)

    # conv2 (3x3, pad=1, stride) + bn2 + relu  — im2col + fused matmul
    patches, ho, wo = _im2col_3x3(out.reshape(B, H, W, planes), stride)
    out = matmul_bias_act(patches.reshape(B * ho * wo, 9 * planes),
                          p["w2"], p["b2"], relu=True)

    # conv3 (1x1) + bn3 (no relu)
    out = matmul_bias_act(out, p["w3"], p["b3"], relu=False)

    # SE + residual add + final relu, fused (1/(H*W) folded into the FC1 weight)
    se_w1_scaled = p["se_w1"] * (1.0 / (ho * wo))
    out = se_residual_relu(out.reshape(B, ho * wo, cout),
                           x.reshape(B, H * W, Cin),
                           se_w1_scaled, p["se_w2"])

    return jnp.transpose(out.reshape(B, ho, wo, cout), (0, 3, 1, 2))   # NCHW


# ---------------------------------------------------------------------------
# Pure-JAX reference (matches the PyTorch forward with inference-mode BN).
# ---------------------------------------------------------------------------
def se_bottleneck_ref(x, raw, *, stride=1, eps=1e-5):
    def conv(x, w, stride=1, padding=0):
        return jax.lax.conv_general_dilated(
            x, w, window_strides=(stride, stride),
            padding=[(padding, padding)] * 2,
            dimension_numbers=("NCHW", "OIHW", "NCHW"))

    def bn(x, params):
        gamma, beta, mean, var = params
        inv = gamma / jnp.sqrt(var + eps)
        return x * inv[None, :, None, None] + (beta - mean * inv)[None, :, None, None]

    out = jax.nn.relu(bn(conv(x, raw["conv1_w"]), raw["bn1"]))
    out = jax.nn.relu(bn(conv(out, raw["conv2_w"], stride=stride, padding=1), raw["bn2"]))
    out = bn(conv(out, raw["conv3_w"]), raw["bn3"])
    y = jnp.mean(out, axis=(2, 3))
    y = jax.nn.sigmoid(jnp.maximum(y @ raw["se_w1"], 0.0) @ raw["se_w2"])
    out = out * y[:, :, None, None]
    return jax.nn.relu(out + x)


if __name__ == "__main__":
    # Keep both the kernels and the reference at full f32 matmul precision so
    # the correctness check is tight.
    jax.config.update("jax_default_matmul_precision", "highest")

    B, planes, H, W = 4, 32, 8, 8
    reduction = 16
    stride = 1
    cout = planes * 4          # 128 -> lane-dense channel dim
    inplanes = cout            # identity residual (no downsample)
    cr = cout // reduction     # 8

    key = jax.random.PRNGKey(0)
    ks = jax.random.split(key, 16)
    x = jax.random.normal(ks[0], (B, inplanes, H, W), jnp.float32)

    def bn_params(k, c):
        k1, k2, k3, k4 = jax.random.split(k, 4)
        gamma = 1.0 + 0.1 * jax.random.normal(k1, (c,), jnp.float32)
        beta = 0.1 * jax.random.normal(k2, (c,), jnp.float32)
        mean = 0.1 * jax.random.normal(k3, (c,), jnp.float32)
        var = 1.0 + 0.1 * jnp.abs(jax.random.normal(k4, (c,), jnp.float32))
        return (gamma, beta, mean, var)

    raw = {
        "conv1_w": 0.10 * jax.random.normal(ks[1], (planes, inplanes, 1, 1), jnp.float32),
        "conv2_w": 0.05 * jax.random.normal(ks[2], (planes, planes, 3, 3), jnp.float32),
        "conv3_w": 0.10 * jax.random.normal(ks[3], (cout, planes, 1, 1), jnp.float32),
        "bn1": bn_params(ks[4], planes),
        "bn2": bn_params(ks[5], planes),
        "bn3": bn_params(ks[6], cout),
        # nn.Linear weights stored pre-transposed (fc.weight.T), bias=False.
        "se_w1": 0.10 * jax.random.normal(ks[7], (cout, cr), jnp.float32),
        "se_w2": 0.10 * jax.random.normal(ks[8], (cr, cout), jnp.float32),
    }

    folded = fold_params(raw)
    fwd = jax.jit(functools.partial(se_bottleneck_forward, stride=stride))
    out = fwd(x, folded)
    jax.block_until_ready(out)

    ref = se_bottleneck_ref(x, raw, stride=stride)
    assert out.shape == ref.shape
    assert jnp.allclose(out, ref, atol=2e-3, rtol=2e-3), (
        f"mismatch vs reference, max abs err = {jnp.max(jnp.abs(out - ref))}")
    print("KERNEL_OK")
</pallas_src>

<mosaic_0001>
module attributes {stable_mosaic.version = 11 : i64} {
  func.func @_matmul_bias_act_kernel(%arg0: i32, %arg1: memref<128x128xf32, #tpu.memory_space<vmem>>, %arg2: memref<128x32xf32, #tpu.memory_space<vmem>>, %arg3: memref<1x32xf32, #tpu.memory_space<vmem>>, %arg4: memref<128x32xf32, #tpu.memory_space<vmem>>) attributes {dimension_semantics = [#tpu.dimension_semantics<parallel>], iteration_bounds = array<i64: 2>, scalar_prefetch = 0 : i64, scratch_operands = 0 : i64, tpu.core_type = #tpu.core_type<tc>, window_params = [{transform_indices = @transform_0, window_bounds = array<i64: 128, 128>}, {pipeline_mode = #tpu.pipeline_mode<synchronous>, transform_indices = @transform_1, window_bounds = array<i64: 128, 32>}, {pipeline_mode = #tpu.pipeline_mode<synchronous>, transform_indices = @transform_2, window_bounds = array<i64: 1, 32>}, {transform_indices = @transform_3, window_bounds = array<i64: 128, 32>}]} {
    %c0 = arith.constant 0 : index
    %c0_0 = arith.constant 0 : index
    %0 = vector.load %arg1[%c0, %c0_0] : memref<128x128xf32, #tpu.memory_space<vmem>>, vector<128x128xf32>
    %c0_1 = arith.constant 0 : index
    %c0_2 = arith.constant 0 : index
    %1 = vector.load %arg2[%c0_1, %c0_2] : memref<128x32xf32, #tpu.memory_space<vmem>>, vector<128x32xf32>
    %cst = arith.constant dense<0.000000e+00> : vector<128x32xf32>
    %2 = tpu.matmul %0, %1, %cst {dimension_numbers = #tpu.dot_dimension_numbers<[1], [0], [0], [1], [0, 0, 1, 1], [], []>, precision = #tpu.contract_precision<fp32>} : vector<128x128xf32>, vector<128x32xf32>, vector<128x32xf32> -> vector<128x32xf32>
    %c0_3 = arith.constant 0 : index
    %c0_4 = arith.constant 0 : index
    %3 = vector.load %arg3[%c0_3, %c0_4] : memref<1x32xf32, #tpu.memory_space<vmem>>, vector<1x32xf32>
    %4 = vector.broadcast %3 : vector<1x32xf32> to vector<128x32xf32>
    %5 = arith.addf %2, %4 : vector<128x32xf32>
    %cst_5 = arith.constant 0.000000e+00 : f32
    %6 = vector.broadcast %cst_5 : f32 to vector<128x32xf32>
    %7 = arith.maximumf %5, %6 : vector<128x32xf32>
    %c0_6 = arith.constant 0 : index
    %c0_7 = arith.constant 0 : index
    %8 = vector.load %arg4[%c0_6, %c0_7] : memref<128x32xf32, #tpu.memory_space<vmem>>, vector<128x32xf32>
    tpu.vector_store %arg4[%c0_6, %c0_7], %7 {strides = array<i32>} : memref<128x32xf32, #tpu.memory_space<vmem>>, vector<128x32xf32>,
    return
  }
  func.func @transform_0(%arg0: i32) -> (i32, i32) {
    %c0_i32 = arith.constant 0 : i32
    %c0_i32_0 = arith.constant 0 : i32
    return %arg0, %c0_i32 : i32, i32
  }
  func.func @transform_1(%arg0: i32) -> (i32, i32) {
    %c0_i32 = arith.constant 0 : i32
    %c0_i32_0 = arith.constant 0 : i32
    %c0_i32_1 = arith.constant 0 : i32
    return %c0_i32, %c0_i32_0 : i32, i32
  }
  func.func @transform_2(%arg0: i32) -> (i32, i32) {
    %c0_i32 = arith.constant 0 : i32
    %c0_i32_0 = arith.constant 0 : i32
    %c0_i32_1 = arith.constant 0 : i32
    return %c0_i32, %c0_i32_0 : i32, i32
  }
  func.func @transform_3(%arg0: i32) -> (i32, i32) {
    %c0_i32 = arith.constant 0 : i32
    %c0_i32_0 = arith.constant 0 : i32
    return %arg0, %c0_i32 : i32, i32
  }
}

module attributes {stable_mosaic.version = 11 : i64} {
  func.func @_matmul_bias_act_kernel(%arg0: i32, %arg1: memref<128x32xf32, #tpu.memory_space<vmem>>, %arg2: memref<32x128xf32, #tpu.memory_space<vmem>>, %arg3: memref<1x128xf32, #tpu.memory_space<vmem>>, %arg4: memref<128x128xf32, #tpu.memory_space<vmem>>) attributes {dimension_semantics = [#tpu.dimension_semantics<parallel>], iteration_bounds = array<i64: 2>, scalar_prefetch = 0 : i64, scratch_operands = 0 : i64, tpu.core_type = #tpu.core_type<tc>, window_params = [{transform_indices = @transform_0, window_bounds = array<i64: 128, 32>}, {pipeline_mode = #tpu.pipeline_mode<synchronous>, transform_indices = @transform_1, window_bounds = array<i64: 32, 128>}, {pipeline_mode = #tpu.pipeline_mode<synchronous>, transform_indices = @transform_2, window_bounds = array<i64: 1, 128>}, {transform_indices = @transform_3, window_bounds = array<i64: 128, 128>}]} {
    %c0 = arith.constant 0 : index
    %c0_0 = arith.constant 0 : index
    %0 = vector.load %arg1[%c0, %c0_0] : memref<128x32xf32, #tpu.memory_space<vmem>>, vector<128x32xf32>
    %c0_1 = arith.constant 0 : index
    %c0_2 = arith.constant 0 : index
    %1 = vector.load %arg2[%c0_1, %c0_2] : memref<32x128xf32, #tpu.memory_space<vmem>>, vector<32x128xf32>
    %cst = arith.constant dense<0.000000e+00> : vector<128x128xf32>
    %2 = tpu.matmul %0, %1, %cst {dimension_numbers = #tpu.dot_dimension_numbers<[1], [0], [0], [1], [0, 0, 1, 1], [], []>, precision = #tpu.contract_precision<fp32>} : vector<128x32xf32>, vector<32x128xf32>, vector<128x128xf32> -> vector<128x128xf32>
    %c0_3 = arith.constant 0 : index
    %c0_4 = arith.constant 0 : index
    %3 = vector.load %arg3[%c0_3, %c0_4] : memref<1x128xf32, #tpu.memory_space<vmem>>, vector<1x128xf32>
    %4 = vector.broadcast %3 : vector<1x128xf32> to vector<128x128xf32>
    %5 = arith.addf %2, %4 : vector<128x128xf32>
    %c0_5 = arith.constant 0 : index
    %c0_6 = arith.constant 0 : index
    %6 = vector.load %arg4[%c0_5, %c0_6] : memref<128x128xf32, #tpu.memory_space<vmem>>, vector<128x128xf32>
    tpu.vector_store %arg4[%c0_5, %c0_6], %5 {strides = array<i32>} : memref<128x128xf32, #tpu.memory_space<vmem>>, vector<128x128xf32>,
    return
  }
  func.func @transform_0(%arg0: i32) -> (i32, i32) {
    %c0_i32 = arith.constant 0 : i32
    %c0_i32_0 = arith.constant 0 : i32
    return %arg0, %c0_i32 : i32, i32
  }
  func.func @transform_1(%arg0: i32) -> (i32, i32) {
    %c0_i32 = arith.constant 0 : i32
    %c0_i32_0 = arith.constant 0 : i32
    %c0_i32_1 = arith.constant 0 : i32
    return %c0_i32, %c0_i32_0 : i32, i32
  }
  func.func @transform_2(%arg0: i32) -> (i32, i32) {
    %c0_i32 = arith.constant 0 : i32
    %c0_i32_0 = arith.constant 0 : i32
    %c0_i32_1 = arith.constant 0 : i32
    return %c0_i32, %c0_i32_0 : i32, i32
  }
  func.func @transform_3(%arg0: i32) -> (i32, i32) {
    %c0_i32 = arith.constant 0 : i32
    %c0_i32_0 = arith.constant 0 : i32
    return %arg0, %c0_i32 : i32, i32
  }
}

module attributes {stable_mosaic.version = 11 : i64} {
  func.func @_matmul_bias_act_kernel(%arg0: i32, %arg1: memref<128x288xf32, #tpu.memory_space<vmem>>, %arg2: memref<288x32xf32, #tpu.memory_space<vmem>>, %arg3: memref<1x32xf32, #tpu.memory_space<vmem>>, %arg4: memref<128x32xf32, #tpu.memory_space<vmem>>) attributes {dimension_semantics = [#tpu.dimension_semantics<parallel>], iteration_bounds = array<i64: 2>, scalar_prefetch = 0 : i64, scratch_operands = 0 : i64, tpu.core_type = #tpu.core_type<tc>, window_params = [{transform_indices = @transform_0, window_bounds = array<i64: 128, 288>}, {pipeline_mode = #tpu.pipeline_mode<synchronous>, transform_indices = @transform_1, window_bounds = array<i64: 288, 32>}, {pipeline_mode = #tpu.pipeline_mode<synchronous>, transform_indices = @transform_2, window_bounds = array<i64: 1, 32>}, {transform_indices = @transform_3, window_bounds = array<i64: 128, 32>}]} {
    %c0 = arith.constant 0 : index
    %c0_0 = arith.constant 0 : index
    %0 = vector.load %arg1[%c0, %c0_0] : memref<128x288xf32, #tpu.memory_space<vmem>>, vector<128x288xf32>
    %c0_1 = arith.constant 0 : index
    %c0_2 = arith.constant 0 : index
    %1 = vector.load %arg2[%c0_1, %c0_2] : memref<288x32xf32, #tpu.memory_space<vmem>>, vector<288x32xf32>
    %cst = arith.constant dense<0.000000e+00> : vector<128x32xf32>
    %2 = tpu.matmul %0, %1, %cst {dimension_numbers = #tpu.dot_dimension_numbers<[1], [0], [0], [1], [0, 0, 1, 1], [], []>, precision = #tpu.contract_precision<fp32>} : vector<128x288xf32>, vector<288x32xf32>, vector<128x32xf32> -> vector<128x32xf32>
    %c0_3 = arith.constant 0 : index
    %c0_4 = arith.constant 0 : index
    %3 = vector.load %arg3[%c0_3, %c0_4] : memref<1x32xf32, #tpu.memory_space<vmem>>, vector<1x32xf32>
    %4 = vector.broadcast %3 : vector<1x32xf32> to vector<128x32xf32>
    %5 = arith.addf %2, %4 : vector<128x32xf32>
    %cst_5 = arith.constant 0.000000e+00 : f32
    %6 = vector.broadcast %cst_5 : f32 to vector<128x32xf32>
    %7 = arith.maximumf %5, %6 : vector<128x32xf32>
    %c0_6 = arith.constant 0 : index
    %c0_7 = arith.constant 0 : index
    %8 = vector.load %arg4[%c0_6, %c0_7] : memref<128x32xf32, #tpu.memory_space<vmem>>, vector<128x32xf32>
    tpu.vector_store %arg4[%c0_6, %c0_7], %7 {strides = array<i32>} : memref<128x32xf32, #tpu.memory_space<vmem>>, vector<128x32xf32>,
    return
  }
  func.func @transform_0(%arg0: i32) -> (i32, i32) {
    %c0_i32 = arith.constant 0 : i32
    %c0_i32_0 = arith.constant 0 : i32
    return %arg0, %c0_i32 : i32, i32
  }
  func.func @transform_1(%arg0: i32) -> (i32, i32) {
    %c0_i32 = arith.constant 0 : i32
    %c0_i32_0 = arith.constant 0 : i32
    %c0_i32_1 = arith.constant 0 : i32
    return %c0_i32, %c0_i32_0 : i32, i32
  }
  func.func @transform_2(%arg0: i32) -> (i32, i32) {
    %c0_i32 = arith.constant 0 : i32
    %c0_i32_0 = arith.constant 0 : i32
    %c0_i32_1 = arith.constant 0 : i32
    return %c0_i32, %c0_i32_0 : i32, i32
  }
  func.func @transform_3(%arg0: i32) -> (i32, i32) {
    %c0_i32 = arith.constant 0 : i32
    %c0_i32_0 = arith.constant 0 : i32
    return %arg0, %c0_i32 : i32, i32
  }
}

module attributes {stable_mosaic.version = 11 : i64} {
  func.func @_se_residual_relu_kernel(%arg0: i32, %arg1: memref<2x64x128xf32, #tpu.memory_space<vmem>>, %arg2: memref<2x64x128xf32, #tpu.memory_space<vmem>>, %arg3: memref<128x8xf32, #tpu.memory_space<vmem>>, %arg4: memref<8x128xf32, #tpu.memory_space<vmem>>, %arg5: memref<2x64x128xf32, #tpu.memory_space<vmem>>) attributes {dimension_semantics = [#tpu.dimension_semantics<parallel>], iteration_bounds = array<i64: 2>, scalar_prefetch = 0 : i64, scratch_operands = 0 : i64, tpu.core_type = #tpu.core_type<tc>, window_params = [{transform_indices = @transform_0, window_bounds = array<i64: 2, 64, 128>}, {transform_indices = @transform_1, window_bounds = array<i64: 2, 64, 128>}, {pipeline_mode = #tpu.pipeline_mode<synchronous>, transform_indices = @transform_2, window_bounds = array<i64: 128, 8>}, {pipeline_mode = #tpu.pipeline_mode<synchronous>, transform_indices = @transform_3, window_bounds = array<i64: 8, 128>}, {transform_indices = @transform_4, window_bounds = array<i64: 2, 64, 128>}]} {
    %c0 = arith.constant 0 : index
    %c0_0 = arith.constant 0 : index
    %c0_1 = arith.constant 0 : index
    %0 = vector.load %arg1[%c0, %c0_0, %c0_1] : memref<2x64x128xf32, #tpu.memory_space<vmem>>, vector<2x64x128xf32>
    %cst = arith.constant dense<0.000000e+00> : vector<2x128xf32>
    %1 = vector.multi_reduction <add>, %0, %cst [1] : vector<2x64x128xf32> to vector<2x128xf32>
    %c0_2 = arith.constant 0 : index
    %c0_3 = arith.constant 0 : index
    %2 = vector.load %arg3[%c0_2, %c0_3] : memref<128x8xf32, #tpu.memory_space<vmem>>, vector<128x8xf32>
    %cst_4 = arith.constant dense<0.000000e+00> : vector<2x8xf32>
    %3 = tpu.matmul %1, %2, %cst_4 {dimension_numbers = #tpu.dot_dimension_numbers<[1], [0], [0], [1], [0, 0, 1, 1], [], []>, precision = #tpu.contract_precision<fp32>} : vector<2x128xf32>, vector<128x8xf32>, vector<2x8xf32> -> vector<2x8xf32>
    %cst_5 = arith.constant 0.000000e+00 : f32
    %4 = vector.broadcast %cst_5 : f32 to vector<2x8xf32>
    %5 = arith.maximumf %3, %4 : vector<2x8xf32>
    %c0_6 = arith.constant 0 : index
    %c0_7 = arith.constant 0 : index
    %6 = vector.load %arg4[%c0_6, %c0_7] : memref<8x128xf32, #tpu.memory_space<vmem>>, vector<8x128xf32>
    %cst_8 = arith.constant dense<0.000000e+00> : vector<2x128xf32>
    %7 = tpu.matmul %5, %6, %cst_8 {dimension_numbers = #tpu.dot_dimension_numbers<[1], [0], [0], [1], [0, 0, 1, 1], [], []>, precision = #tpu.contract_precision<fp32>} : vector<2x8xf32>, vector<8x128xf32>, vector<2x128xf32> -> vector<2x128xf32>
    %8 = arith.negf %7 : vector<2x128xf32>
    %9 = math.exp %8 : vector<2x128xf32>
    %cst_9 = arith.constant 1.000000e+00 : f32
    %10 = vector.broadcast %cst_9 : f32 to vector<2x128xf32>
    %11 = arith.addf %10, %9 : vector<2x128xf32>
    %12 = arith.divf %10, %11 : vector<2x128xf32>
    %13 = vector.shape_cast %12 : vector<2x128xf32> to vector<2x1x128xf32>
    %14 = vector.broadcast %13 : vector<2x1x128xf32> to vector<2x64x128xf32>
    %15 = arith.mulf %0, %14 : vector<2x64x128xf32>
    %c0_10 = arith.constant 0 : index
    %c0_11 = arith.constant 0 : index
    %c0_12 = arith.constant 0 : index
    %16 = vector.load %arg2[%c0_10, %c0_11, %c0_12] : memref<2x64x128xf32, #tpu.memory_space<vmem>>, vector<2x64x128xf32>
    %17 = arith.addf %15, %16 : vector<2x64x128xf32>
    %cst_13 = arith.constant 0.000000e+00 : f32
    %18 = vector.broadcast %cst_13 : f32 to vector<2x64x128xf32>
    %19 = arith.maximumf %17, %18 : vector<2x64x128xf32>
    %c0_14 = arith.constant 0 : index
    %c0_15 = arith.constant 0 : index
    %c0_16 = arith.constant 0 : index
    %20 = vector.load %arg5[%c0_14, %c0_15, %c0_16] : memref<2x64x128xf32, #tpu.memory_space<vmem>>, vector<2x64x128xf32>
    tpu.vector_store %arg5[%c0_14, %c0_15, %c0_16], %19 {strides = array<i32>} : memref<2x64x128xf32, #tpu.memory_space<vmem>>, vector<2x64x128xf32>,
    return
  }
  func.func @transform_0(%arg0: i32) -> (i32, i32, i32) {
    %c0_i32 = arith.constant 0 : i32
    %c0_i32_0 = arith.constant 0 : i32
    %c0_i32_1 = arith.constant 0 : i32
    return %arg0, %c0_i32, %c0_i32_0 : i32, i32, i32
  }
  func.func @transform_1(%arg0: i32) -> (i32, i32, i32) {
    %c0_i32 = arith.constant 0 : i32
    %c0_i32_0 = arith.constant 0 : i32
    %c0_i32_1 = arith.constant 0 : i32
    return %arg0, %c0_i32, %c0_i32_0 : i32, i32, i32
  }
  func.func @transform_2(%arg0: i32) -> (i32, i32) {
    %c0_i32 = arith.constant 0 : i32
    %c0_i32_0 = arith.constant 0 : i32
    %c0_i32_1 = arith.constant 0 : i32
    return %c0_i32, %c0_i32_0 : i32, i32
  }
  func.func @transform_3(%arg0: i32) -> (i32, i32) {
    %c0_i32 = arith.constant 0 : i32
    %c0_i32_0 = arith.constant 0 : i32
    %c0_i32_1 = arith.constant 0 : i32
    return %c0_i32, %c0_i32_0 : i32, i32
  }
  func.func @transform_4(%arg0: i32) -> (i32, i32, i32) {
    %c0_i32 = arith.constant 0 : i32
    %c0_i32_0 = arith.constant 0 : i32
    %c0_i32_1 = arith.constant 0 : i32
    return %arg0, %c0_i32, %c0_i32_0 : i32, i32, i32
  }
}

</mosaic_0001>

<bundles_post_ra>
// kernel: se_bottleneck_forward.4
= control target key start
LH: loop header
LB: loop body
LE: loop exit
PB: predicated region body
PF: predicated region fallthrough
CT: control target
= control target key end

     0   :  { %8 = vsyncpa [#allocation3], 0  ;;  %s3235_s0 = inlined_call_operand.hbm [shape: f32[256,128], index: 0, kind: input, shape index: {}]   ;;  %s3236_s1 = inlined_call_operand.vmem [shape: f32[128,32], index: 1, kind: input, shape index: {}]   ;;  %s3237_s2 = inlined_call_operand.vmem [shape: f32[1,32], index: 2, kind: input, shape index: {}]   ;;  %s3238_s3 = inlined_call_operand.vmem [shape: f32[256,32], index: 3, kind: output, shape index: {}]  }
   0x1   :  { %10 = vsyncpa [#allocation3 + $0x1], 0  ;;  %s2289_s12 = smov 0   ;;  %s2291_s13 = smov 0  }
   0x2   :  { %s2293_s14 = smov 0   ;;  %s2295_s15 = smov 0  }
   0x3 LB: > { %s1618_s16 = sadd.s32 4294967295, %s2264_s15   ;;  %s2309_s17 = sadd.s32 1, %s2264_s15   ;;  %s2264_s15 = sphi %s2295_s15, %s3363_s15   ;;  %s2260_s14 = sphi %s2293_s14, %s3362_s14   ;;  %s2256_s13 = sphi %s2291_s13, %s3361_s13   ;;  %s2252_s12 = sphi %s2289_s12, %s3360_s12  }
   0x4   : > { %s20_s18 = ssub.s32 %s2264_s15, %s2309_s17  ;;  %s23_s19 = sadd.s32 1, %s2260_s14 }
   0x5   : > { %p21_p0 = scmp.eq.s32.totalorder %s20_s18, 0  ;;  %p30_p1 = scmp.ne.s32.totalorder %s2260_s14, %s2256_s13 }
   0x6   : > { %p31_p2 = scmp.eq.s32.totalorder %s2264_s15, 0  ;;  %p36_p3 = scmp.ne.s32.totalorder %s2256_s13, %s2252_s12 }
   0x7   : > { %s2319_s20 = scalar_select %p21_p0, %s2260_s14, %s23_s19  }
   0x8   : > { %p32_p4 = por %p31_p2, %p30_p1  ;;  %p37_p5 = scmp.eq.s32.totalorder %s1618_s16, 0 }
   0x9   : > { %p2167_p6 = scmp.lt.s32.totalorder %s2264_s15, 2  ;;  %s134_s22 = sand.u32 1, %s2260_s14  }
   0xa   : > { %p2324_p7 = por %p37_p5, %p36_p3  ;;  %s1622_s23 = sshll.u32 %s134_s22, 7 }
   0xb   : > { %s1632_s24 = sshll.u32 %s2264_s15, 11  ;;  %s138_s28 = scalar_lea.vmem [#allocation2], %s1622_s23 }
   0xc   : > { %s3279_s21 = scalar_select %p2324_p7, 1, 0 }
   0xd   : > { %s2333_s27 = scalar_lea.hbm %s3235_s0, %s1632_s24  ;;  %s145_s29 = sshll.u32 %s138_s28, 4  ;;  %s2335_s29 = int_to_ptr.vmem [resolvable:$true] %s145_s29 }
   0xe   : > { %p2337_p8 = pnand %p2167_p6, %p32_p4  ;;  %s2342_s4 = scalar_lea.sflag [#allocation3], %s134_s22 }
   0xf   : > { %s2202_s5 = scalar_lea.hbm %s2333_s27, 2048  ;;  %s2207_s8 = scalar_lea.hbm %s3235_s0, 4096 }
  0x10   : > { %p2203_p10 = scmp.ne.s32.totalorder %s2333_s27, %s2202_s5  ;;  %p2204_p11 = pneg %p2337_p8 }
  0x11   : > { %p2208_p0 = scmp.lt.s32.totalorder %s2333_s27, %s3235_s0  ;;  %p2209_p1 = scmp.lt.s32.totalorder %s2207_s8, %s2202_s5 }
  0x12   : > { %p2205_p12 = pnand %p2204_p11, %p2203_p10 }
  0x13   : > { %p2210_p2 = por %p2209_p1, %p2208_p0 }
  0x14   : > { %p2206_p13 = pneg %p2205_p12 }
  0x16   : > { %p2211_p3 = pnand %p2210_p2, %p2206_p13 }
  0x18   : > { %2214 = shalt.err (!%p2211_p3)
}
  0x19   : > { %s2215_s11 = scalar_lea.vmem %s2335_s29, 2048  ;;  %s2266_s12 = smov [#allocation2]  }
  0x1a   : > { %p2216_p4 = scmp.ne.s32.totalorder %s2335_s29, %s2215_s11  ;;  %s2220_s18 = sshll.u32 %s2266_s12, 4  ;;  %s2221_s18 = int_to_ptr.vmem [resolvable:$false] %s2220_s18 }
  0x1b   : > { %s2222_s19 = scalar_lea.vmem %s2221_s18, 4096  ;;  %p2223_p10 = scmp.lt.s32.totalorder %s2335_s29, %s2221_s18 }
  0x1c   : > { %p2218_p5 = pnand %p2216_p4, %p2204_p11  ;;  %p2224_p12 = scmp.lt.s32.totalorder %s2222_s19, %s2215_s11 }
  0x1e   : > { %p2219_p6 = pneg %p2218_p5  ;;  %p2225_p9 = por %p2224_p12, %p2223_p10 }
  0x20   : > { %p2226_p7 = pnand %p2225_p9, %p2219_p6 }
  0x22   : > { %2229 = shalt.err (!%p2226_p7)
}
  0x23   : > { %s2267_s22 = smov 128   ;;  %s2268_s23 = smov 8  }
  0x24   : > { %2166 = dma.hbm_to_vmem [thread:$0]  (!%p2337_p8), %s2333_s27, 2048, %s2335_s29, %s2342_s4, %s2267_s22, %s2267_s22, %s2268_s23  }
  0x25   : > { %p153_p11 = scmp.lt.s32.totalorder %s2264_s15, 3  ;;  %p3281_p13 = scmp.ge.s32.totalorder %s2264_s15, 1 }
  0x27   : > { %p154_p0 = pnand %p3281_p13, %p153_p11 }
  0x29   : > { %157 = sbr.rel (%p154_p0) target bundleno = 417 (0x1a1), region = 32 }
  0x2e   : > { %s159_s24 = sand.u32 1, %s2256_s13   ;;  %p3282_p7 = scmp.ne.s32.totalorder %s3279_s21, 0 }
  0x2f   : > { %s1626_s25 = sshll.u32 %s159_s24, 7  ;;  %s160_s26 = scalar_lea.sflag [#allocation3], %s159_s24 }
  0x30   : > { %s2367_s28 = scalar_lea.vmem [#allocation2], %s1626_s25 }
  0x31   : > { %2247 = dma.done.wait (%p3282_p7), %s160_s26, 2048  }
  0x32   : > { %2249 = vsyncadd (%p3282_p7), %s160_s26, 4294965248  ;;  %v224_v0 = vld [vmem:[%s3236_s1 + $0x78] sm:$0xff]  ;;  %v223_v1 = vld [vmem:[%s3236_s1 + $0x70] sm:$0xff]  ;;  %s1627_s18 = sshll.u32 %s1618_s16, 4  ;;  %vm1534_vm0 = vcmask 261120  }
  0x33   : > { %v222_v2 = vld [vmem:[%s3236_s1 + $0x68] sm:$0xff]  ;;  %v2382_v3 = vand.u32 4294901760, %v224_v0  ;;  %v2384_v4 = vand.u32 4294901760, %v223_v1  ;;  %v221_v6 = vld [vmem:[%s3236_s1 + $0x60] sm:$0xff]  ;;  %v220_v7 = vld [vmem:[%s3236_s1 + $0x58] sm:$0xff]  ;;  %p188_p8 = scmp.lt.s32.totalorder %s1627_s18, 31 }
  0x34   : > { %v2386_v5 = vand.u32 4294901760, %v222_v2  ;;  %v219_v8 = vld [vmem:[%s3236_s1 + $0x50] sm:$0xff]  ;;  %v2397_v9 = vand.u32 4294901760, %v221_v6  ;;  %v2399_v10 = vand.u32 4294901760, %v220_v7  ;;  %v218_v12 = vld [vmem:[%s3236_s1 + $0x48] sm:$0xff]  ;;  %v217_v13 = vld [vmem:[%s3236_s1 + $0x40] sm:$0xff] }
  0x35   : > { %v2401_v11 = vand.u32 4294901760, %v219_v8  ;;  %1825 = vmatprep.subr.mxu0 %v2382_v3  ;;  %v2411_v14 = vsub.f32 %v224_v0, %v2382_v3  ;;  %v2414_v15 = vsub.f32 %v223_v1, %v2384_v4  ;;  %v2416_v16 = vand.u32 4294901760, %v218_v12  ;;  %v216_v18 = vld [vmem:[%s3236_s1 + $0x38] sm:$0xff]  ;;  %v215_v25 = vld [vmem:[%s3236_s1 + $0x30] sm:$0xff]  ;;  %v214_v35 = vld [vmem:[%s3236_s1 + $0x28] sm:$0xff]  ;;  %s3365_s18 = smov (!%p188_p8, %s1627_s18), 31 }
  0x36   : > { %v2419_v17 = vsub.f32 %v222_v2, %v2386_v5  ;;  %1826 = vmatpush3.msra.mxu0 %v2382_v3  ;;  %v2426_v19 = vsub.f32 %v221_v6, %v2397_v9  ;;  %v2429_v20 = vsub.f32 %v220_v7, %v2399_v10  ;;  %v2441_v24 = vand.u32 4294901760, %v217_v13  ;;  %v213_v40 = vld [vmem:[%s3236_s1 + $0x20] sm:$0xff]  ;;  %v194_v49 = vld [vmem:[%s2367_s28 + $0x8] sm:$0xff]  ;;  %v212_v53 = vld [vmem:[%s3236_s1 + $0x18] sm:$0xff]  ;;  %s1628_s15 = sshll.u32 %s3365_s18, 3 }
  0x37   : > { %1827 = vmatprep.subr.mxu0 %v2384_v4  ;;  %v2433_v21 = vand.u32 4294901760, %v2411_v14  ;;  %v2436_v22 = vand.u32 4294901760, %v2414_v15  ;;  %v2450_v27 = vand.u32 4294901760, %v216_v18  ;;  %v2456_v29 = vsub.f32 %v219_v8, %v2401_v11  ;;  %v193_v47 = vld [vmem:[%s2367_s28] sm:$0xff]  ;;  %v211_v59 = vld [vmem:[%s3236_s1 + $0x10] sm:$0xff]  ;;  %v210_v6 = vld [vmem:[%s3236_s1 + $0x8] sm:$0xff]  ;;  %s3137_s22 = scalar_lea.vmem %s3238_s3, %s1628_s15 }
  0x38   : > { %v2439_v23 = vand.u32 4294901760, %v2419_v17  ;;  %1828 = vmatpush3.msra.mxu0 %v2384_v4  ;;  %v2448_v26 = vand.u32 4294901760, %v2426_v19  ;;  %v2453_v28 = vand.u32 4294901760, %v2429_v20  ;;  %v2466_v33 = vsub.f32 %v218_v12, %v2416_v16  ;;  %v195_v63 = vld [vmem:[%s2367_s28 + $0x10] sm:$0xff] }
  0x39   : > { %3283 = vst [vmem:[#allocation5_spill] sm:$0xff] %v2436_v22  ;;  %1829 = vmatprep.subr.mxu0 %v2386_v5  ;;  %v477_v30 = vsub.f32 %v2411_v14, %v2433_v21  ;;  %v484_v31 = vsub.f32 %v2414_v15, %v2436_v22  ;;  %v2469_v34 = vand.u32 4294901760, %v215_v25  ;;  %v2478_v39 = vand.u32 4294901760, %v2456_v29  ;;  %v202_v22 = vld [vmem:[%s2367_s28 + $0x48] sm:$0xff] }
  0x3a   : > { %3284 = vst [vmem:[#allocation6_spill] sm:$0xff] %v2439_v23  ;;  %3285 = vst [vmem:[#allocation7_spill] sm:$0xff] %v2448_v26  ;;  %v491_v32 = vsub.f32 %v2419_v17, %v2439_v23  ;;  %1830 = vmatpush3.msra.mxu0 %v2386_v5  ;;  %v498_v38 = vsub.f32 %v2426_v19, %v2448_v26  ;;  %v2485_v41 = vand.u32 4294901760, %v2466_v33  ;;  %v2493_v45 = vand.u32 4294901760, %v214_v35 }
  0x3b   : > { %3286 = vst [vmem:[#allocation8_spill] sm:$0xff] %v2453_v28  ;;  %1831 = vmatprep.subr.mxu0 %v2397_v9  ;;  %v478_v36 = vand.u32 4294901760, %v477_v30  ;;  %v485_v37 = vand.u32 4294901760, %v484_v31  ;;  %3287 = vst [vmem:[#allocation9_spill] sm:$0xff] %v2478_v39  ;;  %v2488_v42 = vsub.f32 %v217_v13, %v2441_v24  ;;  %v505_v44 = vsub.f32 %v2429_v20, %v2453_v28  ;;  %v209_v31 = vld [vmem:[%s3236_s1] sm:$0xff] }
  0x3c   : > { %1832 = vmatpush3.msra.mxu0 %v2397_v9  ;;  %3288 = vst [vmem:[#allocation10_spill] sm:$0xff] %v2485_v41  ;;  %v492_v43 = vand.u32 4294901760, %v491_v32  ;;  %v2496_v46 = vsub.f32 %v216_v18, %v2450_v27  ;;  %v2500_v48 = vand.u32 4294901760, %v213_v40  ;;  %v499_v50 = vand.u32 4294901760, %v498_v38  ;;  %v196_v18 = vld [vmem:[%s2367_s28 + $0x18] sm:$0xff] }
  0x3d   : > { %1833 = vmatprep.subr.mxu0 %v2399_v10  ;;  %1881 = vmatprep.subr.mxu1 %v478_v36  ;;  %v512_v51 = vsub.f32 %v2456_v29, %v2478_v39  ;;  %v2507_v52 = vand.u32 4294901760, %v2488_v42  ;;  %v2513_v54 = vsub.f32 %v215_v25, %v2469_v34  ;;  %v519_v55 = vsub.f32 %v2466_v33, %v2485_v41 }
  0x3e   : > { %1834 = vmatpush3.msra.mxu0 %v2399_v10  ;;  %1882 = vmatpush3.msra.mxu1 %v478_v36  ;;  %v2518_v56 = vand.u32 4294901760, %v193_v47  ;;  %v506_v57 = vand.u32 4294901760, %v505_v44  ;;  %v2522_v58 = vand.u32 4294901760, %v2496_v46  ;;  %v2528_v60 = vsub.f32 %v214_v35, %v2493_v45 }
  0x3f   : > { %1835 = vmatprep.subr.mxu0 %v2401_v11  ;;  %1883 = vmatprep.subr.mxu1 %v485_v37  ;;  %3289 = vst [vmem:[#allocation11_spill] sm:$0xff] %v2507_v52  ;;  %v2530_v61 = vand.u32 4294901760, %v194_v49  ;;  %v2533_v62 = vand.u32 4294901760, %v212_v53  ;;  %v513_v0 = vand.u32 4294901760, %v512_v51  ;;  %v526_v1 = vsub.f32 %v2488_v42, %v2507_v52 }
  0x40   : > { %1836 = vmatpush3.msra.mxu0 %v2401_v11  ;;  %1884 = vmatpush3.msra.mxu1 %v485_v37  ;;  %3290 = vst [vmem:[#allocation12_spill] sm:$0xff] %v2522_v58  ;;  %v2540_v2 = vand.u32 4294901760, %v2513_v54  ;;  %v2546_v7 = vsub.f32 %v213_v40, %v2500_v48  ;;  %v520_v8 = vand.u32 4294901760, %v519_v55  ;;  %v2549_v12 = vand.u32 4294901760, %v211_v59 }
  0x41   : > { %1837 = vmatprep.subr.mxu0 %v2416_v16  ;;  %1885 = vmatprep.subr.mxu1 %v492_v43  ;;  %v2552_v13 = vsub.f32 %v193_v47, %v2518_v56  ;;  %v533_v25 = vsub.f32 %v2496_v46, %v2522_v58  ;;  %v2559_v30 = vand.u32 4294901760, %v2528_v60  ;;  %v2565_v32 = vsub.f32 %v194_v49, %v2530_v61  ;;  %v197_v47 = vld [vmem:[%s2367_s28 + $0x20] sm:$0xff] }
  0x42   : > { %1838 = vmatpush3.msra.mxu0 %v2416_v16  ;;  %1886 = vmatpush3.msra.mxu1 %v492_v43  ;;  %3291 = vst [vmem:[#allocation13_spill] sm:$0xff] %v2540_v2  ;;  %v2567_v35 = vand.u32 4294901760, %v195_v63  ;;  %v2570_v36 = vand.u32 4294901760, %v210_v6  ;;  %v2573_v37 = vsub.f32 %v212_v53, %v2533_v62  ;;  %v527_v38 = vand.u32 4294901760, %v526_v1 }
  0x43   : > { %1839 = vmatprep.subr.mxu0 %v2441_v24  ;;  %1887 = vmatprep.subr.mxu1 %v499_v50  ;;  %3292 = vst [vmem:[#allocation14_spill] sm:$0xff] %v2559_v30  ;;  %v540_v40 = vsub.f32 %v2513_v54, %v2540_v2  ;;  %v2579_v43 = vand.u32 4294901760, %v2546_v7  ;;  %v2581_v44 = vand.u32 4294901760, %v196_v18  ;;  %v2585_v49 = vand.u32 4294901760, %v209_v31 }
  0x44   : > { %1840 = vmatpush3.msra.mxu0 %v2441_v24  ;;  %1888 = vmatpush3.msra.mxu1 %v499_v50  ;;  %3293 = vst [vmem:[#allocation15_spill] sm:$0xff] %v2570_v36  ;;  %v2589_v51 = vsub.f32 %v211_v59, %v2549_v12  ;;  %v534_v53 = vand.u32 4294901760, %v533_v25  ;;  %v547_v55 = vsub.f32 %v2528_v60, %v2559_v30  ;;  %v2601_v50 = vand.u32 4294901760, %v2573_v37 }
  0x45   : > { %1841 = vmatprep.subr.mxu0 %v2450_v27  ;;  %1889 = vmatprep.subr.mxu1 %v506_v57  ;;  %3294 = vst [vmem:[#allocation16_spill] sm:$0xff] %v2579_v43  ;;  %v2596_v1 = vsub.f32 %v195_v63, %v2567_v35  ;;  %v2604_v59 = vsub.f32 %v210_v6, %v2570_v36  ;;  %v2606_v2 = vand.u32 4294901760, %v197_v47  ;;  %v541_v25 = vand.u32 4294901760, %v540_v40 }
  0x46   : > { %1842 = vmatpush3.msra.mxu0 %v2450_v27  ;;  %1890 = vmatpush3.msra.mxu1 %v506_v57  ;;  %3296 = vst [vmem:[#allocation18_spill] sm:$0xff] %v2601_v50  ;;  %v554_v63 = vsub.f32 %v2546_v7, %v2579_v43  ;;  %v2612_v57 = vsub.f32 %v196_v18, %v2581_v44  ;;  %v2619_v30 = vand.u32 4294901760, %v2589_v51  ;;  %v548_v40 = vand.u32 4294901760, %v547_v55 }
  0x47   : > { %1843 = vmatprep.subr.mxu0 %v2469_v34  ;;  %1891 = vmatprep.subr.mxu1 %v513_v0  ;;  %3295 = vst [vmem:[#allocation17_spill] sm:$0xff] %v2596_v1  ;;  %v3299_v18 = vand.u32 4294901760, %v2565_v32  ;;  %v2629_v52 = vsub.f32 %v209_v31, %v2585_v49  ;;  %v561_v41 = vsub.f32 %v2573_v37, %v2601_v50  ;;  %v2636_v39 = vand.u32 4294901760, %v2604_v59 }
  0x48   : > { %1844 = vmatpush3.msra.mxu0 %v2469_v34  ;;  %1892 = vmatpush3.msra.mxu1 %v513_v0  ;;  %v198_v0 = vld [vmem:[%s2367_s28 + $0x28] sm:$0xff]  ;;  %3298 = vst [vmem:[#allocation19_spill] sm:$0xff] %v2619_v30  ;;  %v2639_v55 = vsub.f32 %v197_v47, %v2606_v2  ;;  %v568_v50 = vsub.f32 %v2589_v51, %v2619_v30  ;;  %v3301_v31 = vand.u32 4294901760, %v2596_v1 }
  0x49   : > { %1845 = vmatprep.subr.mxu0 %v2493_v45  ;;  %1893 = vmatprep.subr.mxu1 %v520_v8  ;;  %v2621_v58 = vand.u32 4294901760, %v198_v0  ;;  %v326_v43 = vsub.f32 %v2565_v32, %v3299_v18  ;;  %3300 = vst [vmem:[#allocation20_spill] sm:$0xff] %v2636_v39  ;;  %v555_v18 = vand.u32 4294901760, %v554_v63 }
  0x4a   : > { %1846 = vmatpush3.msra.mxu0 %v2493_v45  ;;  %1894 = vmatpush3.msra.mxu1 %v520_v8  ;;  %v3297_v8 = vand.u32 4294901760, %v2552_v13  ;;  %v336_v26 = vsub.f32 %v2596_v1, %v3301_v31  ;;  %v201_v1 = vld [vmem:[%s2367_s28 + $0x40] sm:$0xff] }
  0x4b   : > { %1847 = vmatprep.subr.mxu0 %v2500_v48  ;;  %1895 = vmatprep.subr.mxu1 %v527_v38  ;;  %v2648_v28 = vsub.f32 %v198_v0, %v2621_v58  ;;  %v327_v63 = vand.u32 4294901760, %v326_v43  ;;  %v575_v0 = vsub.f32 %v2604_v59, %v2636_v39  ;;  %v3303_v43 = vand.u32 4294901760, %v2612_v57 }
  0x4c   : > { %1848 = vmatpush3.msra.mxu0 %v2500_v48  ;;  %1896 = vmatpush3.msra.mxu1 %v527_v38  ;;  %v316_v6 = vsub.f32 %v2552_v13, %v3297_v8  ;;  %v199_v8 = vld [vmem:[%s2367_s28 + $0x30] sm:$0xff]  ;;  %v200_v38 = vld [vmem:[%s2367_s28 + $0x38] sm:$0xff]  ;;  %v337_v30 = vand.u32 4294901760, %v336_v26 }
  0x4d   : > { %1849 = vmatprep.subr.mxu0 %v2533_v62  ;;  %1897 = vmatprep.subr.mxu1 %v534_v53  ;;  %v2650_v47 = vand.u32 4294901760, %v199_v8  ;;  %v2663_v23 = vand.u32 4294901760, %v200_v38  ;;  %v346_v31 = vsub.f32 %v2612_v57, %v3303_v43  ;;  %v576_v43 = vand.u32 4294901760, %v575_v0 }
  0x4e   : > { %1850 = vmatpush3.msra.mxu0 %v2533_v62  ;;  %1898 = vmatpush3.msra.mxu1 %v534_v53  ;;  %v317_v53 = vand.u32 4294901760, %v316_v6  ;;  %v562_v6 = vand.u32 4294901760, %v561_v41  ;;  %v569_v41 = vand.u32 4294901760, %v568_v50 }
  0x4f   : > { %1851 = vmatprep.subr.mxu0 %v2549_v12  ;;  %1899 = vmatprep.subr.mxu1 %v541_v25  ;;  %v2673_v39 = vsub.f32 %v199_v8, %v2650_v47  ;;  %v2685_v8 = vand.u32 4294901760, %v201_v1  ;;  %v347_v26 = vand.u32 4294901760, %v346_v31 }
  0x50   : > { %1852 = vmatpush3.msra.mxu0 %v2549_v12  ;;  %1900 = vmatpush3.msra.mxu1 %v541_v25  ;;  %v2657_v25 = vand.u32 4294901760, %v2629_v52 }
  0x51   : > { %1853 = vmatprep.subr.mxu0 %v2570_v36  ;;  %1901 = vmatprep.subr.mxu1 %v548_v40  ;;  %v3277_v0 = vand.u32 4294901760, %v2673_v39  ;;  %v2699_v31 = vsub.f32 %v201_v1, %v2685_v8 }
  0x52   : > { %3302 = vst [vmem:[#allocation21_spill] sm:$0xff] %v2657_v25  ;;  %1854 = vmatpush3.msra.mxu0 %v2570_v36  ;;  %1902 = vmatpush3.msra.mxu1 %v548_v40  ;;  %v582_v36 = vsub.f32 %v2629_v52, %v2657_v25  ;;  %v2683_v40 = vsub.f32 %v200_v38, %v2663_v23  ;;  %v203_v25 = vld [vmem:[%s2367_s28 + $0x50] sm:$0xff] }
  0x53   : > { %1855 = vmatprep.subr.mxu0 %v2585_v49  ;;  %1903 = vmatprep.subr.mxu1 %v555_v18  ;;  %v3274_v1 = vand.u32 4294901760, %v2699_v31 }
  0x54   : > { %1856 = vmatpush3.msra.mxu0 %v2585_v49  ;;  %1857 = vmatprep.mubr.f32.mxu0 %v317_v53  ;;  %v3304_v53 = vand.u32 4294901760, %v2639_v55  ;;  %v583_v38 = vand.u32 4294901760, %v582_v36 }
  0x55   : > { %1904 = vmatpush3.msra.mxu1 %v555_v18  ;;  %1858 = vmatmul.mubr.f32.vlgmr.msra.gmra.mxu0 %v327_v63  ;;  %v3305_v18 = vand.u32 4294901760, %v2648_v28 }
  0x56   : > { %1905 = vmatprep.subr.mxu1 %v562_v6  ;;  %1937 = vmatprep.subr.mxu0 %v2411_v14  ;;  %v356_v50 = vsub.f32 %v2639_v55, %v3304_v53  ;;  %v2693_v53 = vand.u32 4294901760, %v202_v22 }
  0x57   : > { %1906 = vmatpush3.msra.mxu1 %v562_v6  ;;  %1938 = vmatpush3.msra.mxu0 %v2411_v14  ;;  %v366_v63 = vsub.f32 %v2648_v28, %v3305_v18  ;;  %v3275_v6 = vand.u32 4294901760, %v2683_v40  ;;  %v204_v18 = vld [vmem:[%s2367_s28 + $0x58] sm:$0xff] }
  0x58   : > { %1907 = vmatprep.subr.mxu1 %v569_v41  ;;  %1939 = vmatprep.subr.mxu0 %v2414_v15  ;;  %v357_v14 = vand.u32 4294901760, %v356_v50  ;;  %v2708_v36 = vsub.f32 %v202_v22, %v2693_v53  ;;  %v205_v22 = vld [vmem:[%s2367_s28 + $0x60] sm:$0xff] }
  0x59   : > { %1860 = vmatprep.mubr.f32.mxu0 %v337_v30  ;;  %1908 = vmatpush3.msra.mxu1 %v569_v41  ;;  %v367_v30 = vand.u32 4294901760, %v366_v63  ;;  %v2710_v41 = vand.u32 4294901760, %v203_v25 }
  0x5a   : > { %1940 = vmatpush3.msra.mxu0 %v2414_v15  ;;  %1909 = vmatprep.subr.mxu1 %v576_v43  ;;  %v376_v15 = vsub.f32 %v2673_v39, %v3277_v0 }
  0x5b   : > { %1861 = vmatmul.mubr.f32.gmra.mxu0 %v347_v26  ;;  %1941 = vmatprep.subr.mxu0 %v2419_v17  ;;  %v3276_v26 = vand.u32 4294901760, %v2708_v36  ;;  %v2725_v63 = vsub.f32 %v203_v25, %v2710_v41  ;;  %v2738_v25 = vand.u32 4294901760, %v205_v22 }
  0x5c   : > { %1910 = vmatpush3.msra.mxu1 %v576_v43  ;;  %1942 = vmatpush3.msra.mxu0 %v2419_v17  ;;  %v386_v17 = vsub.f32 %v2683_v40, %v3275_v6  ;;  %v2717_v43 = vand.u32 4294901760, %v204_v18  ;;  %v377_v50 = vand.u32 4294901760, %v376_v15 }
  0x5d   : > { %1911 = vmatprep.subr.mxu1 %v583_v38  ;;  %1943 = vmatprep.subr.mxu0 %v2426_v19  ;;  %v3278_v15 = vand.u32 4294901760, %v2725_v63  ;;  %v2755_v6 = vsub.f32 %v205_v22, %v2738_v25 }
  0x5e   : > { %1863 = vmatprep.mubr.f32.mxu0 %v357_v14  ;;  %1912 = vmatpush3.msra.mxu1 %v583_v38  ;;  %v206_v38 = vld [vmem:[%s2367_s28 + $0x68] sm:$0xff]  ;;  %v396_v14 = vsub.f32 %v2699_v31, %v3274_v1 }
  0x5f   : > { %1913 = vmatprep.mubr.f32.mxu1 %v2518_v56  ;;  %1944 = vmatpush3.msra.mxu0 %v2426_v19  ;;  %v387_v19 = vand.u32 4294901760, %v386_v17  ;;  %v2747_v17 = vand.u32 4294901760, %v206_v38  ;;  %v435_v22 = vand.u32 4294901760, %v2755_v6 }
  0x60   : > { %1864 = vmatmul.mubr.f32.gmra.mxu0 %v367_v30  ;;  %1914 = vmatmul.mubr.f32.vlgmr.msra.gmra.mxu1 %v2530_v61  ;;  %v2736_v30 = vsub.f32 %v204_v18, %v2717_v43  ;;  %v207_v18 = vld [vmem:[%s2367_s28 + $0x70] sm:$0xff]  ;;  %v397_v1 = vand.u32 4294901760, %v396_v14 }
  0x61   : > { %1945 = vmatprep.subr.mxu0 %v2429_v20  ;;  %1993 = vmatprep.subr.mxu1 %v2382_v3  ;;  %v2766_v14 = vsub.f32 %v206_v38, %v2747_v17  ;;  %v2768_v0 = vand.u32 4294901760, %v207_v18 }
  0x62   : > { %1946 = vmatpush3.msra.mxu0 %v2429_v20  ;;  %1994 = vmatpush3.msra.mxu1 %v2382_v3  ;;  %v406_v20 = vsub.f32 %v2708_v36, %v3276_v26  ;;  %v208_v26 = vld [vmem:[%s2367_s28 + $0x78] sm:$0xff] }
  0x63   : > { %1947 = vmatprep.subr.mxu0 %v2456_v29  ;;  %1995 = vmatprep.subr.mxu1 %v2384_v4 }
  0x64   : > { %1866 = vmatprep.mubr.f32.mxu0 %v377_v50  ;;  %1916 = vmatprep.mubr.f32.mxu1 %v2567_v35  ;;  %v425_v50 = vand.u32 4294901760, %v2736_v30 }
  0x65   : > { %1948 = vmatpush3.msra.mxu0 %v2456_v29  ;;  %1996 = vmatpush3.msra.mxu1 %v2384_v4  ;;  %v407_v29 = vand.u32 4294901760, %v406_v20  ;;  %v2777_v20 = vand.u32 4294901760, %v208_v26 }
  0x66   : > { %1867 = vmatmul.mubr.f32.gmra.mxu0 %v387_v19  ;;  %1917 = vmatmul.mubr.f32.gmra.mxu1 %v2581_v44  ;;  %v416_v19 = vsub.f32 %v2725_v63, %v3278_v15  ;;  %v2784_v15 = vsub.f32 %v207_v18, %v2768_v0 }
  0x67   : > { %1949 = vmatprep.subr.mxu0 %v2466_v33  ;;  %1997 = vmatprep.subr.mxu1 %v2386_v5 }
  0x68   : > { %1950 = vmatpush3.msra.mxu0 %v2466_v33  ;;  %1998 = vmatpush3.msra.mxu1 %v2386_v5  ;;  %v426_v33 = vsub.f32 %v2736_v30, %v425_v50  ;;  %v417_v38 = vand.u32 4294901760, %v416_v19  ;;  %v2794_v19 = vsub.f32 %v208_v26, %v2777_v20  ;;  %v455_v18 = vand.u32 4294901760, %v2784_v15 }
  0x69   : > { %1951 = vmatprep.subr.mxu0 %v2488_v42  ;;  %1999 = vmatprep.subr.mxu1 %v2397_v9 }
  0x6a   : > { %1869 = vmatprep.mubr.f32.mxu0 %v397_v1  ;;  %1919 = vmatprep.mubr.f32.mxu1 %v2606_v2  ;;  %v445_v1 = vand.u32 4294901760, %v2766_v14 }
  0x6b   : > { %1952 = vmatpush3.msra.mxu0 %v2488_v42  ;;  %2000 = vmatpush3.msra.mxu1 %v2397_v9  ;;  %v427_v42 = vand.u32 4294901760, %v426_v33  ;;  %v465_v33 = vand.u32 4294901760, %v2794_v19 }
  0x6c   : > { %1870 = vmatmul.mubr.f32.gmra.mxu0 %v407_v29  ;;  %1920 = vmatmul.mubr.f32.gmra.mxu1 %v2621_v58  ;;  %v436_v29 = vsub.f32 %v2755_v6, %v435_v22 }
  0x6d   : > { %1953 = vmatprep.subr.mxu0 %v2496_v46  ;;  %2001 = vmatprep.subr.mxu1 %v2399_v10 }
  0x6e   : > { %1954 = vmatpush3.msra.mxu0 %v2496_v46  ;;  %2002 = vmatpush3.msra.mxu1 %v2399_v10  ;;  %v446_v46 = vsub.f32 %v2766_v14, %v445_v1  ;;  %v437_v26 = vand.u32 4294901760, %v436_v29 }
  0x6f   : > { %1955 = vmatprep.subr.mxu0 %v2513_v54  ;;  %2003 = vmatprep.subr.mxu1 %v2401_v11 }
  0x70   : > { %1872 = vmatprep.mubr.f32.mxu0 %v417_v38  ;;  %1922 = vmatprep.mubr.f32.mxu1 %v2650_v47  ;;  %v447_v38 = vand.u32 4294901760, %v446_v46  ;;  %v3312_v46 = vand.u32 4294901760, %v2565_v32 }
  0x71   : > { %1956 = vmatpush3.msra.mxu0 %v2513_v54  ;;  %2004 = vmatpush3.msra.mxu1 %v2401_v11  ;;  %v456_v54 = vsub.f32 %v2784_v15, %v455_v18 }
  0x72   : > { %1873 = vmatmul.mubr.f32.gmra.mxu0 %v427_v42  ;;  %1923 = vmatmul.mubr.f32.gmra.mxu1 %v2663_v23  ;;  %v466_v42 = vsub.f32 %v2794_v19, %v465_v33 }
  0x73   : > { %1957 = vmatprep.subr.mxu0 %v2528_v60  ;;  %2005 = vmatprep.subr.mxu1 %v2416_v16 }
  0x74   : > { %1958 = vmatpush3.msra.mxu0 %v2528_v60  ;;  %2006 = vmatpush3.msra.mxu1 %v2416_v16  ;;  %v457_v60 = vand.u32 4294901760, %v456_v54  ;;  %v467_v29 = vand.u32 4294901760, %v466_v42  ;;  %v3317_v54 = vld [vmem:[#allocation10_spill] sm:$0xff]  ;;  %v3321_v42 = vld [vmem:[#allocation12_spill] sm:$0xff] }
  0x75   : > { %1959 = vmatprep.subr.mxu0 %v2546_v7  ;;  %2007 = vmatprep.subr.mxu1 %v2441_v24 }
  0x76   : > { %1875 = vmatprep.mubr.f32.mxu0 %v437_v26  ;;  %1925 = vmatprep.mubr.f32.mxu1 %v2685_v8  ;;  %v3313_v26 = vld [vmem:[#allocation8_spill] sm:$0xff] }
  0x77   : > { %1960 = vmatpush3.msra.mxu0 %v2546_v7  ;;  %2008 = vmatpush3.msra.mxu1 %v2441_v24  ;;  %v3306_v7 = vld [vmem:[#allocation5_spill] sm:$0xff] }
  0x78   : > { %1876 = vmatmul.mubr.f32.gmra.mxu0 %v447_v38  ;;  %1926 = vmatmul.mubr.f32.gmra.mxu1 %v2693_v53  ;;  %v3314_v38 = vld [vmem:[#allocation9_spill] sm:$0xff] }
  0x79   : > { %1961 = vmatprep.subr.mxu0 %v2573_v37  ;;  %2009 = vmatprep.subr.mxu1 %v2450_v27 }
  0x7a   : > { %1962 = vmatpush3.msra.mxu0 %v2573_v37  ;;  %2010 = vmatpush3.msra.mxu1 %v2450_v27  ;;  %v3308_v37 = vld [vmem:[#allocation15_spill] sm:$0xff] }
  0x7b   : > { %1963 = vmatprep.subr.mxu0 %v2589_v51  ;;  %2011 = vmatprep.subr.mxu1 %v2469_v34 }
  0x7c   : > { %1878 = vmatprep.mubr.f32.mxu0 %v457_v60  ;;  %1928 = vmatprep.mubr.f32.mxu1 %v2710_v41 }
  0x7d   : > { %1964 = vmatpush3.msra.mxu0 %v2589_v51  ;;  %2012 = vmatpush3.msra.mxu1 %v2469_v34  ;;  %v3309_v51 = vld [vmem:[#allocation6_spill] sm:$0xff] }
  0x7e   : > { %1879 = vmatmul.mubr.f32.gmra.mxu0 %v467_v29  ;;  %1929 = vmatmul.mubr.f32.gmra.mxu1 %v2717_v43 }
  0x7f   : > { %1965 = vmatprep.subr.mxu0 %v2604_v59  ;;  %2013 = vmatprep.subr.mxu1 %v2493_v45 }
  0x80   : > { %1966 = vmatpush3.msra.mxu0 %v2604_v59  ;;  %2014 = vmatpush3.msra.mxu1 %v2493_v45  ;;  %v3311_v59 = vand.u32 4294901760, %v2552_v13 }
  0x81   : > { %1967 = vmatprep.subr.mxu0 %v2629_v52  ;;  %2015 = vmatprep.subr.mxu1 %v2500_v48 }
  0x82   : > { %1931 = vmatprep.mubr.f32.mxu1 %v2738_v25  ;;  %1968 = vmatpush3.msra.mxu0 %v2629_v52  ;;  %v3307_v52 = vld [vmem:[#allocation17_spill] sm:$0xff] }
  0x83   : > { %1969 = vmatprep.mubr.f32.mxu0 %v2552_v13  ;;  %2016 = vmatpush3.msra.mxu1 %v2500_v48  ;;  %v3315_v13 = vand.u32 4294901760, %v3307_v52 }
  0x84   : > { %1932 = vmatmul.mubr.f32.gmra.mxu1 %v2747_v17  ;;  %1970 = vmatmul.mubr.f32.vlgmr.msra.gmra.mxu0 %v2565_v32  ;;  %v3316_v32 = vand.u32 4294901760, %v2612_v57 }
  0x85   : > { %2017 = vmatprep.subr.mxu1 %v2533_v62  ;;  %2049 = vmatprep.subr.mxu0 %v2433_v21 }
  0x86   : > { %2018 = vmatpush3.msra.mxu1 %v2533_v62  ;;  %2050 = vmatpush3.msra.mxu0 %v2433_v21  ;;  %v3310_v21 = vld [vmem:[#allocation7_spill] sm:$0xff] }
  0x87   : > { %2019 = vmatprep.subr.mxu1 %v2549_v12  ;;  %2051 = vmatprep.subr.mxu0 %v3306_v7 }
  0x88   : > { %1934 = vmatprep.mubr.f32.mxu1 %v2768_v0  ;;  %1972 = vmatprep.mubr.f32.mxu0 %v3307_v52 }
  0x89   : > { %2020 = vmatpush3.msra.mxu1 %v2549_v12  ;;  %2052 = vmatpush3.msra.mxu0 %v3306_v7 }
  0x8a   : > { %1935 = vmatmul.mubr.f32.gmra.mxu1 %v2777_v20  ;;  %1973 = vmatmul.mubr.f32.gmra.mxu0 %v2612_v57  ;;  %v3320_v57 = vand.u32 4294901760, %v2648_v28 }
  0x8b   : > { %2021 = vmatprep.subr.mxu1 %v3308_v37  ;;  %2053 = vmatprep.subr.mxu0 %v3309_v51 }
  0x8c   : > { %2022 = vmatpush3.msra.mxu1 %v3308_v37  ;;  %2054 = vmatpush3.msra.mxu0 %v3309_v51 }
  0x8d   : > { %2023 = vmatprep.subr.mxu1 %v2585_v49  ;;  %2055 = vmatprep.subr.mxu0 %v3310_v21 }
  0x8e   : > { %1975 = vmatprep.mubr.f32.mxu0 %v2639_v55  ;;  %2024 = vmatpush3.msra.mxu1 %v2585_v49 }
  0x8f   : > { %2025 = vmatprep.mubr.f32.mxu1 %v3311_v59  ;;  %2056 = vmatpush3.msra.mxu0 %v3310_v21 }
  0x90   : > { %1976 = vmatmul.mubr.f32.gmra.mxu0 %v2648_v28  ;;  %2026 = vmatmul.mubr.f32.vlgmr.msra.gmra.mxu1 %v3312_v46  ;;  %v3324_v28 = vand.u32 4294901760, %v2683_v40 }
  0x91   : > { %2057 = vmatprep.subr.mxu0 %v3313_v26  ;;  %2105 = vmatprep.subr.mxu1 %v2382_v3 }
  0x92   : > { %2058 = vmatpush3.msra.mxu0 %v3313_v26  ;;  %2106 = vmatpush3.msra.mxu1 %v2382_v3  ;;  %v3318_v3 = vld [vmem:[#allocation11_spill] sm:$0xff] }
  0x93   : > { %2059 = vmatprep.subr.mxu0 %v3314_v38  ;;  %2107 = vmatprep.subr.mxu1 %v2384_v4 }
  0x94   : > { %1978 = vmatprep.mubr.f32.mxu0 %v2673_v39  ;;  %2028 = vmatprep.mubr.f32.mxu1 %v3315_v13 }
  0x95   : > { %2060 = vmatpush3.msra.mxu0 %v3314_v38  ;;  %2108 = vmatpush3.msra.mxu1 %v2384_v4  ;;  %v3319_v4 = vand.u32 4294901760, %v2639_v55  ;;  %v3325_v55 = vld [vmem:[#allocation14_spill] sm:$0xff] }
  0x96   : > { %1979 = vmatmul.mubr.f32.gmra.mxu0 %v2683_v40  ;;  %2029 = vmatmul.mubr.f32.gmra.mxu1 %v3316_v32  ;;  %v3329_v40 = vld [vmem:[#allocation18_spill] sm:$0xff] }
  0x97   : > { %2061 = vmatprep.subr.mxu0 %v3317_v54  ;;  %2109 = vmatprep.subr.mxu1 %v2386_v5 }
  0x98   : > { %2062 = vmatpush3.msra.mxu0 %v3317_v54  ;;  %2110 = vmatpush3.msra.mxu1 %v2386_v5  ;;  %v3322_v5 = vld [vmem:[#allocation13_spill] sm:$0xff] }
  0x99   : > { %2063 = vmatprep.subr.mxu0 %v3318_v3  ;;  %2111 = vmatprep.subr.mxu1 %v2397_v9 }
  0x9a   : > { %1981 = vmatprep.mubr.f32.mxu0 %v2699_v31  ;;  %2031 = vmatprep.mubr.f32.mxu1 %v3319_v4 }
  0x9b   : > { %2064 = vmatpush3.msra.mxu0 %v3318_v3  ;;  %2112 = vmatpush3.msra.mxu1 %v2397_v9  ;;  %v3323_v9 = vand.u32 4294901760, %v2673_v39  ;;  %v3328_v39 = vand.u32 4294901760, %v2708_v36 }
  0x9c   : > { %1982 = vmatmul.mubr.f32.gmra.mxu0 %v2708_v36  ;;  %2032 = vmatmul.mubr.f32.gmra.mxu1 %v3320_v57 }
  0x9d   : > { %2065 = vmatprep.subr.mxu0 %v3321_v42  ;;  %2113 = vmatprep.subr.mxu1 %v2399_v10 }
  0x9e   : > { %2066 = vmatpush3.msra.mxu0 %v3321_v42  ;;  %2114 = vmatpush3.msra.mxu1 %v2399_v10  ;;  %v3326_v10 = vld [vmem:[#allocation16_spill] sm:$0xff] }
  0x9f   : > { %2067 = vmatprep.subr.mxu0 %v3322_v5  ;;  %2115 = vmatprep.subr.mxu1 %v2401_v11 }
  0xa0   : > { %1984 = vmatprep.mubr.f32.mxu0 %v2725_v63  ;;  %2034 = vmatprep.mubr.f32.mxu1 %v3323_v9 }
  0xa1   : > { %2068 = vmatpush3.msra.mxu0 %v3322_v5  ;;  %2116 = vmatpush3.msra.mxu1 %v2401_v11  ;;  %v3327_v11 = vand.u32 4294901760, %v2699_v31  ;;  %v3332_v31 = vld [vmem:[#allocation20_spill] sm:$0xff] }
  0xa2   : > { %1985 = vmatmul.mubr.f32.gmra.mxu0 %v2736_v30  ;;  %2035 = vmatmul.mubr.f32.gmra.mxu1 %v3324_v28 }
  0xa3   : > { %2069 = vmatprep.subr.mxu0 %v3325_v55  ;;  %2117 = vmatprep.subr.mxu1 %v2416_v16 }
  0xa4   : > { %2070 = vmatpush3.msra.mxu0 %v3325_v55  ;;  %2118 = vmatpush3.msra.mxu1 %v2416_v16  ;;  %v3330_v16 = vld [vmem:[#allocation19_spill] sm:$0xff] }
  0xa5   : > { %2071 = vmatprep.subr.mxu0 %v3326_v10  ;;  %2119 = vmatprep.subr.mxu1 %v2441_v24 }
  0xa6   : > { %1987 = vmatprep.mubr.f32.mxu0 %v2755_v6  ;;  %2037 = vmatprep.mubr.f32.mxu1 %v3327_v11 }
  0xa7   : > { %2072 = vmatpush3.msra.mxu0 %v3326_v10  ;;  %2120 = vmatpush3.msra.mxu1 %v2441_v24  ;;  %v3331_v24 = vand.u32 4294901760, %v2725_v63 }
  0xa8   : > { %1988 = vmatmul.mubr.f32.gmra.mxu0 %v2766_v14  ;;  %2038 = vmatmul.mubr.f32.gmra.mxu1 %v3328_v39  ;;  %v3098_v39 = vld [vmem:[%s3237_s2] ss:$0 sm:$0xff] }
  0xa9   : > { %2073 = vmatprep.subr.mxu0 %v3329_v40  ;;  %2121 = vmatprep.subr.mxu1 %v2450_v27 }
  0xaa   : > { %2074 = vmatpush3.msra.mxu0 %v3329_v40  ;;  %2122 = vmatpush3.msra.mxu1 %v2450_v27  ;;  %v3333_v27 = vld [vmem:[#allocation21_spill] sm:$0xff] }
  0xab   : > { %2075 = vmatprep.subr.mxu0 %v3330_v16  ;;  %2123 = vmatprep.subr.mxu1 %v2469_v34 }
  0xac   : > { %1990 = vmatprep.mubr.f32.mxu0 %v2784_v15  ;;  %2040 = vmatprep.mubr.f32.mxu1 %v3331_v24 }
  0xad   : > { %2076 = vmatpush3.msra.mxu0 %v3330_v16  ;;  %2124 = vmatpush3.msra.mxu1 %v2469_v34 }
  0xae   : > { %1991 = vmatmul.mubr.f32.gmra.mxu0 %v2794_v19  ;;  %2041 = vmatmul.mubr.f32.gmra.mxu1 %v425_v50 }
  0xaf   : > { %2077 = vmatprep.subr.mxu0 %v3332_v31  ;;  %2125 = vmatprep.subr.mxu1 %v2493_v45 }
  0xb0   : > { %2078 = vmatpush3.msra.mxu0 %v3332_v31  ;;  %2126 = vmatpush3.msra.mxu1 %v2493_v45 }
  0xb1   : > { %2079 = vmatprep.subr.mxu0 %v3333_v27  ;;  %2127 = vmatprep.subr.mxu1 %v2500_v48 }
  0xb2   : > { %2043 = vmatprep.mubr.f32.mxu1 %v435_v22  ;;  %2080 = vmatpush3.msra.mxu0 %v3333_v27 }
  0xb3   : > { %2081 = vmatprep.mubr.f32.mxu0 %v2518_v56  ;;  %2128 = vmatpush3.msra.mxu1 %v2500_v48 }
  0xb4   : > { %2044 = vmatmul.mubr.f32.gmra.mxu1 %v445_v1  ;;  %2082 = vmatmul.mubr.f32.vlgmr.msra.gmra.mxu0 %v2530_v61 }
  0xb5   : > { %2129 = vmatprep.subr.mxu1 %v2533_v62  ;;  %2046 = vmatprep.mubr.f32.mxu1 %v455_v18 }
  0xb6   : > { %2130 = vmatpush3.msra.mxu1 %v2533_v62  ;;  %2084 = vmatprep.mubr.f32.mxu0 %v2567_v35 }
  0xb7   : > { %2131 = vmatprep.subr.mxu1 %v2549_v12 }
  0xb8   : > { %2132 = vmatpush3.msra.mxu1 %v2549_v12  ;;  %2085 = vmatmul.mubr.f32.gmra.mxu0 %v2581_v44 }
  0xb9   : > { %2047 = vmatmul.mubr.f32.gmra.mxu1 %v465_v33  ;;  %2133 = vmatprep.subr.mxu1 %v3308_v37 }
  0xba   : > { %2134 = vmatpush3.msra.mxu1 %v3308_v37  ;;  %2087 = vmatprep.mubr.f32.mxu0 %v2606_v2 }
  0xbb   : > { %2135 = vmatprep.subr.mxu1 %v2585_v49  ;;  %2137 = vmatprep.mubr.f32.mxu1 %v2518_v56 }
  0xbc   : > { %2136 = vmatpush3.msra.mxu1 %v2585_v49  ;;  %2088 = vmatmul.mubr.f32.gmra.mxu0 %v2621_v58 }
  0xbd   : > { %2138 = vmatmul.mubr.f32.vlgmr.msra.gmra.mxu1 %v2530_v61  ;;  %2090 = vmatprep.mubr.f32.mxu0 %v2650_v47 }
  0xbe   : > { %2140 = vmatprep.mubr.f32.mxu1 %v2567_v35 }
  0xc0   : > { %2091 = vmatmul.mubr.f32.gmra.mxu0 %v2663_v23 }
  0xc1   : > { %2141 = vmatmul.mubr.f32.gmra.mxu1 %v2581_v44  ;;  %2093 = vmatprep.mubr.f32.mxu0 %v2685_v8 }
  0xc2   : > { %2143 = vmatprep.mubr.f32.mxu1 %v2606_v2 }
  0xc4   : > { %2094 = vmatmul.mubr.f32.gmra.mxu0 %v2693_v53 }
  0xc5   : > { %2144 = vmatmul.mubr.f32.gmra.mxu1 %v2621_v58  ;;  %2096 = vmatprep.mubr.f32.mxu0 %v2710_v41 }
  0xc6   : > { %2146 = vmatprep.mubr.f32.mxu1 %v2650_v47 }
  0xc8   : > { %2097 = vmatmul.mubr.f32.gmra.mxu0 %v2717_v43 }
  0xc9   : > { %2147 = vmatmul.mubr.f32.gmra.mxu1 %v2663_v23  ;;  %2099 = vmatprep.mubr.f32.mxu0 %v2738_v25 }
  0xca   : > { %2149 = vmatprep.mubr.f32.mxu1 %v2685_v8 }
  0xcc   : > { %2100 = vmatmul.mubr.f32.gmra.mxu0 %v2747_v17 }
  0xcd   : > { %2150 = vmatmul.mubr.f32.gmra.mxu1 %v2693_v53  ;;  %2102 = vmatprep.mubr.f32.mxu0 %v2768_v0 }
  0xce   : > { %2152 = vmatprep.mubr.f32.mxu1 %v2710_v41 }
  0xd0   : > { %2103 = vmatmul.mubr.f32.gmra.mxu0 %v2777_v20 }
  0xd1   : > { %2153 = vmatmul.mubr.f32.gmra.mxu1 %v2717_v43 }
  0xd2   : > { %2155 = vmatprep.mubr.f32.mxu1 %v2738_v25 }
  0xd5   : > { %2156 = vmatmul.mubr.f32.gmra.mxu1 %v2747_v17 }
  0xd6   : > { %2158 = vmatprep.mubr.f32.mxu1 %v2768_v0 }
  0xd9   : > { %2159 = vmatmul.mubr.f32.gmra.mxu1 %v2777_v20 }
 0x115   : > { %v1859_v23 = vpop.f32.mrf.mxu0 }
 0x116   : > { %v330_v24 = vadd.f32 %v1859_v23, %v3098_v39 }
 0x117   : > { %v2997_v34 = vpop.f32.mrf.mxu0 }
 0x11b   : > { %v2999_v45 = vpop.f32.mrf.mxu0 }
 0x11d   : > { %v3001_v48 = vpop.f32.mrf.mxu0 }
 0x120   : > { %v3003_v56 = vpop.f32.mrf.mxu0  ;;  %v3005_v58 = vpop.f32.mrf.mxu1 }
 0x121   : > { %v370_v23 = vadd.f32 %v3003_v56, %v3098_v39 }
 0x122   : > { %v3007_v61 = vpop.f32.mrf.mxu0  ;;  %v3009_v62 = vpop.f32.mrf.mxu1 }
 0x123   : > { %v360_v56 = vadd.f32 %v3098_v39, %v3007_v61 }
 0x126   : > { %v3011_v2 = vpop.f32.mrf.mxu0  ;;  %v3013_v12 = vpop.f32.mrf.mxu1 }
 0x128   : > { %v3015_v35 = vpop.f32.mrf.mxu0  ;;  %v3017_v44 = vpop.f32.mrf.mxu1 }
 0x12c   : > { %v3019_v49 = vpop.f32.mrf.mxu0  ;;  %v3021_v47 = vpop.f32.mrf.mxu1 }
 0x12e   : > { %v3023_v8 = vpop.f32.mrf.mxu0  ;;  %v3025_v0 = vpop.f32.mrf.mxu1 }
 0x132   : > { %v3027_v53 = vpop.f32.mrf.mxu0  ;;  %v3029_v6 = vpop.f32.mrf.mxu1 }
 0x134   : > { %v3031_v36 = vpop.f32.mrf.mxu0  ;;  %v3033_v41 = vpop.f32.mrf.mxu1 }
 0x138   : > { %v3035_v43 = vpop.f32.mrf.mxu0  ;;  %v3037_v63 = vpop.f32.mrf.mxu1 }
 0x13a   : > { %v3039_v30 = vpop.f32.mrf.mxu0  ;;  %v3041_v25 = vpop.f32.mrf.mxu1 }
 0x13e   : > { %v3043_v15 = vpop.f32.mrf.mxu0  ;;  %v3045_v17 = vpop.f32.mrf.mxu1 }
 0x140   : > { %v3047_v50 = vpop.f32.mrf.mxu0  ;;  %v3049_v14 = vpop.f32.mrf.mxu1 }
 0x141   : > { %3334 = vst [vmem:[#allocation5_spill] sm:$0xff] %v3047_v50 }
 0x144   : > { %v3051_v22 = vpop.f32.mrf.mxu1  ;;  %v1971_v20 = vpop.f32.mrf.mxu0 }
 0x146   : > { %v3053_v1 = vpop.f32.mrf.mxu1  ;;  %v814_v19 = vpop.f32.mrf.mxu0 }
 0x147   : > { %3335 = vst [vmem:[#allocation17_spill] sm:$0xff] %v3053_v1 }
 0x14a   : > { %v3055_v18 = vpop.f32.mrf.mxu1  ;;  %v1974_v33 = vpop.f32.mrf.mxu0 }
 0x14b   : > { %3336 = vst [vmem:[#allocation15_spill] sm:$0xff] %v3055_v18 }
 0x14c   : > { %v3057_v60 = vpop.f32.mrf.mxu1  ;;  %v828_v29 = vpop.f32.mrf.mxu0 }
 0x14d   : > { %3337 = vst [vmem:[#allocation6_spill] sm:$0xff] %v3057_v60  ;;  %v350_v60 = vadd.f32 %v2999_v45, %v3098_v39 }
 0x14f   : > { %v639_v45 = vadd.f32 %v3013_v12, %v350_v60  ;;  %v651_v12 = vadd.f32 %v3021_v47, %v370_v23 }
 0x150   : > { %v3059_v7 = vpop.f32.mrf.mxu0  ;;  %v2027_v52 = vpop.f32.mrf.mxu1 }
 0x152   : > { %v3061_v37 = vpop.f32.mrf.mxu0  ;;  %v1008_v51 = vpop.f32.mrf.mxu1 }
 0x156   : > { %v3063_v21 = vpop.f32.mrf.mxu0  ;;  %v2030_v59 = vpop.f32.mrf.mxu1 }
 0x158   : > { %v3065_v46 = vpop.f32.mrf.mxu0  ;;  %v1024_v26 = vpop.f32.mrf.mxu1 }
 0x15c   : > { %v3067_v38 = vpop.f32.mrf.mxu0  ;;  %v3069_v13 = vpop.f32.mrf.mxu1 }
 0x15e   : > { %v3071_v32 = vpop.f32.mrf.mxu0  ;;  %v3073_v54 = vpop.f32.mrf.mxu1 }
 0x162   : > { %v3075_v3 = vpop.f32.mrf.mxu0  ;;  %v3077_v4 = vpop.f32.mrf.mxu1 }
 0x164   : > { %v3079_v57 = vpop.f32.mrf.mxu0  ;;  %v3081_v42 = vpop.f32.mrf.mxu1 }
 0x168   : > { %v3083_v5 = vpop.f32.mrf.mxu0  ;;  %v3085_v9 = vpop.f32.mrf.mxu1 }
 0x169   : > { %3338 = vst [vmem:[#allocation7_spill] sm:$0xff] %v3083_v5 }
 0x16a   : > { %v3087_v28 = vpop.f32.mrf.mxu0  ;;  %v3089_v55 = vpop.f32.mrf.mxu1 }
 0x16b   : > { %3339 = vst [vmem:[#allocation8_spill] sm:$0xff] %v3087_v28  ;;  %v627_v28 = vadd.f32 %v3005_v58, %v330_v24 }
 0x16e   : > { %v3091_v10 = vpop.f32.mrf.mxu0  ;;  %v3093_v11 = vpop.f32.mrf.mxu1 }
 0x16f   : > { %3340 = vst [vmem:[#allocation9_spill] sm:$0xff] %v3091_v10  ;;  %3341 = vst [vmem:[#allocation10_spill] sm:$0xff] %v3093_v11  ;;  %v320_v10 = vadd.f32 %v3098_v39, %v2997_v34  ;;  %v340_v34 = vadd.f32 %v3098_v39, %v3001_v48  ;;  %v390_v48 = vadd.f32 %v3011_v2, %v3098_v39 }
 0x170   : > { %v3100_v40 = vpop.f32.mrf.mxu0  ;;  %v3102_v16 = vpop.f32.mrf.mxu1 }
 0x171   : > { %3342 = vst [vmem:[#allocation11_spill] sm:$0xff] %v3100_v40  ;;  %3343 = vst [vmem:[#allocation12_spill] sm:$0xff] %v3102_v16  ;;  %v621_v50 = vadd.f32 %v3009_v62, %v320_v10  ;;  %v822_v16 = vadd.f32 %v1971_v20, %v627_v28  ;;  %v633_v62 = vadd.f32 %v3017_v44, %v340_v34 }
 0x172   : > { %v836_v20 = vadd.f32 %v1974_v33, %v639_v45  ;;  %v645_v44 = vadd.f32 %v3025_v0, %v360_v56  ;;  %v410_v0 = vadd.f32 %v3019_v49, %v3098_v39 }
 0x173   : > { %v815_v1 = vadd.f32 %v814_v19, %v621_v50  ;;  %v1017_v58 = vadd.f32 %v2027_v52, %v822_v16  ;;  %v829_v19 = vadd.f32 %v828_v29, %v633_v62 }
 0x174   : > { %v3107_v31 = vpop.f32.mrf.mxu1  ;;  %v2083_v27 = vpop.f32.mrf.mxu0  ;;  %v1033_v60 = vadd.f32 %v2030_v59, %v836_v20  ;;  %v380_v59 = vadd.f32 %v3098_v39, %v3015_v35 }
 0x175   : > { %3344 = vst [vmem:[#allocation13_spill] sm:$0xff] %v3107_v31  ;;  %v1009_v28 = vadd.f32 %v1008_v51, %v815_v1  ;;  %v1254_v10 = vadd.f32 %v2083_v27, %v1017_v58  ;;  %v850_v1 = vadd.f32 %v3059_v7, %v651_v12  ;;  %v1025_v2 = vadd.f32 %v1024_v26, %v829_v19 }
 0x176   : > { %v3114_v18 = vpop.f32.mrf.mxu1  ;;  %v1247_v40 = vpop.f32.mrf.mxu0  ;;  %v663_v7 = vadd.f32 %v3029_v6, %v390_v48  ;;  %v657_v58 = vadd.f32 %v3033_v41, %v380_v59  ;;  %v675_v41 = vadd.f32 %v3037_v63, %v410_v0  ;;  %v470_v59 = vadd.f32 %v3043_v15, %v3098_v39 }
 0x177   : > { %3345 = vst [vmem:[#allocation14_spill] sm:$0xff] %v3114_v18  ;;  %v1248_v52 = vadd.f32 %v1247_v40, %v1009_v28  ;;  %v843_v40 = vadd.f32 %v3061_v37, %v645_v44  ;;  %v1049_v23 = vadd.f32 %v3069_v13, %v850_v1  ;;  %v430_v28 = vadd.f32 %v3027_v53, %v3098_v39 }
 0x178   : > { %v2086_v5 = vpop.f32.mrf.mxu0  ;;  %v864_v35 = vadd.f32 %v3063_v21, %v663_v7  ;;  %v857_v21 = vadd.f32 %v3065_v46, %v657_v58  ;;  %v3347_v7 = vld [vmem:[#allocation10_spill] sm:$0xff]  ;;  %v3350_v15 = vld [vmem:[#allocation12_spill] sm:$0xff] }
 0x179   : > { %v3119_v31 = vpop.f32.mrf.mxu1  ;;  %v1266_v47 = vadd.f32 %v2086_v5, %v1033_v60  ;;  %v1041_v49 = vadd.f32 %v3073_v54, %v843_v40 }
 0x17a   : > { %v1259_v24 = vpop.f32.mrf.mxu0  ;;  %v1065_v54 = vadd.f32 %v3077_v4, %v864_v35  ;;  %v1057_v53 = vadd.f32 %v3081_v42, %v857_v21 }
 0x17b   : > { %v3124_v18 = vpop.f32.mrf.mxu1  ;;  %v1260_v34 = vadd.f32 %v1259_v24, %v1025_v2  ;;  %v400_v24 = vadd.f32 %v3098_v39, %v3023_v8  ;;  %v878_v8 = vadd.f32 %v3067_v38, %v675_v41 }
 0x17c   : > { %3346 = vst [vmem:[#allocation16_spill] sm:$0xff] %v3124_v18  ;;  %v2089_v11 = vpop.f32.mrf.mxu0  ;;  %v3354_v41 = vld [vmem:[#allocation13_spill] sm:$0xff] }
 0x17d   : > { %v2139_v50 = vpop.f32.mrf.mxu1  ;;  %v1278_v6 = vadd.f32 %v2089_v11, %v1049_v23  ;;  %v1081_v42 = vadd.f32 %v3085_v9, %v878_v8 }
 0x17e   : > { %v1431_v16 = vadd.f32 %v2139_v50, %v1254_v10  ;;  %v1271_v18 = vpop.f32.mrf.mxu0  ;;  %v669_v50 = vadd.f32 %v3041_v25, %v400_v24  ;;  %v687_v25 = vadd.f32 %v3045_v17, %v430_v28 }
 0x17f   : > { %v1424_v61 = vpop.f32.mrf.mxu1  ;;  %v1272_v11 = vadd.f32 %v1271_v18, %v1041_v49  ;;  %v420_v18 = vadd.f32 %v3098_v39, %v3031_v36  ;;  %v3351_v49 = vld [vmem:[#allocation5_spill] sm:$0xff] }
 0x180   : > { %v1519_v33 = vmax.f32 %v1431_v16, 0.0  ;;  %v1425_v29 = vadd.f32 %v1424_v61, %v1248_v52  ;;  %v2092_v51 = vpop.f32.mrf.mxu0  ;;  %v450_v52 = vadd.f32 %v3035_v43, %v3098_v39  ;;  %v871_v38 = vadd.f32 %v3071_v32, %v669_v50 }
 0x181   : > { %v2142_v27 = vpop.f32.mrf.mxu1  ;;  %v1290_v63 = vadd.f32 %v2092_v51, %v1065_v54  ;;  %v892_v36 = vadd.f32 %v3075_v3, %v687_v25  ;;  %v440_v51 = vadd.f32 %v3098_v39, %v3039_v30  ;;  %v3349_v30 = vld [vmem:[#allocation7_spill] sm:$0xff] }
 0x182   : > { %1536 = vst.msk [vmem:[%s3137_s22 + $0x8] sm:$0xff] %vm1534_vm0, %v1519_v33  ;;  %v1518_v26 = vmax.f32 %v1425_v29, 0.0  ;;  %v1443_v5 = vadd.f32 %v2142_v27, %v1266_v47  ;;  %v1283_v45 = vpop.f32.mrf.mxu0  ;;  %v681_v47 = vadd.f32 %v3049_v14, %v420_v18  ;;  %v1073_v43 = vadd.f32 %v3089_v55, %v871_v38 }
 0x183   : > { %v1436_v62 = vpop.f32.mrf.mxu1  ;;  %v1284_v44 = vadd.f32 %v1283_v45, %v1057_v53  ;;  %v699_v14 = vadd.f32 %v3051_v22, %v450_v52  ;;  %v1097_v55 = vadd.f32 %v3347_v7, %v892_v36 }
 0x184   : > { %1535 = vst.msk [vmem:[%s3137_s22] sm:$0xff] %vm1534_vm0, %v1518_v26  ;;  %v1521_v37 = vmax.f32 %v1443_v5, 0.0  ;;  %v1437_v20 = vadd.f32 %v1436_v62, %v1260_v34  ;;  %v2095_v13 = vpop.f32.mrf.mxu0  ;;  %v885_v3 = vadd.f32 %v3079_v57, %v681_v47  ;;  %v3348_v34 = vld [vmem:[#allocation17_spill] sm:$0xff] }
 0x185   : > { %v2145_v10 = vpop.f32.mrf.mxu1  ;;  %v1302_v17 = vadd.f32 %v2095_v13, %v1081_v42  ;;  %v693_v26 = vadd.f32 %v3348_v34, %v440_v51  ;;  %v906_v5 = vadd.f32 %v3349_v30, %v699_v14  ;;  %v3353_v13 = vld [vmem:[#allocation8_spill] sm:$0xff] }
 0x186   : > { %1538 = vst.msk [vmem:[%s3137_s22 + $0x18] sm:$0xff] %vm1534_vm0, %v1521_v37  ;;  %v1520_v56 = vmax.f32 %v1437_v20, 0.0  ;;  %v1455_v48 = vadd.f32 %v2145_v10, %v1278_v6  ;;  %v1295_v12 = vpop.f32.mrf.mxu0  ;;  %v1089_v35 = vadd.f32 %v3350_v15, %v885_v3  ;;  %v460_v6 = vadd.f32 %v3098_v39, %v3351_v49  ;;  %v3352_v37 = vld [vmem:[#allocation15_spill] sm:$0xff]  ;;  %v3357_v39 = vld [vmem:[#allocation14_spill] sm:$0xff] }
 0x187   : > { %v1448_v19 = vpop.f32.mrf.mxu1  ;;  %v1296_v40 = vadd.f32 %v1295_v12, %v1073_v43  ;;  %v711_v20 = vadd.f32 %v3352_v37, %v470_v59  ;;  %v899_v24 = vadd.f32 %v3353_v13, %v693_v26  ;;  %v1113_v21 = vadd.f32 %v3354_v41, %v906_v5  ;;  %v3356_v12 = vld [vmem:[#allocation9_spill] sm:$0xff] }
 0x188   : > { %1537 = vst.msk [vmem:[%s3137_s22 + $0x10] sm:$0xff] %vm1534_vm0, %v1520_v56  ;;  %v1523_v46 = vmax.f32 %v1455_v48, 0.0  ;;  %v1449_v60 = vadd.f32 %v1448_v19, %v1272_v11  ;;  %v2098_v4 = vpop.f32.mrf.mxu0  ;;  %v3355_v56 = vld [vmem:[#allocation6_spill] sm:$0xff] }
 0x189   : > { %v2148_v16 = vpop.f32.mrf.mxu1  ;;  %v1314_v22 = vadd.f32 %v2098_v4, %v1097_v55  ;;  %v705_v48 = vadd.f32 %v3355_v56, %v460_v6  ;;  %v920_v50 = vadd.f32 %v3356_v12, %v711_v20  ;;  %v1105_v53 = vadd.f32 %v3357_v39, %v899_v24  ;;  %v3358_v4 = vld [vmem:[#allocation11_spill] sm:$0xff] }
 0x18a   : > { %1540 = vst.msk [vmem:[%s3137_s22 + $0x28] sm:$0xff] %vm1534_vm0, %v1523_v46  ;;  %v1522_v1 = vmax.f32 %v1449_v60, 0.0  ;;  %v1467_v61 = vadd.f32 %v2148_v16, %v1290_v63  ;;  %v1307_v2 = vpop.f32.mrf.mxu0 }
 0x18b   : > { %v1460_v33 = vpop.f32.mrf.mxu1  ;;  %v1308_v10 = vadd.f32 %v1307_v2, %v1089_v35  ;;  %v913_v18 = vadd.f32 %v3358_v4, %v705_v48  ;;  %v1129_v25 = vadd.f32 %v3119_v31, %v920_v50 }
 0x18c   : > { %1539 = vst.msk [vmem:[%s3137_s22 + $0x20] sm:$0xff] %vm1534_vm0, %v1522_v1  ;;  %v1525_v32 = vmax.f32 %v1467_v61, 0.0  ;;  %v1461_v29 = vadd.f32 %v1460_v33, %v1284_v44  ;;  %v2101_v9 = vpop.f32.mrf.mxu0  ;;  %v3359_v61 = vld [vmem:[#allocation16_spill] sm:$0xff] }
 0x18d   : > { %v2151_v0 = vpop.f32.mrf.mxu1  ;;  %v1326_v63 = vadd.f32 %v2101_v9, %v1113_v21  ;;  %v1121_v2 = vadd.f32 %v3359_v61, %v913_v18 }
 0x18e   : > { %1542 = vst.msk [vmem:[%s3137_s22 + $0x38] sm:$0xff] %vm1534_vm0, %v1525_v32  ;;  %v1524_v27 = vmax.f32 %v1461_v29, 0.0  ;;  %v1479_v23 = vadd.f32 %v2151_v0, %v1302_v17  ;;  %v1319_v45 = vpop.f32.mrf.mxu0 }
 0x18f   : > { %v1472_v58 = vpop.f32.mrf.mxu1  ;;  %v1320_v38 = vadd.f32 %v1319_v45, %v1105_v53 }
 0x190   : > { %1541 = vst.msk [vmem:[%s3137_s22 + $0x30] sm:$0xff] %vm1534_vm0, %v1524_v27  ;;  %v1527_v57 = vmax.f32 %v1479_v23, 0.0  ;;  %v1473_v62 = vadd.f32 %v1472_v58, %v1296_v40  ;;  %v2104_v8 = vpop.f32.mrf.mxu0 }
 0x191   : > { %v2154_v28 = vpop.f32.mrf.mxu1  ;;  %v1338_v47 = vadd.f32 %v2104_v8, %v1129_v25 }
 0x192   : > { %1544 = vst.msk [vmem:[%s3137_s22 + $0x48] sm:$0xff] %vm1534_vm0, %v1527_v57  ;;  %v1526_v54 = vmax.f32 %v1473_v62, 0.0  ;;  %v1491_v11 = vadd.f32 %v2154_v28, %v1314_v22  ;;  %v1331_v44 = vpop.f32.mrf.mxu0 }
 0x193   : > { %v1484_v19 = vpop.f32.mrf.mxu1  ;;  %v1332_v17 = vadd.f32 %v1331_v44, %v1121_v2 }
 0x194   : > { %1543 = vst.msk [vmem:[%s3137_s22 + $0x40] sm:$0xff] %vm1534_vm0, %v1526_v54  ;;  %v1529_v46 = vmax.f32 %v1491_v11, 0.0  ;;  %v1485_v60 = vadd.f32 %v1484_v19, %v1308_v10 }
 0x195   : > { %v2157_v52 = vpop.f32.mrf.mxu1 }
 0x196   : > { %1546 = vst.msk [vmem:[%s3137_s22 + $0x58] sm:$0xff] %vm1534_vm0, %v1529_v46  ;;  %v1528_v16 = vmax.f32 %v1485_v60, 0.0  ;;  %v1503_v42 = vadd.f32 %v2157_v52, %v1326_v63 }
 0x197   : > { %v1496_v1 = vpop.f32.mrf.mxu1 }
 0x198   : > { %1545 = vst.msk [vmem:[%s3137_s22 + $0x50] sm:$0xff] %vm1534_vm0, %v1528_v16  ;;  %v1531_v36 = vmax.f32 %v1503_v42, 0.0  ;;  %v1497_v33 = vadd.f32 %v1496_v1, %v1320_v38 }
 0x199   : > { %v2160_v43 = vpop.f32.mrf.mxu1 }
 0x19a   : > { %1548 = vst.msk [vmem:[%s3137_s22 + $0x68] sm:$0xff] %vm1534_vm0, %v1531_v36  ;;  %v1530_v31 = vmax.f32 %v1497_v33, 0.0  ;;  %v1515_v32 = vadd.f32 %v2160_v43, %v1338_v47 }
 0x19b   : > { %v1508_v29 = vpop.f32.mrf.mxu1 }
 0x19c   : > { %1547 = vst.msk [vmem:[%s3137_s22 + $0x60] sm:$0xff] %vm1534_vm0, %v1530_v31  ;;  %v1533_v9 = vmax.f32 %v1515_v32, 0.0  ;;  %v1509_v51 = vadd.f32 %v1508_v29, %v1332_v17 }
 0x19e   : > { %1550 = vst.msk [vmem:[%s3137_s22 + $0x78] sm:$0xff] %vm1534_vm0, %v1533_v9  ;;  %v1532_v59 = vmax.f32 %v1509_v51, 0.0 }
 0x1a0   : > { %1549 = vst.msk [vmem:[%s3137_s22 + $0x70] sm:$0xff] %vm1534_vm0, %v1532_v59 }
 0x1a1 PF: > { %p13_p9 = scmp.ge.s32.totalorder %s2309_s17, 4   ;;  %s3360_s12 = smov %s2256_s13 }
 0x1a2   : > { %s3361_s13 = smov %s2260_s14  ;;  %s3362_s14 = smov %s2319_s20 }
 0x1a3   : > { %s3363_s15 = smov %s2309_s17  ;;  %15 = sbr.rel (!%p13_p9) target bundleno = 3 (0x3), region = 72 }
 0x1a8   :  { %1573 = vsyncpa [#allocation3], 1 }
 0x1a9   :  { %1575 = vsyncpa [#allocation3 + $0x1], 1 }

// kernel: se_bottleneck_forward.6
= control target key start
LH: loop header
LB: loop body
LE: loop exit
PB: predicated region body
PF: predicated region fallthrough
CT: control target
= control target key end

     0   :  { %s1812_s12 = smov 0   ;;  %s2385_s0 = inlined_call_operand.vmem [shape: f32[256,32], index: 0, kind: input, shape index: {}]   ;;  %s2386_s1 = inlined_call_operand.vmem [shape: f32[32,128], index: 1, kind: input, shape index: {}]   ;;  %s2387_s2 = inlined_call_operand.vmem [shape: f32[1,128], index: 2, kind: input, shape index: {}]   ;;  %s2388_s3 = inlined_call_operand.vmem [shape: f32[256,128], index: 3, kind: output, shape index: {}]  }
   0x1 LB: > { %s1452_s13 = sadd.s32 4294967295, %s1790_s12   ;;  %p1456_p0 = scmp.ge.s32.totalorder %s1790_s12, 1  ;;  %s1790_s12 = sphi %s1812_s12, %s13_s12  }
   0x2   : > { %p138_p1 = scmp.lt.s32.totalorder %s1790_s12, 3 }
   0x4   : > { %p139_p2 = pnand %p1456_p0, %p138_p1 }
   0x6   : > { %142 = sbr.rel (%p139_p2) target bundleno = 323 (0x143), region = 32 }
   0xb   : > { %v193_v0 = vld [vmem:[%s2386_s1 + $0x18] sm:$0xff]  ;;  %v192_v1 = vld [vmem:[%s2386_s1 + $0x10] sm:$0xff]  ;;  %v191_v2 = vld [vmem:[%s2386_s1 + $0x8] sm:$0xff]  ;;  %s1457_s20 = sshll.u32 %s1452_s13, 4  ;;  %vm201_vm0 = vcmask 261120  }
   0xc   : > { %v1829_v3 = vand.u32 4294901760, %v193_v0  ;;  %v1831_v4 = vand.u32 4294901760, %v192_v1  ;;  %v1833_v5 = vand.u32 4294901760, %v191_v2  ;;  %v190_v6 = vld [vmem:[%s2386_s1] sm:$0xff]  ;;  %p163_p3 = scmp.lt.s32.totalorder %s1457_s20, 31 }
   0xd   : > { %v1838_v7 = vand.u32 4294901760, %v190_v6 }
   0xe   : > { %1584 = vmatprep.subr.mxu0 %v1829_v3  ;;  %v1842_v8 = vsub.f32 %v193_v0, %v1829_v3  ;;  %v1845_v9 = vsub.f32 %v192_v1, %v1831_v4  ;;  %v1848_v10 = vsub.f32 %v191_v2, %v1833_v5  ;;  %s2408_s20 = smov (!%p163_p3, %s1457_s20), 31 }
   0xf   : > { %1585 = vmatpush3.msra.mxu0 %v1829_v3  ;;  %v1854_v11 = vsub.f32 %v190_v6, %v1838_v7  ;;  %s1458_s23 = sshll.u32 %s2408_s20, 3 }
  0x10   : > { %v1857_v12 = vand.u32 4294901760, %v1842_v8  ;;  %1586 = vmatprep.subr.mxu0 %v1831_v4  ;;  %v1861_v13 = vand.u32 4294901760, %v1845_v9  ;;  %v1864_v14 = vand.u32 4294901760, %v1848_v10  ;;  %s1876_s26 = scalar_lea.vmem %s2385_s0, %s1458_s23  ;;  %s2316_s4 = scalar_lea.vmem %s2388_s3, %s1458_s23 }
  0x11   : > { %1587 = vmatpush3.msra.mxu0 %v1831_v4  ;;  %v1869_v15 = vand.u32 4294901760, %v1854_v11  ;;  %v174_v19 = vld [vmem:[%s1876_s26] sm:$0xff]  ;;  %v175_v20 = vld [vmem:[%s1876_s26 + $0x8] sm:$0xff]  ;;  %v176_v21 = vld [vmem:[%s1876_s26 + $0x10] sm:$0xff] }
  0x12   : > { %v507_v16 = vsub.f32 %v1842_v8, %v1857_v12  ;;  %v514_v17 = vsub.f32 %v1845_v9, %v1861_v13  ;;  %1588 = vmatprep.subr.mxu0 %v1833_v5  ;;  %v521_v18 = vsub.f32 %v1848_v10, %v1864_v14  ;;  %v203_v23 = vsel %vm201_vm0, %v174_v19, 0  ;;  %v177_v26 = vld [vmem:[%s1876_s26 + $0x18] sm:$0xff]  ;;  %v178_v27 = vld [vmem:[%s1876_s26 + $0x20] sm:$0xff]  ;;  %v179_v28 = vld [vmem:[%s1876_s26 + $0x28] sm:$0xff] }
  0x13   : > { %1589 = vmatpush3.msra.mxu0 %v1833_v5  ;;  %v528_v22 = vsub.f32 %v1854_v11, %v1869_v15  ;;  %v206_v24 = vsel %vm201_vm0, %v175_v20, 0  ;;  %v209_v25 = vsel %vm201_vm0, %v176_v21, 0  ;;  %v1898_v32 = vand.u32 4294901760, %v203_v23  ;;  %v180_v37 = vld [vmem:[%s1876_s26 + $0x30] sm:$0xff]  ;;  %v181_v38 = vld [vmem:[%s1876_s26 + $0x38] sm:$0xff]  ;;  %v182_v63 = vld [vmem:[%s1876_s26 + $0x40] sm:$0xff] }
  0x14   : > { %v508_v29 = vand.u32 4294901760, %v507_v16  ;;  %v515_v30 = vand.u32 4294901760, %v514_v17  ;;  %v522_v31 = vand.u32 4294901760, %v521_v18  ;;  %1590 = vmatprep.subr.mxu0 %v1838_v7  ;;  %v1901_v34 = vand.u32 4294901760, %v206_v24  ;;  %v183_v16 = vld [vmem:[%s1876_s26 + $0x48] sm:$0xff]  ;;  %v184_v21 = vld [vmem:[%s1876_s26 + $0x50] sm:$0xff] }
  0x15   : > { %1591 = vmatpush3.msra.mxu0 %v1838_v7  ;;  %v529_v33 = vand.u32 4294901760, %v528_v22  ;;  %v1903_v35 = vand.u32 4294901760, %v209_v25  ;;  %v212_v36 = vsel %vm201_vm0, %v177_v26, 0  ;;  %v1909_v39 = vsub.f32 %v203_v23, %v1898_v32  ;;  %1624 = vmatprep.mubr.f32.mxu1 %v1898_v32  ;;  %v186_v26 = vld [vmem:[%s1876_s26 + $0x60] sm:$0xff] }
  0x16   : > { %1616 = vmatprep.subr.mxu1 %v508_v29  ;;  %v1912_v40 = vand.u32 4294901760, %v212_v36  ;;  %v215_v41 = vsel %vm201_vm0, %v178_v27, 0  ;;  %v218_v42 = vsel %vm201_vm0, %v179_v28, 0  ;;  %1648 = vmatprep.subr.mxu0 %v1842_v8  ;;  %v1918_v43 = vsub.f32 %v206_v24, %v1901_v34 }
  0x17   : > { %1617 = vmatpush3.msra.mxu1 %v508_v29  ;;  %v1921_v44 = vsub.f32 %v209_v25, %v1903_v35  ;;  %v1923_v45 = vand.u32 4294901760, %v215_v41  ;;  %v1925_v46 = vand.u32 4294901760, %v218_v42  ;;  %v321_v47 = vand.u32 4294901760, %v1909_v39  ;;  %v185_v25 = vld [vmem:[%s1876_s26 + $0x58] sm:$0xff] }
  0x18   : > { %1618 = vmatprep.subr.mxu1 %v515_v30  ;;  %v1929_v48 = vsub.f32 %v212_v36, %v1912_v40  ;;  %v221_v49 = vsel %vm201_vm0, %v180_v37, 0  ;;  %v224_v50 = vsel %vm201_vm0, %v181_v38, 0  ;;  %v331_v51 = vand.u32 4294901760, %v1918_v43  ;;  %v187_v38 = vld [vmem:[%s1876_s26 + $0x68] sm:$0xff] }
  0x19   : > { %1619 = vmatpush3.msra.mxu1 %v515_v30  ;;  %v341_v52 = vand.u32 4294901760, %v1921_v44  ;;  %v1936_v53 = vsub.f32 %v215_v41, %v1923_v45  ;;  %v1939_v54 = vsub.f32 %v218_v42, %v1925_v46  ;;  %v322_v55 = vsub.f32 %v1909_v39, %v321_v47 }
  0x1a   : > { %1620 = vmatprep.subr.mxu1 %v522_v31  ;;  %v351_v56 = vand.u32 4294901760, %v1929_v48  ;;  %v1945_v57 = vand.u32 4294901760, %v221_v49  ;;  %v1947_v58 = vand.u32 4294901760, %v224_v50  ;;  %v332_v59 = vsub.f32 %v1918_v43, %v331_v51 }
  0x1b   : > { %1621 = vmatpush3.msra.mxu1 %v522_v31  ;;  %v342_v60 = vsub.f32 %v1921_v44, %v341_v52  ;;  %v361_v61 = vand.u32 4294901760, %v1936_v53  ;;  %v371_v62 = vand.u32 4294901760, %v1939_v54  ;;  %v323_v0 = vand.u32 4294901760, %v322_v55 }
  0x1c   : > { %1622 = vmatprep.subr.mxu1 %v529_v33  ;;  %v352_v1 = vsub.f32 %v1929_v48, %v351_v56  ;;  %v1962_v2 = vsub.f32 %v221_v49, %v1945_v57  ;;  %v1965_v6 = vsub.f32 %v224_v50, %v1947_v58  ;;  %v333_v17 = vand.u32 4294901760, %v332_v59  ;;  %v188_v50 = vld [vmem:[%s1876_s26 + $0x70] sm:$0xff] }
  0x1d   : > { %1623 = vmatpush3.msra.mxu1 %v529_v33  ;;  %v343_v18 = vand.u32 4294901760, %v342_v60  ;;  %v362_v19 = vsub.f32 %v1936_v53, %v361_v61  ;;  %v372_v20 = vsub.f32 %v1939_v54, %v371_v62  ;;  %1592 = vmatprep.mubr.f32.mxu0 %v323_v0  ;;  %v227_v24 = vsel %vm201_vm0, %v182_v63, 0 }
  0x1e   : > { %1625 = vmatmul.mubr.f32.vlgmr.msra.gmra.mxu1 %v1901_v34  ;;  %v381_v22 = vand.u32 4294901760, %v1962_v2  ;;  %v391_v23 = vand.u32 4294901760, %v1965_v6  ;;  %1593 = vmatmul.mubr.f32.vlgmr.msra.gmra.mxu0 %v333_v17  ;;  %v353_v27 = vand.u32 4294901760, %v352_v1  ;;  %v1982_v29 = vand.u32 4294901760, %v227_v24 }
  0x1f   : > { %1680 = vmatprep.subr.mxu1 %v1829_v3  ;;  %v363_v28 = vand.u32 4294901760, %v362_v19  ;;  %v230_v30 = vsel %vm201_vm0, %v183_v16, 0  ;;  %1649 = vmatpush3.msra.mxu0 %v1842_v8  ;;  %v373_v31 = vand.u32 4294901760, %v372_v20  ;;  %v233_v37 = vsel %vm201_vm0, %v184_v21, 0 }
  0x20   : > { %1681 = vmatpush3.msra.mxu1 %v1829_v3  ;;  %v382_v33 = vsub.f32 %v1962_v2, %v381_v22  ;;  %v1990_v36 = vand.u32 4294901760, %v230_v30  ;;  %1595 = vmatprep.mubr.f32.mxu0 %v343_v18  ;;  %v1996_v41 = vsub.f32 %v227_v24, %v1982_v29  ;;  %v1998_v42 = vand.u32 4294901760, %v233_v37  ;;  %v189_v18 = vld [vmem:[%s1876_s26 + $0x78] sm:$0xff] }
  0x21   : > { %1627 = vmatprep.mubr.f32.mxu1 %v1903_v35  ;;  %v236_v8 = vsel %vm201_vm0, %v185_v25, 0  ;;  %v239_v49 = vsel %vm201_vm0, %v186_v26, 0  ;;  %1650 = vmatprep.subr.mxu0 %v1845_v9  ;;  %v392_v59 = vsub.f32 %v1965_v6, %v391_v23  ;;  %v242_v17 = vsel %vm201_vm0, %v187_v38, 0 }
  0x22   : > { %1628 = vmatmul.mubr.f32.gmra.mxu1 %v1912_v40  ;;  %v383_v55 = vand.u32 4294901760, %v382_v33  ;;  %v2009_v60 = vsub.f32 %v230_v30, %v1990_v36  ;;  %v2011_v63 = vand.u32 4294901760, %v236_v8  ;;  %1596 = vmatmul.mubr.f32.gmra.mxu0 %v353_v27  ;;  %v401_v0 = vand.u32 4294901760, %v1996_v41 }
  0x23   : > { %1630 = vmatprep.mubr.f32.mxu1 %v1923_v45  ;;  %v2016_v1 = vsub.f32 %v233_v37, %v1998_v42  ;;  %v2018_v16 = vand.u32 4294901760, %v239_v49  ;;  %1598 = vmatprep.mubr.f32.mxu0 %v363_v28  ;;  %v2027_v21 = vand.u32 4294901760, %v242_v17  ;;  %v245_v24 = vsel %vm201_vm0, %v188_v50, 0 }
  0x24   : > { %1651 = vmatpush3.msra.mxu0 %v1845_v9  ;;  %v411_v19 = vand.u32 4294901760, %v2009_v60  ;;  %v2025_v20 = vsub.f32 %v236_v8, %v2011_v63  ;;  %1682 = vmatprep.subr.mxu1 %v1831_v4  ;;  %v402_v25 = vsub.f32 %v1996_v41, %v401_v0  ;;  %v2039_v27 = vand.u32 4294901760, %v245_v24 }
  0x25   : > { %1652 = vmatprep.subr.mxu0 %v1848_v10  ;;  %v421_v26 = vand.u32 4294901760, %v2016_v1  ;;  %v2037_v9 = vsub.f32 %v239_v49, %v2018_v16  ;;  %v393_v28 = vand.u32 4294901760, %v392_v59  ;;  %v248_v30 = vsel %vm201_vm0, %v189_v18, 0  ;;  %1683 = vmatpush3.msra.mxu1 %v1831_v4 }
  0x26   : > { %1631 = vmatmul.mubr.f32.gmra.mxu1 %v1925_v46  ;;  %1653 = vmatpush3.msra.mxu0 %v1848_v10  ;;  %v403_v33 = vand.u32 4294901760, %v402_v25  ;;  %v412_v37 = vsub.f32 %v2009_v60, %v411_v19  ;;  %v431_v38 = vand.u32 4294901760, %v2025_v20  ;;  %v2050_v8 = vsub.f32 %v242_v17, %v2027_v21 }
  0x27   : > { %1599 = vmatmul.mubr.f32.gmra.mxu0 %v373_v31  ;;  %1633 = vmatprep.mubr.f32.mxu1 %v1945_v57  ;;  %v422_v10 = vsub.f32 %v2016_v1, %v421_v26  ;;  %v441_v31 = vand.u32 4294901760, %v2037_v9  ;;  %v2058_v49 = vsub.f32 %v245_v24, %v2039_v27  ;;  %v2060_v50 = vand.u32 4294901760, %v248_v30 }
  0x28   : > { %1601 = vmatprep.mubr.f32.mxu0 %v383_v55  ;;  %1684 = vmatprep.subr.mxu1 %v1833_v5  ;;  %v413_v55 = vand.u32 4294901760, %v412_v37  ;;  %v432_v59 = vsub.f32 %v2025_v20, %v431_v38  ;;  %v451_v17 = vand.u32 4294901760, %v2050_v8 }
  0x29   : > { %1654 = vmatprep.subr.mxu0 %v1854_v11  ;;  %v2072_v18 = vsub.f32 %v248_v30, %v2060_v50  ;;  %1685 = vmatpush3.msra.mxu1 %v1833_v5  ;;  %v423_v24 = vand.u32 4294901760, %v422_v10  ;;  %v461_v25 = vand.u32 4294901760, %v2058_v49 }
  0x2a   : > { %1634 = vmatmul.mubr.f32.gmra.mxu1 %v1947_v58  ;;  %1655 = vmatpush3.msra.mxu0 %v1854_v11  ;;  %v442_v11 = vsub.f32 %v2037_v9, %v441_v31  ;;  %v452_v30 = vsub.f32 %v2050_v8, %v451_v17 }
  0x2b   : > { %1602 = vmatmul.mubr.f32.gmra.mxu0 %v393_v28  ;;  %1636 = vmatprep.mubr.f32.mxu1 %v1982_v29  ;;  %v433_v28 = vand.u32 4294901760, %v432_v59  ;;  %v462_v10 = vsub.f32 %v2058_v49, %v461_v25 }
  0x2c   : > { %1604 = vmatprep.mubr.f32.mxu0 %v403_v33  ;;  %1686 = vmatprep.subr.mxu1 %v1838_v7  ;;  %v471_v33 = vand.u32 4294901760, %v2072_v18  ;;  %v443_v37 = vand.u32 4294901760, %v442_v11 }
  0x2d   : > { %1712 = vmatprep.subr.mxu0 %v1857_v12  ;;  %1687 = vmatpush3.msra.mxu1 %v1838_v7 }
  0x2e   : > { %1637 = vmatmul.mubr.f32.gmra.mxu1 %v1990_v36  ;;  %1744 = vmatprep.subr.mxu1 %v1829_v3  ;;  %v472_v59 = vsub.f32 %v2072_v18, %v471_v33 }
  0x2f   : > { %1605 = vmatmul.mubr.f32.gmra.mxu0 %v413_v55  ;;  %1639 = vmatprep.mubr.f32.mxu1 %v1998_v42  ;;  %v453_v55 = vand.u32 4294901760, %v452_v30 }
  0x30   : > { %1607 = vmatprep.mubr.f32.mxu0 %v423_v24  ;;  %v463_v24 = vand.u32 4294901760, %v462_v10  ;;  %v473_v11 = vand.u32 4294901760, %v472_v59 }
  0x32   : > { %1640 = vmatmul.mubr.f32.gmra.mxu1 %v2011_v63 }
  0x33   : > { %1608 = vmatmul.mubr.f32.gmra.mxu0 %v433_v28  ;;  %1642 = vmatprep.mubr.f32.mxu1 %v2018_v16 }
  0x34   : > { %1610 = vmatprep.mubr.f32.mxu0 %v443_v37 }
  0x36   : > { %1643 = vmatmul.mubr.f32.gmra.mxu1 %v2027_v21 }
  0x37   : > { %1611 = vmatmul.mubr.f32.gmra.mxu0 %v453_v55  ;;  %1645 = vmatprep.mubr.f32.mxu1 %v2039_v27 }
  0x38   : > { %1613 = vmatprep.mubr.f32.mxu0 %v463_v24 }
  0x3a   : > { %1646 = vmatmul.mubr.f32.gmra.mxu1 %v2060_v50 }
  0x3b   : > { %1614 = vmatmul.mubr.f32.gmra.mxu0 %v473_v11  ;;  %1688 = vmatprep.mubr.f32.mxu1 %v321_v47 }
  0x3c   : > { %1656 = vmatprep.mubr.f32.mxu0 %v1909_v39 }
  0x3e   : > { %1689 = vmatmul.mubr.f32.vlgmr.msra.gmra.mxu1 %v331_v51 }
  0x3f   : > { %1657 = vmatmul.mubr.f32.vlgmr.msra.gmra.mxu0 %v1918_v43  ;;  %1745 = vmatpush3.msra.mxu1 %v1829_v3 }
  0x40   : > { %1713 = vmatpush3.msra.mxu0 %v1857_v12  ;;  %1659 = vmatprep.mubr.f32.mxu0 %v1921_v44 }
  0x41   : > { %1691 = vmatprep.mubr.f32.mxu1 %v341_v52  ;;  %1714 = vmatprep.subr.mxu0 %v1861_v13 }
  0x42   : > { %1692 = vmatmul.mubr.f32.gmra.mxu1 %v351_v56  ;;  %1715 = vmatpush3.msra.mxu0 %v1861_v13 }
  0x43   : > { %1660 = vmatmul.mubr.f32.gmra.mxu0 %v1929_v48  ;;  %1694 = vmatprep.mubr.f32.mxu1 %v361_v61 }
  0x44   : > { %1662 = vmatprep.mubr.f32.mxu0 %v1936_v53  ;;  %1746 = vmatprep.subr.mxu1 %v1831_v4 }
  0x45   : > { %1747 = vmatpush3.msra.mxu1 %v1831_v4  ;;  %1716 = vmatprep.subr.mxu0 %v1864_v14 }
  0x46   : > { %1695 = vmatmul.mubr.f32.gmra.mxu1 %v371_v62  ;;  %1717 = vmatpush3.msra.mxu0 %v1864_v14 }
  0x47   : > { %1663 = vmatmul.mubr.f32.gmra.mxu0 %v1939_v54  ;;  %1697 = vmatprep.mubr.f32.mxu1 %v381_v22 }
  0x48   : > { %1665 = vmatprep.mubr.f32.mxu0 %v1962_v2  ;;  %1748 = vmatprep.subr.mxu1 %v1833_v5 }
  0x49   : > { %1749 = vmatpush3.msra.mxu1 %v1833_v5  ;;  %1718 = vmatprep.subr.mxu0 %v1869_v15 }
  0x4a   : > { %1698 = vmatmul.mubr.f32.gmra.mxu1 %v391_v23  ;;  %1719 = vmatpush3.msra.mxu0 %v1869_v15 }
  0x4b   : > { %1666 = vmatmul.mubr.f32.gmra.mxu0 %v1965_v6  ;;  %1700 = vmatprep.mubr.f32.mxu1 %v401_v0 }
  0x4c   : > { %1668 = vmatprep.mubr.f32.mxu0 %v1996_v41  ;;  %1750 = vmatprep.subr.mxu1 %v1838_v7 }
  0x4d   : > { %1751 = vmatpush3.msra.mxu1 %v1838_v7 }
  0x4e   : > { %1701 = vmatmul.mubr.f32.gmra.mxu1 %v411_v19 }
  0x4f   : > { %1669 = vmatmul.mubr.f32.gmra.mxu0 %v2009_v60  ;;  %1703 = vmatprep.mubr.f32.mxu1 %v421_v26 }
  0x50   : > { %1671 = vmatprep.mubr.f32.mxu0 %v2016_v1 }
  0x52   : > { %1704 = vmatmul.mubr.f32.gmra.mxu1 %v431_v38 }
  0x53   : > { %1672 = vmatmul.mubr.f32.gmra.mxu0 %v2025_v20  ;;  %1706 = vmatprep.mubr.f32.mxu1 %v441_v31 }
  0x54   : > { %1674 = vmatprep.mubr.f32.mxu0 %v2037_v9 }
  0x56   : > { %1707 = vmatmul.mubr.f32.gmra.mxu1 %v451_v17 }
  0x57   : > { %1675 = vmatmul.mubr.f32.gmra.mxu0 %v2050_v8  ;;  %1709 = vmatprep.mubr.f32.mxu1 %v461_v25 }
  0x58   : > { %1677 = vmatprep.mubr.f32.mxu0 %v2058_v49 }
  0x5a   : > { %1710 = vmatmul.mubr.f32.gmra.mxu1 %v471_v33 }
  0x5b   : > { %1678 = vmatmul.mubr.f32.gmra.mxu0 %v2072_v18  ;;  %1752 = vmatprep.mubr.f32.mxu1 %v1898_v32 }
  0x5c   : > { %1720 = vmatprep.mubr.f32.mxu0 %v1898_v32 }
  0x5e   : > { %1753 = vmatmul.mubr.f32.vlgmr.msra.gmra.mxu1 %v1901_v34 }
  0x5f   : > { %1721 = vmatmul.mubr.f32.vlgmr.msra.gmra.mxu0 %v1901_v34  ;;  %1755 = vmatprep.mubr.f32.mxu1 %v1903_v35 }
  0x60   : > { %1723 = vmatprep.mubr.f32.mxu0 %v1903_v35 }
  0x62   : > { %1756 = vmatmul.mubr.f32.gmra.mxu1 %v1912_v40 }
  0x63   : > { %1724 = vmatmul.mubr.f32.gmra.mxu0 %v1912_v40  ;;  %1758 = vmatprep.mubr.f32.mxu1 %v1923_v45 }
  0x64   : > { %1726 = vmatprep.mubr.f32.mxu0 %v1923_v45 }
  0x66   : > { %1759 = vmatmul.mubr.f32.gmra.mxu1 %v1925_v46 }
  0x67   : > { %1727 = vmatmul.mubr.f32.gmra.mxu0 %v1925_v46  ;;  %1761 = vmatprep.mubr.f32.mxu1 %v1945_v57 }
  0x68   : > { %1729 = vmatprep.mubr.f32.mxu0 %v1945_v57 }
  0x6a   : > { %1762 = vmatmul.mubr.f32.gmra.mxu1 %v1947_v58 }
  0x6b   : > { %1730 = vmatmul.mubr.f32.gmra.mxu0 %v1947_v58  ;;  %1764 = vmatprep.mubr.f32.mxu1 %v1982_v29 }
  0x6c   : > { %1732 = vmatprep.mubr.f32.mxu0 %v1982_v29 }
  0x6e   : > { %1765 = vmatmul.mubr.f32.gmra.mxu1 %v1990_v36 }
  0x6f   : > { %1733 = vmatmul.mubr.f32.gmra.mxu0 %v1990_v36  ;;  %1767 = vmatprep.mubr.f32.mxu1 %v1998_v42 }
  0x70   : > { %1735 = vmatprep.mubr.f32.mxu0 %v1998_v42 }
  0x72   : > { %1768 = vmatmul.mubr.f32.gmra.mxu1 %v2011_v63 }
  0x73   : > { %1736 = vmatmul.mubr.f32.gmra.mxu0 %v2011_v63  ;;  %1770 = vmatprep.mubr.f32.mxu1 %v2018_v16 }
  0x74   : > { %1738 = vmatprep.mubr.f32.mxu0 %v2018_v16 }
  0x76   : > { %1771 = vmatmul.mubr.f32.gmra.mxu1 %v2027_v21 }
  0x77   : > { %1739 = vmatmul.mubr.f32.gmra.mxu0 %v2027_v21  ;;  %1773 = vmatprep.mubr.f32.mxu1 %v2039_v27 }
  0x78   : > { %1741 = vmatprep.mubr.f32.mxu0 %v2039_v27 }
  0x7a   : > { %1774 = vmatmul.mubr.f32.gmra.mxu1 %v2060_v50 }
  0x7b   : > { %1742 = vmatmul.mubr.f32.gmra.mxu0 %v2060_v50  ;;  %v2267_v50 = vld [vmem:[%s2387_s2] ss:$0 sm:$0xff] }
  0xde   : > { %v1626_v3 = vpop.f32.mrf.mxu1  ;;  %v1594_v4 = vpop.f32.mrf.mxu0 }
  0xdf   : > { %v336_v28 = vadd.f32 %v1594_v4, %v2267_v50 }
  0xe0   : > { %v2194_v5 = vpop.f32.mrf.mxu1  ;;  %v325_v7 = vpop.f32.mrf.mxu0 }
  0xe1   : > { %v326_v37 = vadd.f32 %v2267_v50, %v325_v7  ;;  %v573_v59 = vadd.f32 %v1626_v3, %v336_v28 }
  0xe2   : > { %v2196_v12 = vpop.f32.mrf.mxu1  ;;  %v1597_v13 = vpop.f32.mrf.mxu0 }
  0xe3   : > { %v356_v24 = vadd.f32 %v1597_v13, %v2267_v50 }
  0xe4   : > { %v2198_v14 = vpop.f32.mrf.mxu1  ;;  %v345_v15 = vpop.f32.mrf.mxu0 }
  0xe5   : > { %v346_v4 = vadd.f32 %v2267_v50, %v345_v15  ;;  %v585_v7 = vadd.f32 %v2196_v12, %v356_v24 }
  0xe6   : > { %v2200_v32 = vpop.f32.mrf.mxu1 }
  0xe7   : > { %v1600_v34 = vpop.f32.mrf.mxu0 }
  0xe8   : > { %v2202_v35 = vpop.f32.mrf.mxu1 }
  0xe9   : > { %v2204_v39 = vpop.f32.mrf.mxu0 }
  0xea   : > { %v2206_v40 = vpop.f32.mrf.mxu1  ;;  %v366_v13 = vadd.f32 %v2267_v50, %v2204_v39 }
  0xeb   : > { %v2208_v43 = vpop.f32.mrf.mxu0 }
  0xec   : > { %v2210_v44 = vpop.f32.mrf.mxu1 }
  0xed   : > { %v2212_v45 = vpop.f32.mrf.mxu0 }
  0xee   : > { %v2214_v46 = vpop.f32.mrf.mxu1  ;;  %v386_v39 = vadd.f32 %v2267_v50, %v2212_v45 }
  0xef   : > { %v2216_v47 = vpop.f32.mrf.mxu0 }
  0xf0   : > { %v2218_v48 = vpop.f32.mrf.mxu1 }
  0xf1   : > { %v2220_v51 = vpop.f32.mrf.mxu0 }
  0xf2   : > { %v2222_v52 = vpop.f32.mrf.mxu1 }
  0xf3   : > { %v2224_v53 = vpop.f32.mrf.mxu0 }
  0xf4   : > { %v2226_v54 = vpop.f32.mrf.mxu1 }
  0xf5   : > { %v2228_v56 = vpop.f32.mrf.mxu0 }
  0xf6   : > { %v2230_v57 = vpop.f32.mrf.mxu1 }
  0xf7   : > { %v2232_v58 = vpop.f32.mrf.mxu0 }
  0xf8   : > { %v2234_v61 = vpop.f32.mrf.mxu1 }
  0xf9   : > { %v2236_v62 = vpop.f32.mrf.mxu0 }
  0xfa   : > { %v2238_v2 = vpop.f32.mrf.mxu1 }
  0xfb   : > { %2389 = vst [vmem:[#allocation2_spill] sm:$0xff] %v2238_v2  ;;  %v2240_v6 = vpop.f32.mrf.mxu0  ;;  %v567_v2 = vadd.f32 %v2194_v5, %v326_v37  ;;  %v579_v5 = vadd.f32 %v2198_v14, %v346_v4 }
  0xfc   : > { %v2242_v22 = vpop.f32.mrf.mxu1 }
  0xfd   : > { %2390 = vst [vmem:[#allocation3_spill] sm:$0xff] %v2242_v22  ;;  %v2244_v23 = vpop.f32.mrf.mxu0 }
  0xfe   : > { %2391 = vst [vmem:[#allocation4_spill] sm:$0xff] %v2244_v23  ;;  %v1690_v29 = vpop.f32.mrf.mxu1 }
  0xff   : > { %v1658_v36 = vpop.f32.mrf.mxu0 }
 0x100   : > { %v918_v41 = vpop.f32.mrf.mxu1 }
 0x101   : > { %v736_v42 = vpop.f32.mrf.mxu0 }
 0x102   : > { %v1693_v60 = vpop.f32.mrf.mxu1  ;;  %v737_v3 = vadd.f32 %v736_v42, %v567_v2 }
 0x103   : > { %v1661_v63 = vpop.f32.mrf.mxu0 }
 0x104   : > { %v934_v0 = vpop.f32.mrf.mxu1  ;;  %v919_v2 = vadd.f32 %v918_v41, %v737_v3 }
 0x105   : > { %v750_v1 = vpop.f32.mrf.mxu0 }
 0x106   : > { %v2246_v16 = vpop.f32.mrf.mxu1  ;;  %v751_v42 = vadd.f32 %v750_v1, %v579_v5 }
 0x107   : > { %v1664_v19 = vpop.f32.mrf.mxu0 }
 0x108   : > { %v2248_v20 = vpop.f32.mrf.mxu1 }
 0x109   : > { %v764_v21 = vpop.f32.mrf.mxu0 }
 0x10a   : > { %v2250_v26 = vpop.f32.mrf.mxu1 }
 0x10b   : > { %v2252_v9 = vpop.f32.mrf.mxu0 }
 0x10c   : > { %v2254_v27 = vpop.f32.mrf.mxu1 }
 0x10d   : > { %v2256_v38 = vpop.f32.mrf.mxu0 }
 0x10e   : > { %v2258_v8 = vpop.f32.mrf.mxu1 }
 0x10f   : > { %v2260_v31 = vpop.f32.mrf.mxu0 }
 0x110   : > { %v2262_v49 = vpop.f32.mrf.mxu1 }
 0x111   : > { %v2269_v17 = vpop.f32.mrf.mxu0 }
 0x112   : > { %v2271_v18 = vpop.f32.mrf.mxu1 }
 0x113   : > { %2392 = vst [vmem:[#allocation5_spill] sm:$0xff] %v2271_v18  ;;  %v2273_v25 = vpop.f32.mrf.mxu0 }
 0x114   : > { %v2276_v30 = vpop.f32.mrf.mxu1 }
 0x115   : > { %2393 = vst [vmem:[#allocation6_spill] sm:$0xff] %v2276_v30  ;;  %v2278_v33 = vpop.f32.mrf.mxu0  ;;  %v744_v30 = vadd.f32 %v1658_v36, %v573_v59  ;;  %v758_v36 = vadd.f32 %v1661_v63, %v585_v7  ;;  %v396_v59 = vadd.f32 %v2208_v43, %v2267_v50 }
 0x116   : > { %v2281_v10 = vpop.f32.mrf.mxu1 }
 0x117   : > { %2394 = vst [vmem:[#allocation7_spill] sm:$0xff] %v2281_v10  ;;  %v2283_v55 = vpop.f32.mrf.mxu0  ;;  %v376_v10 = vadd.f32 %v1600_v34, %v2267_v50  ;;  %v927_v15 = vadd.f32 %v1690_v29, %v744_v30  ;;  %v943_v43 = vadd.f32 %v1693_v60, %v758_v36  ;;  %v609_v1 = vadd.f32 %v2206_v40, %v396_v59 }
 0x118   : > { %v2286_v11 = vpop.f32.mrf.mxu1  ;;  %v935_v30 = vadd.f32 %v934_v0, %v751_v42  ;;  %v603_v60 = vadd.f32 %v2210_v44, %v386_v39  ;;  %v426_v59 = vadd.f32 %v2267_v50, %v2228_v56  ;;  %v456_v42 = vadd.f32 %v2232_v58, %v2267_v50 }
 0x119   : > { %2395 = vst [vmem:[#allocation8_spill] sm:$0xff] %v2286_v11  ;;  %v2288_v22 = vpop.f32.mrf.mxu0  ;;  %v597_v34 = vadd.f32 %v2200_v32, %v376_v10  ;;  %v786_v40 = vadd.f32 %v2252_v9, %v609_v1 }
 0x11a   : > { %v2292_v18 = vpop.f32.mrf.mxu1 }
 0x11b   : > { %2396 = vst [vmem:[#allocation9_spill] sm:$0xff] %v2292_v18  ;;  %v2294_v23 = vpop.f32.mrf.mxu0  ;;  %v591_v18 = vadd.f32 %v2202_v35, %v366_v13  ;;  %v772_v29 = vadd.f32 %v1664_v19, %v597_v34  ;;  %v416_v35 = vadd.f32 %v2216_v47, %v2267_v50  ;;  %v406_v19 = vadd.f32 %v2267_v50, %v2220_v51 }
 0x11c   : > { %v2298_v28 = vpop.f32.mrf.mxu1  ;;  %v779_v51 = vadd.f32 %v2256_v38, %v603_v60  ;;  %v2400_v60 = vld [vmem:[#allocation2_spill] sm:$0xff] }
 0x11d   : > { %2397 = vst [vmem:[#allocation10_spill] sm:$0xff] %v2298_v28  ;;  %v2302_v11 = vpop.f32.mrf.mxu0  ;;  %v765_v10 = vadd.f32 %v764_v21, %v591_v18  ;;  %v959_v5 = vadd.f32 %v2246_v16, %v772_v29  ;;  %v621_v21 = vadd.f32 %v2214_v46, %v416_v35  ;;  %v436_v18 = vadd.f32 %v2224_v53, %v2267_v50 }
 0x11e   : > { %v1754_v37 = vpop.f32.mrf.mxu1  ;;  %v975_v46 = vadd.f32 %v2250_v26, %v786_v40 }
 0x11f   : > { %v1722_v12 = vpop.f32.mrf.mxu0  ;;  %v951_v44 = vadd.f32 %v2248_v20, %v765_v10  ;;  %v800_v53 = vadd.f32 %v2260_v31, %v621_v21 }
 0x120   : > { %v1128_v24 = vadd.f32 %v1722_v12, %v927_v15  ;;  %v1286_v28 = vpop.f32.mrf.mxu1 }
 0x121   : > { %v1121_v14 = vpop.f32.mrf.mxu0 }
 0x122   : > { %v1293_v32 = vadd.f32 %v1754_v37, %v1128_v24  ;;  %v1122_v41 = vadd.f32 %v1121_v14, %v919_v2  ;;  %v1757_v63 = vpop.f32.mrf.mxu1  ;;  %v615_v37 = vadd.f32 %v2218_v48, %v406_v19  ;;  %v633_v2 = vadd.f32 %v2222_v52, %v436_v18  ;;  %v2403_v18 = vld [vmem:[#allocation7_spill] sm:$0xff] }
 0x123   : > { %v1725_v45 = vpop.f32.mrf.mxu0  ;;  %v967_v48 = vadd.f32 %v2254_v27, %v779_v51  ;;  %v627_v14 = vadd.f32 %v2226_v54, %v426_v59  ;;  %v991_v52 = vadd.f32 %v2258_v8, %v800_v53 }
 0x124   : > { %1381 = vst [vmem:[%s2316_s4 + $0x8] sm:$0xff] %v1293_v32  ;;  %v1287_v4 = vadd.f32 %v1286_v28, %v1122_v41  ;;  %v1140_v7 = vadd.f32 %v1725_v45, %v943_v43  ;;  %v1298_v3 = vpop.f32.mrf.mxu1  ;;  %v793_v56 = vadd.f32 %v2269_v17, %v615_v37  ;;  %v446_v43 = vadd.f32 %v2267_v50, %v2236_v62 }
 0x125   : > { %v1133_v13 = vpop.f32.mrf.mxu0  ;;  %v814_v58 = vadd.f32 %v2273_v25, %v633_v2  ;;  %v645_v41 = vadd.f32 %v2230_v57, %v456_v42  ;;  %v807_v62 = vadd.f32 %v2278_v33, %v627_v14  ;;  %v2399_v57 = vld [vmem:[#allocation5_spill] sm:$0xff] }
 0x126   : > { %1380 = vst [vmem:[%s2316_s4] sm:$0xff] %v1287_v4  ;;  %v1305_v47 = vadd.f32 %v1757_v63, %v1140_v7  ;;  %v1134_v15 = vadd.f32 %v1133_v13, %v935_v30  ;;  %v1760_v0 = vpop.f32.mrf.mxu1  ;;  %v476_v63 = vadd.f32 %v2240_v6, %v2267_v50  ;;  %v983_v54 = vadd.f32 %v2262_v49, %v793_v56  ;;  %v2398_v30 = vld [vmem:[#allocation4_spill] sm:$0xff] }
 0x127   : > { %v1728_v28 = vpop.f32.mrf.mxu0  ;;  %v639_v45 = vadd.f32 %v2234_v61, %v446_v43  ;;  %v466_v10 = vadd.f32 %v2267_v50, %v2398_v30  ;;  %v1007_v7 = vadd.f32 %v2399_v57, %v814_v58  ;;  %v828_v6 = vadd.f32 %v2283_v55, %v645_v41 }
 0x128   : > { %1383 = vst [vmem:[%s2316_s4 + $0x18] sm:$0xff] %v1305_v47  ;;  %v1299_v36 = vadd.f32 %v1298_v3, %v1134_v15  ;;  %v1152_v16 = vadd.f32 %v1728_v28, %v959_v5  ;;  %v1310_v9 = vpop.f32.mrf.mxu1  ;;  %v657_v19 = vadd.f32 %v2400_v60, %v476_v63  ;;  %v2401_v5 = vld [vmem:[#allocation6_spill] sm:$0xff] }
 0x129   : > { %v1145_v12 = vpop.f32.mrf.mxu0  ;;  %v999_v40 = vadd.f32 %v2401_v5, %v807_v62  ;;  %v821_v61 = vadd.f32 %v2288_v22, %v639_v45  ;;  %v1023_v28 = vadd.f32 %v2403_v18, %v828_v6  ;;  %v2404_v22 = vld [vmem:[#allocation8_spill] sm:$0xff] }
 0x12a   : > { %1382 = vst [vmem:[%s2316_s4 + $0x10] sm:$0xff] %v1299_v36  ;;  %v1317_v34 = vadd.f32 %v1760_v0, %v1152_v16  ;;  %v1146_v20 = vadd.f32 %v1145_v12, %v951_v44  ;;  %v1763_v38 = vpop.f32.mrf.mxu1  ;;  %v2402_v0 = vld [vmem:[#allocation3_spill] sm:$0xff]  ;;  %v842_v44 = vadd.f32 %v2294_v23, %v657_v19 }
 0x12b   : > { %v1731_v24 = vpop.f32.mrf.mxu0  ;;  %v651_v21 = vadd.f32 %v2402_v0, %v466_v10  ;;  %v1015_v37 = vadd.f32 %v2404_v22, %v821_v61 }
 0x12c   : > { %1385 = vst [vmem:[%s2316_s4 + $0x28] sm:$0xff] %v1317_v34  ;;  %v1311_v39 = vadd.f32 %v1310_v9, %v1146_v20  ;;  %v1164_v26 = vadd.f32 %v1731_v24, %v975_v46  ;;  %v1322_v31 = vpop.f32.mrf.mxu1  ;;  %v2405_v20 = vld [vmem:[#allocation9_spill] sm:$0xff] }
 0x12d   : > { %v1157_v29 = vpop.f32.mrf.mxu0  ;;  %v835_v59 = vadd.f32 %v2302_v11, %v651_v21 }
 0x12e   : > { %1384 = vst [vmem:[%s2316_s4 + $0x20] sm:$0xff] %v1311_v39  ;;  %v1329_v32 = vadd.f32 %v1763_v38, %v1164_v26  ;;  %v1158_v27 = vadd.f32 %v1157_v29, %v967_v48  ;;  %v1766_v17 = vpop.f32.mrf.mxu1  ;;  %v1039_v38 = vadd.f32 %v2405_v20, %v842_v44  ;;  %v2406_v48 = vld [vmem:[#allocation10_spill] sm:$0xff] }
 0x12f   : > { %v1734_v1 = vpop.f32.mrf.mxu0  ;;  %v1031_v56 = vadd.f32 %v2406_v48, %v835_v59 }
 0x130   : > { %1387 = vst [vmem:[%s2316_s4 + $0x38] sm:$0xff] %v1329_v32  ;;  %v1323_v35 = vadd.f32 %v1322_v31, %v1158_v27  ;;  %v1176_v8 = vadd.f32 %v1734_v1, %v991_v52  ;;  %v1334_v25 = vpop.f32.mrf.mxu1 }
 0x131   : > { %v1169_v4 = vpop.f32.mrf.mxu0 }
 0x132   : > { %1386 = vst [vmem:[%s2316_s4 + $0x30] sm:$0xff] %v1323_v35  ;;  %v1341_v49 = vadd.f32 %v1766_v17, %v1176_v8  ;;  %v1170_v3 = vadd.f32 %v1169_v4, %v983_v54  ;;  %v1769_v33 = vpop.f32.mrf.mxu1 }
 0x133   : > { %v1737_v13 = vpop.f32.mrf.mxu0 }
 0x134   : > { %1389 = vst [vmem:[%s2316_s4 + $0x48] sm:$0xff] %v1341_v49  ;;  %v1335_v50 = vadd.f32 %v1334_v25, %v1170_v3  ;;  %v1188_v47 = vadd.f32 %v1737_v13, %v1007_v7  ;;  %v1346_v15 = vpop.f32.mrf.mxu1 }
 0x135   : > { %v1181_v55 = vpop.f32.mrf.mxu0 }
 0x136   : > { %1388 = vst [vmem:[%s2316_s4 + $0x40] sm:$0xff] %v1335_v50  ;;  %v1353_v51 = vadd.f32 %v1769_v33, %v1188_v47  ;;  %v1182_v36 = vadd.f32 %v1181_v55, %v999_v40  ;;  %v1772_v16 = vpop.f32.mrf.mxu1 }
 0x137   : > { %v1740_v9 = vpop.f32.mrf.mxu0 }
 0x138   : > { %1391 = vst [vmem:[%s2316_s4 + $0x58] sm:$0xff] %v1353_v51  ;;  %v1347_v12 = vadd.f32 %v1346_v15, %v1182_v36  ;;  %v1200_v46 = vadd.f32 %v1740_v9, %v1023_v28  ;;  %v1358_v53 = vpop.f32.mrf.mxu1 }
 0x139   : > { %v1193_v34 = vpop.f32.mrf.mxu0 }
 0x13a   : > { %1390 = vst [vmem:[%s2316_s4 + $0x50] sm:$0xff] %v1347_v12  ;;  %v1365_v23 = vadd.f32 %v1772_v16, %v1200_v46  ;;  %v1194_v2 = vadd.f32 %v1193_v34, %v1015_v37  ;;  %v1775_v24 = vpop.f32.mrf.mxu1 }
 0x13b   : > { %v1743_v42 = vpop.f32.mrf.mxu0 }
 0x13c   : > { %1393 = vst [vmem:[%s2316_s4 + $0x68] sm:$0xff] %v1365_v23  ;;  %v1359_v39 = vadd.f32 %v1358_v53, %v1194_v2  ;;  %v1212_v11 = vadd.f32 %v1743_v42, %v1039_v38  ;;  %v1370_v43 = vpop.f32.mrf.mxu1 }
 0x13d   : > { %v1205_v26 = vpop.f32.mrf.mxu0 }
 0x13e   : > { %1392 = vst [vmem:[%s2316_s4 + $0x60] sm:$0xff] %v1359_v39  ;;  %v1377_v31 = vadd.f32 %v1775_v24, %v1212_v11  ;;  %v1206_v14 = vadd.f32 %v1205_v26, %v1031_v56 }
 0x140   : > { %1395 = vst [vmem:[%s2316_s4 + $0x78] sm:$0xff] %v1377_v31  ;;  %v1371_v29 = vadd.f32 %v1370_v43, %v1206_v14 }
 0x142   : > { %1394 = vst [vmem:[%s2316_s4 + $0x70] sm:$0xff] %v1371_v29 }
 0x143 PF: > { %s13_s12 = sadd.s32 1, %s1790_s12  }
 0x144   : > { %p10_p4 = scmp.ge.s32.totalorder %s13_s12, 4  }
 0x146   :  { %12 = sbr.rel (!%p10_p4) target bundleno = 1 (0x1), region = 62 }

// kernel: se_bottleneck_forward.5
= control target key start
LH: loop header
LB: loop body
LE: loop exit
PB: predicated region body
PF: predicated region fallthrough
CT: control target
= control target key end

     0   :  { %s4078_s12 = smov 0   ;;  %s6012_s0 = inlined_call_operand.vmem [shape: f32[256,288], index: 0, kind: input, shape index: {}]   ;;  %s6013_s1 = inlined_call_operand.vmem [shape: f32[288,32], index: 1, kind: input, shape index: {}]   ;;  %s6014_s2 = inlined_call_operand.vmem [shape: f32[1,32], index: 2, kind: input, shape index: {}]   ;;  %s6015_s3 = inlined_call_operand.vmem [shape: f32[256,32], index: 3, kind: output, shape index: {}]  }
   0x1 LB: > { %s3237_s13 = sadd.s32 4294967295, %s4056_s12   ;;  %p3241_p0 = scmp.ge.s32.totalorder %s4056_s12, 1  ;;  %s4056_s12 = sphi %s4078_s12, %s13_s12  }
   0x2   : > { %p139_p1 = scmp.lt.s32.totalorder %s4056_s12, 3 }
   0x4   : > { %p140_p2 = pnand %p3241_p0, %p139_p1 }
   0x6   : > { %143 = sbr.rel (%p140_p2) target bundleno = 550 (0x226), region = 32 }
   0xb   : > { %v256_v0 = vld [vmem:[%s6013_s1 + $0xf8] sm:$0xff]  ;;  %v255_v2 = vld [vmem:[%s6013_s1 + $0xf0] sm:$0xff]  ;;  %v254_v7 = vld [vmem:[%s6013_s1 + $0xe8] sm:$0xff]  ;;  %s4248_s25 = sshll.u32 %s3237_s13, 4  ;;  %vm268_vm0 = vcmask 261120  }
   0xc   : > { %v240_v1 = vld [vmem:[%s6013_s1 + $0x78] sm:$0xff]  ;;  %v4095_v3 = vand.u32 4294901760, %v256_v0  ;;  %v4099_v5 = vand.u32 4294901760, %v255_v2  ;;  %v239_v6 = vld [vmem:[%s6013_s1 + $0x70] sm:$0xff]  ;;  %v238_v8 = vld [vmem:[%s6013_s1 + $0x68] sm:$0xff]  ;;  %v4112_v10 = vand.u32 4294901760, %v254_v7 }
   0xd   : > { %v4097_v4 = vand.u32 4294901760, %v240_v1  ;;  %v4110_v9 = vand.u32 4294901760, %v239_v6  ;;  %v4114_v11 = vand.u32 4294901760, %v238_v8  ;;  %v253_v12 = vld [vmem:[%s6013_s1 + $0xe0] sm:$0xff]  ;;  %v4125_v14 = vld [vmem:[%s6013_s1 + $0xd8] sm:$0xff]  ;;  %v4146_v20 = vld [vmem:[%s6013_s1 + $0xd0] sm:$0xff] }
   0xe   : > { %6233 = vst [vmem:[#allocation2_spill] sm:$0xff] %v4099_v5  ;;  %v237_v13 = vld [vmem:[%s6013_s1 + $0x60] sm:$0xff]  ;;  %3249 = vmatprep.subr.mxu0 %v4095_v3  ;;  %v4128_v15 = vand.u32 4294901760, %v253_v12  ;;  %v4133_v17 = vand.u32 4294901760, %v4125_v14  ;;  %v4136_v18 = vsub.f32 %v256_v0, %v4095_v3  ;;  %v4141_v19 = vld [vmem:[%s6013_s1 + $0x58] sm:$0xff]  ;;  %v4151_v21 = vld [vmem:[%s6013_s1 + $0x50] sm:$0xff]  ;;  %v4164_v25 = vsub.f32 %v255_v2, %v4099_v5 }
   0xf   : > { %v4130_v16 = vand.u32 4294901760, %v237_v13  ;;  %3250 = vmatpush3.msra.mxu0 %v4097_v4  ;;  %v4155_v22 = vand.u32 4294901760, %v4141_v19  ;;  %v4158_v23 = vsub.f32 %v240_v1, %v4097_v4  ;;  %v4161_v24 = vand.u32 4294901760, %v4146_v20  ;;  %v4169_v26 = vld [vmem:[%s6013_s1 + $0xc8] sm:$0xff]  ;;  %v4179_v28 = vld [vmem:[%s6013_s1 + $0xc0] sm:$0xff]  ;;  %v4231_v46 = vld [vmem:[%s6013_s1 + $0xb8] sm:$0xff] }
  0x10   : > { %6234 = vst [vmem:[#allocation3_spill] sm:$0xff] %v4136_v18  ;;  %6236 = vst [vmem:[#allocation5_spill] sm:$0xff] %v4164_v25  ;;  %v4174_v27 = vld [vmem:[%s6013_s1 + $0x48] sm:$0xff]  ;;  %3251 = vmatprep.subr.mxu0 %v4099_v5  ;;  %v6029_v29 = vand.u32 4294901760, %v4136_v18  ;;  %v4184_v30 = vand.u32 4294901760, %v4151_v21  ;;  %v4187_v31 = vsub.f32 %v239_v6, %v4110_v9  ;;  %v4190_v32 = vand.u32 4294901760, %v4169_v26 }
  0x11   : > { %6235 = vst [vmem:[#allocation4_spill] sm:$0xff] %v4158_v23  ;;  %3252 = vmatpush3.msra.mxu0 %v4110_v9  ;;  %v6028_v33 = vand.u32 4294901760, %v4158_v23  ;;  %v6026_v34 = vand.u32 4294901760, %v4164_v25  ;;  %v4196_v35 = vsub.f32 %v254_v7, %v4112_v10  ;;  %v4199_v36 = vand.u32 4294901760, %v4174_v27  ;;  %v4204_v37 = vld [vmem:[%s6013_s1 + $0x40] sm:$0xff]  ;;  %v4244_v51 = vld [vmem:[%s6013_s1 + $0x38] sm:$0xff] }
  0x12   : > { %6237 = vst [vmem:[#allocation6_spill] sm:$0xff] %v4187_v31  ;;  %3253 = vmatprep.subr.mxu0 %v4112_v10  ;;  %v770_v38 = vsub.f32 %v4136_v18, %v6029_v29  ;;  %v6025_v39 = vand.u32 4294901760, %v4187_v31  ;;  %v4212_v40 = vsub.f32 %v238_v8, %v4114_v11  ;;  %v4215_v41 = vand.u32 4294901760, %v4179_v28  ;;  %v4258_v56 = vld [vmem:[%s6013_s1 + $0xb0] sm:$0xff]  ;;  %v4289_v2 = vld [vmem:[%s6013_s1 + $0xa8] sm:$0xff]  ;;  %p165_p3 = scmp.lt.s32.totalorder %s4248_s25, 31 }
  0x13   : > { %6238 = vst [vmem:[#allocation7_spill] sm:$0xff] %v4196_v35  ;;  %6239 = vst [vmem:[#allocation8_spill] sm:$0xff] %v4199_v36  ;;  %3254 = vmatpush3.msra.mxu0 %v4114_v11  ;;  %v658_v42 = vsub.f32 %v4158_v23, %v6028_v33  ;;  %v777_v43 = vsub.f32 %v4164_v25, %v6026_v34  ;;  %v6023_v44 = vand.u32 4294901760, %v4196_v35  ;;  %v4239_v50 = vand.u32 4294901760, %v4204_v37  ;;  %v4273_v61 = vld [vmem:[%s6013_s1 + $0x30] sm:$0xff]  ;;  %v4432_v33 = vld [vmem:[%s6013_s1 + $0x88] sm:$0xff] }
  0x14   : > { %6240 = vst [vmem:[#allocation9_spill] sm:$0xff] %v4212_v40  ;;  %6241 = vst [vmem:[#allocation10_spill] sm:$0xff] %v4215_v41  ;;  %v4226_v45 = vsub.f32 %v253_v12, %v4128_v15  ;;  %3255 = vmatprep.subr.mxu0 %v4128_v15  ;;  %v771_v47 = vand.u32 4294901760, %v770_v38  ;;  %v665_v48 = vsub.f32 %v4187_v31, %v6025_v39  ;;  %v6021_v49 = vand.u32 4294901760, %v4212_v40  ;;  %s6583_s25 = smov (!%p165_p3, %s4248_s25), 31 }
  0x15   : > { %6243 = vst [vmem:[#allocation12_spill] sm:$0xff] %v4239_v50  ;;  %3256 = vmatpush3.msra.mxu0 %v4130_v16  ;;  %v659_v52 = vand.u32 4294901760, %v658_v42  ;;  %v778_v53 = vand.u32 4294901760, %v777_v43  ;;  %v784_v54 = vsub.f32 %v4196_v35, %v6023_v44  ;;  %v4265_v59 = vsub.f32 %v237_v13, %v4130_v16  ;;  %v4304_v13 = vld [vmem:[%s6013_s1 + $0x28] sm:$0xff]  ;;  %v4404_v44 = vld [vmem:[%s6013_s1 + $0x90] sm:$0xff]  ;;  %s4041_s18 = smul.u32 24, %s6583_s25 }
  0x16   : > { %6242 = vst [vmem:[#allocation11_spill] sm:$0xff] %v4226_v45  ;;  %v6020_v55 = vand.u32 4294901760, %v4226_v45  ;;  %3257 = vmatprep.subr.mxu0 %v4133_v17  ;;  %3329 = vmatprep.subr.mxu1 %v771_v47  ;;  %v666_v57 = vand.u32 4294901760, %v665_v48  ;;  %v672_v58 = vsub.f32 %v4212_v40, %v6021_v49  ;;  %v4268_v60 = vand.u32 4294901760, %v4231_v46  ;;  %v4388_v49 = vld [vmem:[%s6013_s1 + $0x18] sm:$0xff]  ;;  %s3245_s17 = sshll.u32 %s6583_s25, 3 }
  0x17   : > { %6244 = vst [vmem:[#allocation13_spill] sm:$0xff] %v4265_v59  ;;  %3258 = vmatpush3.msra.mxu0 %v4155_v22  ;;  %3330 = vmatpush3.msra.mxu1 %v659_v52  ;;  %v785_v62 = vand.u32 4294901760, %v784_v54  ;;  %v4281_v0 = vsub.f32 %v4125_v14, %v4133_v17  ;;  %v4284_v1 = vand.u32 4294901760, %v4244_v51  ;;  %v6018_v7 = vand.u32 4294901760, %v4265_v59  ;;  %s4465_s13 = scalar_lea.vmem %s6012_s0, %s4041_s18  ;;  %s5925_s19 = scalar_lea.vmem %s6015_s3, %s3245_s17 }
  0x18   : > { %6245 = vst [vmem:[#allocation14_spill] sm:$0xff] %v4268_v60  ;;  %v791_v63 = vsub.f32 %v4226_v45, %v6020_v55  ;;  %3259 = vmatprep.subr.mxu0 %v4161_v24  ;;  %3331 = vmatprep.subr.mxu1 %v778_v53  ;;  %v673_v6 = vand.u32 4294901760, %v672_v58  ;;  %v4296_v8 = vsub.f32 %v4141_v19, %v4155_v22  ;;  %v4299_v12 = vand.u32 4294901760, %v4258_v56 }
  0x19   : > { %6246 = vst [vmem:[#allocation15_spill] sm:$0xff] %v4281_v0  ;;  %6247 = vst [vmem:[#allocation16_spill] sm:$0xff] %v4284_v1  ;;  %3260 = vmatpush3.msra.mxu0 %v4184_v30  ;;  %3332 = vmatpush3.msra.mxu1 %v666_v57  ;;  %v6016_v38 = vand.u32 4294901760, %v4281_v0  ;;  %v4310_v19 = vsub.f32 %v4146_v20, %v4161_v24  ;;  %v4313_v42 = vand.u32 4294901760, %v4273_v61  ;;  %v4325_v52 = vand.u32 4294901760, %v4289_v2  ;;  %v4330_v20 = vld [vmem:[%s6013_s1 + $0xa0] sm:$0xff] }
  0x1a   : > { %6248 = vst [vmem:[#allocation17_spill] sm:$0xff] %v4296_v8  ;;  %6249 = vst [vmem:[#allocation18_spill] sm:$0xff] %v4299_v12  ;;  %v792_v14 = vand.u32 4294901760, %v791_v63  ;;  %3261 = vmatprep.subr.mxu0 %v4190_v32  ;;  %3333 = vmatprep.subr.mxu1 %v785_v62  ;;  %v679_v43 = vsub.f32 %v4265_v59, %v6018_v7  ;;  %v6017_v47 = vand.u32 4294901760, %v4296_v8  ;;  %v4342_v57 = vand.u32 4294901760, %v4304_v13 }
  0x1b   : > { %6250 = vst [vmem:[#allocation19_spill] sm:$0xff] %v4313_v42  ;;  %v4322_v48 = vsub.f32 %v4151_v21, %v4184_v30  ;;  %6251 = vst [vmem:[#allocation20_spill] sm:$0xff] %v4325_v52  ;;  %3262 = vmatpush3.msra.mxu0 %v4199_v36  ;;  %3334 = vmatpush3.msra.mxu1 %v673_v6  ;;  %v798_v53 = vsub.f32 %v4281_v0, %v6016_v38  ;;  %v6019_v54 = vand.u32 4294901760, %v4310_v19  ;;  %v4361_v6 = vld [vmem:[%s6013_s1 + $0x20] sm:$0xff] }
  0x1c   : > { %v4339_v21 = vsub.f32 %v4169_v26, %v4190_v32  ;;  %6252 = vst [vmem:[#allocation21_spill] sm:$0xff] %v4342_v57  ;;  %3263 = vmatprep.subr.mxu0 %v4215_v41  ;;  %3335 = vmatprep.subr.mxu1 %v792_v14  ;;  %v680_v58 = vand.u32 4294901760, %v679_v43  ;;  %v686_v62 = vsub.f32 %v4296_v8, %v6017_v47  ;;  %v4369_v47 = vand.u32 4294901760, %v4330_v20 }
  0x1d   : > { %v6022_v63 = vand.u32 4294901760, %v4322_v48  ;;  %v4356_v26 = vsub.f32 %v4174_v27, %v4199_v36  ;;  %3264 = vmatpush3.msra.mxu0 %v4239_v50  ;;  %v799_v38 = vand.u32 4294901760, %v798_v53  ;;  %v805_v14 = vsub.f32 %v4310_v19, %v6019_v54  ;;  %v4374_v27 = vld [vmem:[%s6013_s1 + $0x98] sm:$0xff] }
  0x1e   : > { %v6024_v43 = vand.u32 4294901760, %v4339_v21  ;;  %6253 = vst [vmem:[#allocation22_spill] sm:$0xff] %v4369_v47  ;;  %3336 = vmatpush3.msra.mxu1 %v680_v58  ;;  %3265 = vmatprep.subr.mxu0 %v4268_v60  ;;  %v687_v7 = vand.u32 4294901760, %v686_v62  ;;  %v4383_v55 = vsub.f32 %v4179_v28, %v4215_v41  ;;  %v4399_v28 = vsub.f32 %v4204_v37, %v4239_v50  ;;  %v4418_v37 = vld [vmem:[%s6013_s1 + $0x10] sm:$0xff]  ;;  %v177_v41 = vld [vmem:[%s4465_s13] sm:$0xff] }
  0x1f   : > { %v693_v53 = vsub.f32 %v4322_v48, %v6022_v63  ;;  %v6027_v54 = vand.u32 4294901760, %v4356_v26  ;;  %3337 = vmatprep.subr.mxu1 %v799_v38  ;;  %3266 = vmatpush3.msra.mxu0 %v4284_v1  ;;  %v806_v58 = vand.u32 4294901760, %v805_v14  ;;  %v4395_v63 = vand.u32 4294901760, %v4361_v6 }
  0x20   : > { %v812_v62 = vsub.f32 %v4339_v21, %v6024_v43  ;;  %6254 = vst [vmem:[#allocation23_spill] sm:$0xff] %v4399_v28  ;;  %3338 = vmatpush3.msra.mxu1 %v687_v7  ;;  %3267 = vmatprep.subr.mxu0 %v4299_v12  ;;  %v6032_v43 = vand.u32 4294901760, %v4383_v55  ;;  %v4413_v39 = vand.u32 4294901760, %v4374_v27  ;;  %v4424_v34 = vsub.f32 %v4231_v46, %v4268_v60 }
  0x21   : > { %v694_v38 = vand.u32 4294901760, %v693_v53  ;;  %v700_v14 = vsub.f32 %v4356_v26, %v6027_v54  ;;  %3339 = vmatprep.subr.mxu1 %v806_v58  ;;  %3268 = vmatpush3.msra.mxu0 %v4313_v42  ;;  %v6033_v53 = vand.u32 4294901760, %v4399_v28  ;;  %v4427_v54 = vand.u32 4294901760, %v4388_v49 }
  0x22   : > { %6255 = vst [vmem:[#allocation24_spill] sm:$0xff] %v4413_v39  ;;  %v813_v7 = vand.u32 4294901760, %v812_v62  ;;  %6256 = vst [vmem:[#allocation25_spill] sm:$0xff] %v4424_v34  ;;  %3269 = vmatprep.subr.mxu0 %v4325_v52  ;;  %v819_v62 = vsub.f32 %v4383_v55, %v6032_v43  ;;  %v4440_v46 = vsub.f32 %v4244_v51, %v4284_v1  ;;  %v4443_v29 = vand.u32 4294901760, %v4404_v44  ;;  %v4460_v51 = vld [vmem:[%s6013_s1 + $0x8] sm:$0xff] }
  0x23   : > { %6257 = vst [vmem:[#allocation26_spill] sm:$0xff] %v4427_v54  ;;  %3340 = vmatpush3.msra.mxu1 %v694_v38  ;;  %v701_v58 = vand.u32 4294901760, %v700_v14  ;;  %3270 = vmatpush3.msra.mxu0 %v4342_v57  ;;  %v707_v38 = vsub.f32 %v4399_v28, %v6033_v53  ;;  %v4452_v60 = vsub.f32 %v4258_v56, %v4299_v12  ;;  %v4455_v43 = vand.u32 4294901760, %v4418_v37  ;;  %v4479_v12 = vld [vmem:[%s6013_s1 + $0x80] sm:$0xff] }
  0x24   : > { %6258 = vst [vmem:[#allocation27_spill] sm:$0xff] %v4440_v46  ;;  %6259 = vst [vmem:[#allocation28_spill] sm:$0xff] %v4443_v29  ;;  %3341 = vmatprep.subr.mxu1 %v813_v7  ;;  %3271 = vmatprep.subr.mxu0 %v4369_v47  ;;  %v820_v7 = vand.u32 4294901760, %v819_v62  ;;  %v4471_v53 = vsub.f32 %v4273_v61, %v4313_v42  ;;  %v4474_v14 = vand.u32 4294901760, %v4432_v33  ;;  %v6261_v62 = vand.u32 4294901760, %v4424_v34 }
  0x25   : > { %6260 = vst [vmem:[#allocation29_spill] sm:$0xff] %v4452_v60  ;;  %3342 = vmatpush3.msra.mxu1 %v701_v58  ;;  %3272 = vmatpush3.msra.mxu0 %v4395_v63  ;;  %v708_v58 = vand.u32 4294901760, %v707_v38  ;;  %v4488_v61 = vsub.f32 %v4289_v2, %v4325_v52  ;;  %v6263_v42 = vand.u32 4294901760, %v4440_v46  ;;  %v4496_v38 = vand.u32 4294901760, %v4460_v51  ;;  %v4505_v2 = vld [vmem:[%s6013_s1] sm:$0xff] }
  0x26   : > { %v826_v56 = vsub.f32 %v4424_v34, %v6261_v62  ;;  %3343 = vmatprep.subr.mxu1 %v820_v7  ;;  %3273 = vmatprep.subr.mxu0 %v4413_v39  ;;  %v4500_v62 = vsub.f32 %v4304_v13, %v4342_v57  ;;  %v178_v7 = vld [vmem:[%s4465_s13 + $0x8] sm:$0xff]  ;;  %v6266_v57 = vand.u32 4294901760, %v4471_v53 }
  0x27   : > { %6262 = vst [vmem:[#allocation30_spill] sm:$0xff] %v4488_v61  ;;  %v714_v28 = vsub.f32 %v4440_v46, %v6263_v42  ;;  %3344 = vmatpush3.msra.mxu1 %v708_v58  ;;  %3274 = vmatpush3.msra.mxu0 %v4427_v54  ;;  %v6264_v42 = vand.u32 4294901760, %v4452_v60  ;;  %v6058_v52 = vand.u32 4294901760, %v4488_v61  ;;  %v4514_v46 = vand.u32 4294901760, %v4479_v12 }
  0x28   : > { %v827_v1 = vand.u32 4294901760, %v826_v56  ;;  %3275 = vmatprep.subr.mxu0 %v4443_v29  ;;  %v721_v34 = vsub.f32 %v4471_v53, %v6266_v57  ;;  %v4523_v58 = vsub.f32 %v4330_v20, %v4369_v47  ;;  %v4533_v57 = vand.u32 4294901760, %v178_v7 }
  0x29   : > { %v833_v50 = vsub.f32 %v4452_v60, %v6264_v42  ;;  %6265 = vst [vmem:[#allocation31_spill] sm:$0xff] %v4514_v46  ;;  %v715_v13 = vand.u32 4294901760, %v714_v28  ;;  %3276 = vmatpush3.msra.mxu0 %v4455_v43  ;;  %v840_v28 = vsub.f32 %v4488_v61, %v6058_v52  ;;  %v4531_v60 = vand.u32 4294901760, %v4505_v2 }
  0x2a   : > { %3345 = vmatprep.subr.mxu1 %v827_v1  ;;  %6268 = vst [vmem:[#allocation33_spill] sm:$0xff] %v4533_v57  ;;  %v722_v56 = vand.u32 4294901760, %v721_v34  ;;  %3277 = vmatprep.subr.mxu0 %v4474_v14  ;;  %v6269_v20 = vand.u32 4294901760, %v4500_v62  ;;  %v4542_v47 = vsub.f32 %v4361_v6, %v4395_v63  ;;  %v4546_v61 = vsub.f32 %v178_v7, %v4533_v57 }
  0x2b   : > { %v834_v42 = vand.u32 4294901760, %v833_v50  ;;  %6267 = vst [vmem:[#allocation32_spill] sm:$0xff] %v4531_v60  ;;  %3346 = vmatpush3.msra.mxu1 %v715_v13  ;;  %v841_v52 = vand.u32 4294901760, %v840_v28  ;;  %3278 = vmatpush3.msra.mxu0 %v4496_v38  ;;  %v4548_v34 = vand.u32 4294901760, %v177_v41  ;;  %v4552_v13 = vsub.f32 %v4374_v27, %v4413_v39 }
  0x2c   : > { %v728_v50 = vsub.f32 %v4500_v62, %v6269_v20  ;;  %6270 = vst [vmem:[#allocation34_spill] sm:$0xff] %v4546_v61  ;;  %v181_v20 = vld [vmem:[%s4465_s13 + $0x20] sm:$0xff]  ;;  %3279 = vmatprep.subr.mxu0 %v4514_v46  ;;  %v6273_v6 = vand.u32 4294901760, %v4523_v58  ;;  %v4562_v7 = vsub.f32 %v4388_v49, %v4427_v54  ;;  %v6068_v27 = vand.u32 4294901760, %v4546_v61  ;;  %879 = vmatprep.mubr.f32.mxu1 %v4533_v57 }
  0x2d   : > { %3347 = vmatprep.subr.mxu1 %v834_v42  ;;  %6271 = vst [vmem:[#allocation35_spill] sm:$0xff] %v4548_v34  ;;  %6272 = vst [vmem:[#allocation36_spill] sm:$0xff] %v4552_v13  ;;  %3280 = vmatpush3.msra.mxu0 %v4531_v60  ;;  %v6276_v49 = vand.u32 4294901760, %v4542_v47  ;;  %v4578_v39 = vand.u32 4294901760, %v181_v20 }
  0x2e   : > { %3348 = vmatpush3.msra.mxu1 %v722_v56  ;;  %v729_v1 = vand.u32 4294901760, %v728_v50  ;;  %v847_v42 = vsub.f32 %v4523_v58, %v6273_v6  ;;  %6274 = vst [vmem:[#allocation37_spill] sm:$0xff] %v4562_v7  ;;  %v4567_v56 = vsub.f32 %v177_v41, %v4548_v34  ;;  %v4572_v6 = vsub.f32 %v4404_v44, %v4443_v29  ;;  %v180_v29 = vld [vmem:[%s4465_s13 + $0x18] sm:$0xff] }
  0x2f   : > { %3349 = vmatprep.subr.mxu1 %v841_v52  ;;  %v735_v52 = vsub.f32 %v4542_v47, %v6276_v49  ;;  %v6075_v54 = vand.u32 4294901760, %v4562_v7  ;;  %6277 = vst [vmem:[#allocation39_spill] sm:$0xff] %v4578_v39  ;;  %3409 = vmatprep.subr.mxu0 %v4136_v18  ;;  %v416_v41 = vsub.f32 %v4546_v61, %v6068_v27  ;;  %v6278_v44 = vand.u32 4294901760, %v4552_v13 }
  0x30   : > { %6275 = vst [vmem:[#allocation38_spill] sm:$0xff] %v4567_v56  ;;  %3350 = vmatpush3.msra.mxu1 %v729_v1  ;;  %v848_v28 = vand.u32 4294901760, %v847_v42  ;;  %v4595_v27 = vsub.f32 %v181_v20, %v4578_v39  ;;  %v4599_v50 = vsub.f32 %v4418_v37, %v4455_v43  ;;  %v6280_v42 = vand.u32 4294901760, %v4567_v56  ;;  %v184_v37 = vld [vmem:[%s4465_s13 + $0x38] sm:$0xff] }
  0x31   : > { %v854_v1 = vsub.f32 %v4552_v13, %v6278_v44  ;;  %v736_v49 = vand.u32 4294901760, %v735_v52  ;;  %v742_v18 = vsub.f32 %v4562_v7, %v6075_v54  ;;  %v417_v44 = vand.u32 4294901760, %v416_v41 }
  0x32   : > { %3351 = vmatprep.subr.mxu1 %v848_v28  ;;  %6279 = vst [vmem:[#allocation40_spill] sm:$0xff] %v4595_v27  ;;  %v422_v61 = vsub.f32 %v4567_v56, %v6280_v42  ;;  %v6281_v28 = vand.u32 4294901760, %v4572_v6  ;;  %v6079_v54 = vand.u32 4294901760, %v4595_v27  ;;  %v6078_v20 = vand.u32 4294901760, %v4599_v50 }
  0x33   : > { %v855_v13 = vand.u32 4294901760, %v854_v1  ;;  %3352 = vmatpush3.msra.mxu1 %v736_v49  ;;  %v743_v57 = vand.u32 4294901760, %v742_v18  ;;  %v4609_v7 = vand.u32 4294901760, %v180_v29  ;;  %418 = vmatprep.mubr.f32.mxu0 %v417_v44  ;;  %v4614_v1 = vsub.f32 %v4432_v33, %v4474_v14 }
  0x34   : > { %v861_v52 = vsub.f32 %v4572_v6, %v6281_v28  ;;  %v423_v41 = vand.u32 4294901760, %v422_v61  ;;  %v4618_v18 = vsub.f32 %v4460_v51, %v4496_v38  ;;  %v431_v49 = vsub.f32 %v4595_v27, %v6079_v54 }
  0x35   : > { %6282 = vst [vmem:[#allocation41_spill] sm:$0xff] %v4609_v7  ;;  %3353 = vmatprep.subr.mxu1 %v855_v13  ;;  %v749_v61 = vsub.f32 %v4599_v50, %v6078_v20  ;;  %v4627_v13 = vsub.f32 %v180_v29, %v4609_v7  ;;  %v4631_v33 = vsub.f32 %v4479_v12, %v4514_v46  ;;  %v6082_v51 = vand.u32 4294901760, %v4614_v1  ;;  %v187_v20 = vld [vmem:[%s4465_s13 + $0x50] sm:$0xff] }
  0x36   : > { %v862_v42 = vand.u32 4294901760, %v861_v52  ;;  %6283 = vst [vmem:[#allocation42_spill] sm:$0xff] %v4618_v18  ;;  %3354 = vmatpush3.msra.mxu1 %v743_v57  ;;  %424 = vmatmul.mubr.f32.vlgmr.msra.gmra.mxu0 %v423_v41  ;;  %v6083_v57 = vand.u32 4294901760, %v4618_v18  ;;  %v4635_v44 = vand.u32 4294901760, %v184_v37  ;;  %v4639_v28 = vsub.f32 %v4505_v2, %v4531_v60  ;;  %v183_v52 = vld [vmem:[%s4465_s13 + $0x30] sm:$0xff] }
  0x37   : > { %6284 = vst [vmem:[#allocation43_spill] sm:$0xff] %v4627_v13  ;;  %6285 = vst [vmem:[#allocation44_spill] sm:$0xff] %v4631_v33  ;;  %v432_v29 = vand.u32 4294901760, %v431_v49  ;;  %v750_v54 = vand.u32 4294901760, %v749_v61  ;;  %v6090_v12 = vand.u32 4294901760, %v4627_v13  ;;  %v6093_v41 = vand.u32 4294901760, %v4631_v33  ;;  %3410 = vmatpush3.msra.mxu0 %v4158_v23 }
  0x38   : > { %3355 = vmatprep.subr.mxu1 %v862_v42  ;;  %6286 = vst [vmem:[#allocation45_spill] sm:$0xff] %v4635_v44  ;;  %v868_v42 = vsub.f32 %v4614_v1, %v6082_v51  ;;  %v756_v2 = vsub.f32 %v4618_v18, %v6083_v57  ;;  %v4653_v27 = vsub.f32 %v184_v37, %v4635_v44  ;;  %v4663_v57 = vand.u32 4294901760, %v183_v52  ;;  %v186_v23 = vld [vmem:[%s4465_s13 + $0x48] sm:$0xff] }
  0x39   : > { %3411 = vmatprep.subr.mxu0 %v4164_v25  ;;  %433 = vmatprep.mubr.f32.mxu0 %v432_v29  ;;  %v437_v61 = vsub.f32 %v4627_v13, %v6090_v12  ;;  %v875_v51 = vsub.f32 %v4631_v33, %v6093_v41  ;;  %v4665_v37 = vand.u32 4294901760, %v187_v20  ;;  %v190_v49 = vld [vmem:[%s4465_s13 + $0x68] sm:$0xff]  ;;  %v189_v12 = vld [vmem:[%s4465_s13 + $0x60] sm:$0xff] }
  0x3a   : > { %3356 = vmatpush3.msra.mxu1 %v750_v54  ;;  %6287 = vst [vmem:[#allocation46_spill] sm:$0xff] %v4663_v57  ;;  %v869_v56 = vand.u32 4294901760, %v868_v42  ;;  %v757_v60 = vand.u32 4294901760, %v756_v2  ;;  %v6102_v29 = vand.u32 4294901760, %v4653_v27  ;;  %v6289_v54 = vand.u32 4294901760, %v4639_v28  ;;  %3412 = vmatpush3.msra.mxu0 %v4187_v31  ;;  %v193_v13 = vld [vmem:[%s4465_s13 + $0x80] sm:$0xff] }
  0x3b   : > { %6288 = vst [vmem:[#allocation47_spill] sm:$0xff] %v4665_v37  ;;  %v438_v41 = vand.u32 4294901760, %v437_v61  ;;  %v876_v46 = vand.u32 4294901760, %v875_v51  ;;  %v4677_v33 = vsub.f32 %v183_v52, %v4663_v57  ;;  %v4680_v18 = vsub.f32 %v187_v20, %v4665_v37  ;;  %3413 = vmatprep.subr.mxu0 %v4196_v35  ;;  %v192_v42 = vld [vmem:[%s4465_s13 + $0x78] sm:$0xff] }
  0x3c   : > { %v763_v25 = vsub.f32 %v4639_v28, %v6289_v54  ;;  %3357 = vmatprep.subr.mxu1 %v869_v56  ;;  %v446_v2 = vsub.f32 %v4653_v27, %v6102_v29  ;;  %v4687_v31 = vand.u32 4294901760, %v186_v23  ;;  %v4689_v61 = vand.u32 4294901760, %v190_v49  ;;  %3414 = vmatpush3.msra.mxu0 %v4212_v40  ;;  %v196_v35 = vld [vmem:[%s4465_s13 + $0x98] sm:$0xff] }
  0x3d   : > { %6290 = vst [vmem:[#allocation48_spill] sm:$0xff] %v4677_v33  ;;  %6291 = vst [vmem:[#allocation49_spill] sm:$0xff] %v4680_v18  ;;  %439 = vmatmul.mubr.f32.gmra.mxu0 %v438_v41  ;;  %3358 = vmatpush3.msra.mxu1 %v757_v60  ;;  %v6105_v20 = vand.u32 4294901760, %v4677_v33  ;;  %v6108_v51 = vand.u32 4294901760, %v4680_v18  ;;  %v4694_v52 = vand.u32 4294901760, %v189_v12  ;;  %v4696_v56 = vand.u32 4294901760, %v193_v13 }
  0x3e   : > { %v764_v54 = vand.u32 4294901760, %v763_v25  ;;  %6292 = vst [vmem:[#allocation50_spill] sm:$0xff] %v4687_v31  ;;  %6293 = vst [vmem:[#allocation51_spill] sm:$0xff] %v4689_v61  ;;  %3359 = vmatprep.subr.mxu1 %v876_v46  ;;  %v447_v29 = vand.u32 4294901760, %v446_v2  ;;  %v4700_v25 = vsub.f32 %v186_v23, %v4687_v31  ;;  %v4703_v40 = vsub.f32 %v190_v49, %v4689_v61 }
  0x3f   : > { %6294 = vst [vmem:[#allocation52_spill] sm:$0xff] %v4694_v52  ;;  %6295 = vst [vmem:[#allocation53_spill] sm:$0xff] %v4696_v56  ;;  %3415 = vmatprep.subr.mxu0 %v4226_v45  ;;  %v4706_v60 = vand.u32 4294901760, %v192_v42  ;;  %v452_v41 = vsub.f32 %v4677_v33, %v6105_v20  ;;  %v461_v46 = vsub.f32 %v4680_v18, %v6108_v51  ;;  %v4726_v20 = vand.u32 4294901760, %v196_v35  ;;  %v195_v33 = vld [vmem:[%s4465_s13 + $0x90] sm:$0xff] }
  0x40   : > { %6296 = vst [vmem:[#allocation54_spill] sm:$0xff] %v4700_v25  ;;  %6297 = vst [vmem:[#allocation55_spill] sm:$0xff] %v4703_v40  ;;  %3360 = vmatpush3.msra.mxu1 %v764_v54  ;;  %v4715_v23 = vsub.f32 %v189_v12, %v4694_v52  ;;  %v4718_v2 = vsub.f32 %v193_v13, %v4696_v56  ;;  %448 = vmatprep.mubr.f32.mxu0 %v447_v29  ;;  %v6113_v49 = vand.u32 4294901760, %v4700_v25  ;;  %v199_v51 = vld [vmem:[%s4465_s13 + $0xb0] sm:$0xff] }
  0x41   : > { %6298 = vst [vmem:[#allocation56_spill] sm:$0xff] %v4706_v60  ;;  %881 = vmatmul.mubr.f32.vlgmr.msra.gmra.mxu1 %v4548_v34  ;;  %v6114_v54 = vand.u32 4294901760, %v4703_v40  ;;  %v4724_v45 = vsub.f32 %v192_v42, %v4706_v60  ;;  %6302 = vst [vmem:[#allocation60_spill] sm:$0xff] %v4726_v20  ;;  %v453_v18 = vand.u32 4294901760, %v452_v41  ;;  %3489 = vmatprep.subr.mxu1 %v4095_v3  ;;  %v462_v12 = vand.u32 4294901760, %v461_v46  ;;  %v198_v46 = vld [vmem:[%s4465_s13 + $0xa8] sm:$0xff] }
  0x42   : > { %6299 = vst [vmem:[#allocation57_spill] sm:$0xff] %v4715_v23  ;;  %6300 = vst [vmem:[#allocation58_spill] sm:$0xff] %v4718_v2  ;;  %886 = vmatprep.mubr.f32.mxu1 %v4578_v39  ;;  %v6123_v13 = vand.u32 4294901760, %v4715_v23  ;;  %3490 = vmatpush3.msra.mxu1 %v4097_v4  ;;  %v467_v42 = vsub.f32 %v4700_v25, %v6113_v49  ;;  %v4744_v39 = vsub.f32 %v196_v35, %v4726_v20 }
  0x43   : > { %6301 = vst [vmem:[#allocation59_spill] sm:$0xff] %v4724_v45  ;;  %v476_v41 = vsub.f32 %v4703_v40, %v6114_v54  ;;  %3416 = vmatpush3.msra.mxu0 %v4265_v59  ;;  %3491 = vmatprep.subr.mxu1 %v4099_v5  ;;  %v6304_v49 = vand.u32 4294901760, %v4718_v2  ;;  %v4753_v34 = vand.u32 4294901760, %v195_v33  ;;  %v4755_v59 = vand.u32 4294901760, %v199_v51  ;;  %v202_v40 = vld [vmem:[%s4465_s13 + $0xc8] sm:$0xff]  ;;  %v201_v5 = vld [vmem:[%s4465_s13 + $0xc0] sm:$0xff] }
  0x44   : > { %6303 = vst [vmem:[#allocation61_spill] sm:$0xff] %v4744_v39  ;;  %454 = vmatmul.mubr.f32.gmra.mxu0 %v453_v18  ;;  %v482_v29 = vsub.f32 %v4715_v23, %v6123_v13  ;;  %v468_v35 = vand.u32 4294901760, %v467_v42  ;;  %3492 = vmatpush3.msra.mxu1 %v4110_v9  ;;  %v6309_v42 = vand.u32 4294901760, %v4724_v45  ;;  %v4776_v25 = vand.u32 4294901760, %v198_v46 }
  0x45   : > { %v491_v54 = vsub.f32 %v4718_v2, %v6304_v49  ;;  %6305 = vst [vmem:[#allocation62_spill] sm:$0xff] %v4753_v34  ;;  %6306 = vst [vmem:[#allocation63_spill] sm:$0xff] %v4755_v59  ;;  %463 = vmatprep.mubr.f32.mxu0 %v462_v12  ;;  %888 = vmatmul.mubr.f32.gmra.mxu1 %v4609_v7  ;;  %v477_v18 = vand.u32 4294901760, %v476_v41  ;;  %v4765_v49 = vsub.f32 %v195_v33, %v4753_v34  ;;  %v205_v2 = vld [vmem:[%s4465_s13 + $0xe0] sm:$0xff] }
  0x46   : > { %893 = vmatprep.mubr.f32.mxu1 %v4635_v44  ;;  %v4768_v13 = vsub.f32 %v199_v51, %v4755_v59  ;;  %v483_v12 = vand.u32 4294901760, %v482_v29  ;;  %3493 = vmatprep.subr.mxu1 %v4112_v10  ;;  %v497_v41 = vsub.f32 %v4724_v45, %v6309_v42  ;;  %6310 = vst [vmem:[#allocation66_spill] sm:$0xff] %v4776_v25  ;;  %v4778_v44 = vand.u32 4294901760, %v202_v40  ;;  %v204_v42 = vld [vmem:[%s4465_s13 + $0xd8] sm:$0xff] }
  0x47   : > { %6307 = vst [vmem:[#allocation64_spill] sm:$0xff] %v4765_v49  ;;  %3417 = vmatprep.subr.mxu0 %v4281_v0  ;;  %3494 = vmatpush3.msra.mxu1 %v4114_v11  ;;  %v492_v33 = vand.u32 4294901760, %v491_v54  ;;  %v6312_v51 = vand.u32 4294901760, %v4744_v39  ;;  %v4785_v23 = vand.u32 4294901760, %v201_v5  ;;  %v4791_v0 = vsub.f32 %v198_v46, %v4776_v25 }
  0x48   : > { %6308 = vst [vmem:[#allocation65_spill] sm:$0xff] %v4768_v13  ;;  %6311 = vst [vmem:[#allocation67_spill] sm:$0xff] %v4778_v44  ;;  %469 = vmatmul.mubr.f32.gmra.mxu0 %v468_v35  ;;  %v4794_v54 = vsub.f32 %v202_v40, %v4778_v44  ;;  %v4796_v35 = vand.u32 4294901760, %v205_v2  ;;  %3495 = vmatprep.subr.mxu1 %v4128_v15  ;;  %v498_v7 = vand.u32 4294901760, %v497_v41  ;;  %v6318_v40 = vand.u32 4294901760, %v4765_v49  ;;  %v207_v41 = vld [vmem:[%s4465_s13 + $0xf0] sm:$0xff] }
  0x49   : > { %v506_v29 = vsub.f32 %v4744_v39, %v6312_v51  ;;  %6313 = vst [vmem:[#allocation68_spill] sm:$0xff] %v4785_v23  ;;  %478 = vmatprep.mubr.f32.mxu0 %v477_v18  ;;  %895 = vmatmul.mubr.f32.gmra.mxu1 %v4663_v57  ;;  %6314 = vst [vmem:[#allocation69_spill] sm:$0xff] %v4791_v0  ;;  %v208_v51 = vld [vmem:[%s4465_s13 + $0xf8] sm:$0xff]  ;;  %v4803_v18 = vand.u32 4294901760, %v204_v42  ;;  %v4811_v57 = vsub.f32 %v201_v5, %v4785_v23 }
  0x4a   : > { %6315 = vst [vmem:[#allocation70_spill] sm:$0xff] %v4794_v54  ;;  %6316 = vst [vmem:[#allocation71_spill] sm:$0xff] %v4796_v35  ;;  %900 = vmatprep.mubr.f32.mxu1 %v4665_v37  ;;  %3496 = vmatpush3.msra.mxu1 %v4130_v16  ;;  %v512_v45 = vsub.f32 %v4765_v49, %v6318_v40  ;;  %v6150_v37 = vand.u32 4294901760, %v4791_v0  ;;  %v6320_v39 = vand.u32 4294901760, %v4768_v13  ;;  %v4822_v40 = vand.u32 4294901760, %v208_v51  ;;  %v211_v49 = vld [vmem:[%s4465_s13 + $0x110] sm:$0xff] }
  0x4b   : > { %3418 = vmatpush3.msra.mxu0 %v4296_v8  ;;  %6317 = vst [vmem:[#allocation72_spill] sm:$0xff] %v4803_v18  ;;  %v507_v46 = vand.u32 4294901760, %v506_v29  ;;  %3497 = vmatprep.subr.mxu1 %v4133_v17  ;;  %6319 = vst [vmem:[#allocation73_spill] sm:$0xff] %v4811_v57  ;;  %v4820_v8 = vsub.f32 %v205_v2, %v4796_v35  ;;  %v4830_v5 = vsub.f32 %v204_v42, %v4803_v18  ;;  %v214_v29 = vld [vmem:[%s4465_s13 + $0x128] sm:$0xff] }
  0x4c   : > { %484 = vmatmul.mubr.f32.gmra.mxu0 %v483_v12  ;;  %v521_v12 = vsub.f32 %v4768_v13, %v6320_v39  ;;  %6322 = vst [vmem:[#allocation75_spill] sm:$0xff] %v4822_v40  ;;  %3498 = vmatpush3.msra.mxu1 %v4155_v22  ;;  %v4832_v39 = vand.u32 4294901760, %v207_v41  ;;  %v513_v2 = vand.u32 4294901760, %v512_v45 }
  0x4d   : > { %493 = vmatprep.mubr.f32.mxu0 %v492_v33  ;;  %902 = vmatmul.mubr.f32.gmra.mxu1 %v4687_v31  ;;  %6321 = vst [vmem:[#allocation74_spill] sm:$0xff] %v4820_v8  ;;  %6323 = vst [vmem:[#allocation76_spill] sm:$0xff] %v4830_v5  ;;  %v527_v33 = vsub.f32 %v4791_v0, %v6150_v37  ;;  %v6326_v31 = vand.u32 4294901760, %v4794_v54  ;;  %v210_v37 = vld [vmem:[%s4465_s13 + $0x108] sm:$0xff] }
  0x4e   : > { %907 = vmatprep.mubr.f32.mxu1 %v4689_v61  ;;  %3419 = vmatprep.subr.mxu0 %v4310_v19  ;;  %6324 = vst [vmem:[#allocation77_spill] sm:$0xff] %v4832_v39  ;;  %v4839_v61 = vand.u32 4294901760, %v211_v49  ;;  %v522_v42 = vand.u32 4294901760, %v521_v12  ;;  %v6329_v12 = vand.u32 4294901760, %v4811_v57 }
  0x4f   : > { %3499 = vmatprep.subr.mxu1 %v4161_v24  ;;  %v536_v13 = vsub.f32 %v4794_v54, %v6326_v31  ;;  %3420 = vmatpush3.msra.mxu0 %v4322_v48  ;;  %v4857_v31 = vsub.f32 %v207_v41, %v4832_v39  ;;  %v6331_v41 = vand.u32 4294901760, %v4820_v8  ;;  %v4873_v54 = vand.u32 4294901760, %v214_v29 }
  0x50   : > { %499 = vmatmul.mubr.f32.gmra.mxu0 %v498_v7  ;;  %3500 = vmatpush3.msra.mxu1 %v4184_v30  ;;  %6325 = vst [vmem:[#allocation78_spill] sm:$0xff] %v4839_v61  ;;  %v4847_v7 = vsub.f32 %v208_v51, %v4822_v40  ;;  %v528_v51 = vand.u32 4294901760, %v527_v33  ;;  %v542_v45 = vsub.f32 %v4811_v57, %v6329_v12  ;;  %v213_v12 = vld [vmem:[%s4465_s13 + $0x120] sm:$0xff] }
  0x51   : > { %508 = vmatprep.mubr.f32.mxu0 %v507_v46  ;;  %909 = vmatmul.mubr.f32.gmra.mxu1 %v4694_v52  ;;  %6328 = vst [vmem:[#allocation80_spill] sm:$0xff] %v4857_v31  ;;  %v4866_v52 = vand.u32 4294901760, %v210_v37  ;;  %v537_v46 = vand.u32 4294901760, %v536_v13  ;;  %6332 = vst [vmem:[#allocation82_spill] sm:$0xff] %v4873_v54  ;;  %v4890_v0 = vand.u32 4294901760, %v213_v12 }
  0x52   : > { %6327 = vst [vmem:[#allocation79_spill] sm:$0xff] %v4847_v7  ;;  %914 = vmatprep.mubr.f32.mxu1 %v4696_v56  ;;  %3421 = vmatprep.subr.mxu0 %v4339_v21  ;;  %v4864_v56 = vsub.f32 %v211_v49, %v4839_v61  ;;  %v217_v49 = vld [vmem:[%s4465_s13 + $0x140] sm:$0xff]  ;;  %v543_v33 = vand.u32 4294901760, %v542_v45  ;;  %v4898_v45 = vsub.f32 %v214_v29, %v4873_v54 }
  0x53   : > { %3501 = vmatprep.subr.mxu1 %v4190_v32  ;;  %3422 = vmatpush3.msra.mxu0 %v4356_v26  ;;  %v4888_v57 = vsub.f32 %v210_v37, %v4866_v52  ;;  %6337 = vst [vmem:[#allocation84_spill] sm:$0xff] %v4890_v0  ;;  %v6341_v37 = vld [vmem:[#allocation23_spill] sm:$0xff] }
  0x54   : > { %514 = vmatmul.mubr.f32.gmra.mxu0 %v513_v2  ;;  %3502 = vmatpush3.msra.mxu1 %v4199_v36  ;;  %6330 = vst [vmem:[#allocation81_spill] sm:$0xff] %v4864_v56  ;;  %v551_v2 = vsub.f32 %v4820_v8, %v6331_v41  ;;  %v6335_v8 = vld [vmem:[#allocation12_spill] sm:$0xff]  ;;  %v216_v36 = vld [vmem:[%s4465_s13 + $0x138] sm:$0xff]  ;;  %6339 = vst [vmem:[#allocation85_spill] sm:$0xff] %v4898_v45 }
  0x55   : > { %523 = vmatprep.mubr.f32.mxu0 %v522_v42  ;;  %916 = vmatmul.mubr.f32.gmra.mxu1 %v4706_v60  ;;  %v6333_v42 = vand.u32 4294901760, %v4830_v5  ;;  %v6334_v60 = vld [vmem:[#allocation10_spill] sm:$0xff]  ;;  %6336 = vst [vmem:[#allocation83_spill] sm:$0xff] %v4888_v57 }
  0x56   : > { %921 = vmatprep.mubr.f32.mxu1 %v4726_v20  ;;  %3423 = vmatprep.subr.mxu0 %v4383_v55  ;;  %v220_v20 = vld [vmem:[%s4465_s13 + $0x158] sm:$0xff] }
  0x57   : > { %v557_v13 = vsub.f32 %v4830_v5, %v6333_v42  ;;  %3503 = vmatprep.subr.mxu1 %v6334_v60  ;;  %v552_v42 = vand.u32 4294901760, %v551_v2  ;;  %v6338_v5 = vand.u32 4294901760, %v4847_v7  ;;  %3424 = vmatpush3.msra.mxu0 %v6341_v37  ;;  %v4918_v60 = vsub.f32 %v213_v12, %v4890_v0  ;;  %v6350_v12 = vld [vmem:[#allocation29_spill] sm:$0xff] }
  0x58   : > { %529 = vmatmul.mubr.f32.gmra.mxu0 %v528_v51  ;;  %3504 = vmatpush3.msra.mxu1 %v6335_v8  ;;  %v4900_v51 = vand.u32 4294901760, %v217_v49  ;;  %v6342_v8 = vld [vmem:[#allocation25_spill] sm:$0xff] }
  0x59   : > { %538 = vmatprep.mubr.f32.mxu0 %v537_v46  ;;  %923 = vmatmul.mubr.f32.gmra.mxu1 %v4753_v34  ;;  %v566_v41 = vsub.f32 %v4847_v7, %v6338_v5  ;;  %v6343_v46 = vand.u32 4294901760, %v4857_v31  ;;  %v6344_v34 = vld [vmem:[#allocation14_spill] sm:$0xff]  ;;  %v4910_v5 = vand.u32 4294901760, %v216_v36  ;;  %v558_v29 = vand.u32 4294901760, %v557_v13  ;;  %v6346_v7 = vld [vmem:[#allocation16_spill] sm:$0xff] }
  0x5a   : > { %6340 = vst [vmem:[#allocation86_spill] sm:$0xff] %v4900_v51  ;;  %928 = vmatprep.mubr.f32.mxu1 %v4755_v59  ;;  %3425 = vmatprep.subr.mxu0 %v6342_v8  ;;  %v6347_v59 = vand.u32 4294901760, %v4864_v56  ;;  %v4925_v13 = vand.u32 4294901760, %v220_v20  ;;  %v223_v8 = vld [vmem:[%s4465_s13 + $0x170] sm:$0xff] }
  0x5b   : > { %v572_v2 = vsub.f32 %v4857_v31, %v6343_v46  ;;  %3505 = vmatprep.subr.mxu1 %v6344_v34  ;;  %6345 = vst [vmem:[#allocation87_spill] sm:$0xff] %v4910_v5  ;;  %v567_v46 = vand.u32 4294901760, %v566_v41  ;;  %v4934_v41 = vsub.f32 %v216_v36, %v4910_v5  ;;  %v6352_v31 = vand.u32 4294901760, %v4888_v57  ;;  %v6353_v34 = vld [vmem:[#allocation19_spill] sm:$0xff] }
  0x5c   : > { %544 = vmatmul.mubr.f32.gmra.mxu0 %v543_v33  ;;  %3506 = vmatpush3.msra.mxu1 %v6346_v7  ;;  %v581_v37 = vsub.f32 %v4864_v56, %v6347_v59  ;;  %v4923_v33 = vsub.f32 %v217_v49, %v4900_v51  ;;  %6348 = vst [vmem:[#allocation88_spill] sm:$0xff] %v4925_v13  ;;  %v219_v7 = vld [vmem:[%s4465_s13 + $0x150] sm:$0xff]  ;;  %v6349_v59 = vld [vmem:[#allocation27_spill] sm:$0xff] }
  0x5d   : > { %553 = vmatprep.mubr.f32.mxu0 %v552_v42  ;;  %930 = vmatmul.mubr.f32.gmra.mxu1 %v4776_v25  ;;  %v573_v56 = vand.u32 4294901760, %v572_v2  ;;  %v6351_v42 = vld [vmem:[#allocation18_spill] sm:$0xff]  ;;  %v587_v25 = vsub.f32 %v4888_v57, %v6352_v31  ;;  %v6355_v2 = vand.u32 4294901760, %v4898_v45  ;;  %v222_v31 = vld [vmem:[%s4465_s13 + $0x168] sm:$0xff] }
  0x5e   : > { %935 = vmatprep.mubr.f32.mxu1 %v4778_v44  ;;  %3426 = vmatpush3.msra.mxu0 %v6349_v59  ;;  %v582_v49 = vand.u32 4294901760, %v581_v37  ;;  %v4941_v59 = vand.u32 4294901760, %v219_v7  ;;  %v4949_v37 = vsub.f32 %v220_v20, %v4925_v13  ;;  %v6357_v44 = vld [vmem:[#allocation30_spill] sm:$0xff] }
  0x5f   : > { %3427 = vmatprep.subr.mxu0 %v6350_v12  ;;  %3507 = vmatprep.subr.mxu1 %v6351_v42  ;;  %v596_v36 = vsub.f32 %v4898_v45, %v6355_v2  ;;  %v4951_v42 = vand.u32 4294901760, %v223_v8  ;;  %v588_v2 = vand.u32 4294901760, %v587_v25  ;;  %v6360_v45 = vld [vmem:[#allocation21_spill] sm:$0xff] }
  0x60   : > { %559 = vmatmul.mubr.f32.gmra.mxu0 %v558_v29  ;;  %3508 = vmatpush3.msra.mxu1 %v6353_v34  ;;  %6354 = vst [vmem:[#allocation29_spill] sm:$0xff] %v4941_v59  ;;  %v6359_v29 = vand.u32 4294901760, %v4918_v60  ;;  %v4964_v57 = vsub.f32 %v219_v7, %v4941_v59  ;;  %v6363_v7 = vld [vmem:[#allocation22_spill] sm:$0xff] }
  0x61   : > { %568 = vmatprep.mubr.f32.mxu0 %v567_v46  ;;  %937 = vmatmul.mubr.f32.gmra.mxu1 %v4785_v23  ;;  %6356 = vst [vmem:[#allocation89_spill] sm:$0xff] %v4951_v42  ;;  %v6358_v46 = vld [vmem:[#allocation20_spill] sm:$0xff]  ;;  %v597_v34 = vand.u32 4294901760, %v596_v36  ;;  %v4974_v23 = vsub.f32 %v223_v8, %v4951_v42  ;;  %v6364_v36 = vand.u32 4294901760, %v4934_v41 }
  0x62   : > { %942 = vmatprep.mubr.f32.mxu1 %v4796_v35  ;;  %3428 = vmatpush3.msra.mxu0 %v4471_v53  ;;  %v602_v20 = vsub.f32 %v4918_v60, %v6359_v29  ;;  %v4966_v35 = vand.u32 4294901760, %v222_v31 }
  0x63   : > { %3429 = vmatprep.subr.mxu0 %v6357_v44  ;;  %3509 = vmatprep.subr.mxu1 %v6358_v46  ;;  %v6362_v46 = vand.u32 4294901760, %v4923_v33  ;;  %v617_v29 = vsub.f32 %v4934_v41, %v6364_v36  ;;  %v6366_v36 = vld [vmem:[#allocation36_spill] sm:$0xff] }
  0x64   : > { %574 = vmatmul.mubr.f32.gmra.mxu0 %v573_v56  ;;  %3510 = vmatpush3.msra.mxu1 %v6360_v45  ;;  %6361 = vst [vmem:[#allocation30_spill] sm:$0xff] %v4966_v35  ;;  %v4986_v8 = vsub.f32 %v222_v31, %v4966_v35 }
  0x65   : > { %583 = vmatprep.mubr.f32.mxu0 %v582_v49  ;;  %944 = vmatmul.mubr.f32.gmra.mxu1 %v4803_v18  ;;  %v611_v56 = vsub.f32 %v4923_v33, %v6362_v46  ;;  %v603_v49 = vand.u32 4294901760, %v602_v20  ;;  %v6367_v46 = vld [vmem:[#allocation24_spill] sm:$0xff]  ;;  %v618_v31 = vand.u32 4294901760, %v617_v29 }
  0x66   : > { %949 = vmatprep.mubr.f32.mxu1 %v4822_v40  ;;  %3430 = vmatpush3.msra.mxu0 %v4500_v62  ;;  %v6365_v40 = vand.u32 4294901760, %v4949_v37  ;;  %v6372_v29 = vld [vmem:[#allocation28_spill] sm:$0xff] }
  0x67   : > { %3431 = vmatprep.subr.mxu0 %v4523_v58  ;;  %3511 = vmatprep.subr.mxu1 %v6363_v7  ;;  %v612_v25 = vand.u32 4294901760, %v611_v56 }
  0x68   : > { %589 = vmatmul.mubr.f32.gmra.mxu0 %v588_v2  ;;  %3512 = vmatpush3.msra.mxu1 %v4395_v63  ;;  %v626_v2 = vsub.f32 %v4949_v37, %v6365_v40  ;;  %v6200_v40 = vand.u32 4294901760, %v4986_v8 }
  0x69   : > { %598 = vmatprep.mubr.f32.mxu0 %v597_v34  ;;  %951 = vmatmul.mubr.f32.gmra.mxu1 %v4832_v39  ;;  %v6368_v34 = vand.u32 4294901760, %v4964_v57  ;;  %v6369_v39 = vld [vmem:[#allocation26_spill] sm:$0xff] }
  0x6a   : > { %956 = vmatprep.mubr.f32.mxu1 %v4839_v61  ;;  %3432 = vmatpush3.msra.mxu0 %v4542_v47  ;;  %v627_v20 = vand.u32 4294901760, %v626_v2  ;;  %v6370_v61 = vand.u32 4294901760, %v4974_v23 }
  0x6b   : > { %3433 = vmatprep.subr.mxu0 %v6366_v36  ;;  %3513 = vmatprep.subr.mxu1 %v6367_v46  ;;  %v632_v56 = vsub.f32 %v4964_v57, %v6368_v34 }
  0x6c   : > { %604 = vmatmul.mubr.f32.gmra.mxu0 %v603_v49  ;;  %3514 = vmatpush3.msra.mxu1 %v6369_v39  ;;  %v641_v18 = vsub.f32 %v4974_v23, %v6370_v61  ;;  %v6371_v49 = vld [vmem:[#allocation37_spill] sm:$0xff] }
  0x6d   : > { %613 = vmatprep.mubr.f32.mxu0 %v612_v25  ;;  %958 = vmatmul.mubr.f32.gmra.mxu1 %v4866_v52  ;;  %v633_v34 = vand.u32 4294901760, %v632_v56  ;;  %v647_v25 = vsub.f32 %v4986_v8, %v6200_v40  ;;  %v6376_v56 = vld [vmem:[#allocation32_spill] sm:$0xff]  ;;  %v6380_v40 = vld [vmem:[#allocation38_spill] sm:$0xff] }
  0x6e   : > { %963 = vmatprep.mubr.f32.mxu1 %v4873_v54  ;;  %3434 = vmatpush3.msra.mxu0 %v6371_v49  ;;  %v642_v61 = vand.u32 4294901760, %v641_v18  ;;  %v6374_v18 = vld [vmem:[#allocation44_spill] sm:$0xff] }
  0x6f   : > { %3435 = vmatprep.subr.mxu0 %v4572_v6  ;;  %3515 = vmatprep.subr.mxu1 %v6372_v29  ;;  %v648_v2 = vand.u32 4294901760, %v647_v25  ;;  %v6378_v25 = vld [vmem:[#allocation3_spill] sm:$0xff] }
  0x70   : > { %619 = vmatmul.mubr.f32.gmra.mxu0 %v618_v31  ;;  %3516 = vmatpush3.msra.mxu1 %v4455_v43  ;;  %v6373_v31 = vld [vmem:[#allocation42_spill] sm:$0xff] }
  0x71   : > { %628 = vmatprep.mubr.f32.mxu0 %v627_v20  ;;  %965 = vmatmul.mubr.f32.gmra.mxu1 %v4890_v0  ;;  %v6375_v20 = vld [vmem:[#allocation31_spill] sm:$0xff] }
  0x72   : > { %970 = vmatprep.mubr.f32.mxu1 %v4900_v51  ;;  %3436 = vmatpush3.msra.mxu0 %v4599_v50  ;;  %v6384_v51 = vld [vmem:[#allocation5_spill] sm:$0xff] }
  0x73   : > { %3437 = vmatprep.subr.mxu0 %v4614_v1  ;;  %3517 = vmatprep.subr.mxu1 %v4474_v14  ;;  %v6385_v0 = vand.u32 4294901760, %v6384_v51 }
  0x74   : > { %634 = vmatmul.mubr.f32.gmra.mxu0 %v633_v34  ;;  %3518 = vmatpush3.msra.mxu1 %v4496_v38  ;;  %v6377_v34 = vld [vmem:[#allocation34_spill] sm:$0xff] }
  0x75   : > { %643 = vmatprep.mubr.f32.mxu0 %v642_v61  ;;  %972 = vmatmul.mubr.f32.gmra.mxu1 %v4910_v5  ;;  %v6379_v61 = vand.u32 4294901760, %v6378_v25  ;;  %v6387_v25 = vld [vmem:[#allocation6_spill] sm:$0xff] }
  0x76   : > { %3438 = vmatpush3.msra.mxu0 %v6373_v31  ;;  %977 = vmatprep.mubr.f32.mxu1 %v4925_v13  ;;  %v6381_v13 = vld [vmem:[#allocation40_spill] sm:$0xff] }
  0x77   : > { %3439 = vmatprep.subr.mxu0 %v6374_v18  ;;  %3519 = vmatprep.subr.mxu1 %v6375_v20 }
  0x78   : > { %649 = vmatmul.mubr.f32.gmra.mxu0 %v648_v2  ;;  %3520 = vmatpush3.msra.mxu1 %v6376_v56  ;;  %v6382_v2 = vld [vmem:[#allocation4_spill] sm:$0xff] }
  0x79   : > { %3440 = vmatpush3.msra.mxu0 %v4639_v28  ;;  %1121 = vmatprep.mubr.f32.mxu0 %v6377_v34  ;;  %v6383_v5 = vand.u32 4294901760, %v6382_v2  ;;  %v6392_v2 = vld [vmem:[#allocation9_spill] sm:$0xff] }
  0x7a   : > { %979 = vmatmul.mubr.f32.gmra.mxu1 %v4941_v59  ;;  %3569 = vmatprep.subr.mxu0 %v6379_v61  ;;  %v6386_v59 = vand.u32 4294901760, %v6377_v34  ;;  %v6388_v61 = vand.u32 4294901760, %v6387_v25  ;;  %v6398_v34 = vld [vmem:[#allocation48_spill] sm:$0xff]  ;;  %v6399_v25 = vld [vmem:[#allocation2_spill] sm:$0xff] }
  0x7b   : > { %984 = vmatprep.mubr.f32.mxu1 %v4951_v42  ;;  %3649 = vmatprep.subr.mxu1 %v4095_v3  ;;  %v6389_v42 = vld [vmem:[#allocation43_spill] sm:$0xff] }
  0x7c   : > { %1124 = vmatmul.mubr.f32.vlgmr.msra.gmra.mxu0 %v6380_v40  ;;  %v6390_v3 = vld [vmem:[#allocation7_spill] sm:$0xff] }
  0x7d   : > { %1130 = vmatprep.mubr.f32.mxu0 %v6381_v13  ;;  %3570 = vmatpush3.msra.mxu0 %v6383_v5  ;;  %v6391_v54 = vand.u32 4294901760, %v6390_v3  ;;  %v6393_v5 = vand.u32 4294901760, %v6392_v2 }
  0x7e   : > { %986 = vmatmul.mubr.f32.gmra.mxu1 %v4966_v35  ;;  %3571 = vmatprep.subr.mxu0 %v6385_v0  ;;  %v6394_v35 = vand.u32 4294901760, %v6380_v40  ;;  %v6395_v0 = vld [vmem:[#allocation11_spill] sm:$0xff]  ;;  %v6405_v40 = vld [vmem:[#allocation13_spill] sm:$0xff] }
  0x7f   : > { %1363 = vmatprep.mubr.f32.mxu1 %v6386_v59  ;;  %3572 = vmatpush3.msra.mxu0 %v6388_v61  ;;  %v6396_v51 = vand.u32 4294901760, %v6395_v0  ;;  %v6397_v59 = vand.u32 4294901760, %v6381_v13  ;;  %v6401_v61 = vand.u32 4294901760, %v6389_v42  ;;  %v6404_v13 = vld [vmem:[#allocation55_spill] sm:$0xff]  ;;  %v6406_v3 = vand.u32 4294901760, %v6405_v40 }
  0x80   : > { %1133 = vmatmul.mubr.f32.gmra.mxu0 %v6389_v42  ;;  %3573 = vmatprep.subr.mxu0 %v6391_v54  ;;  %v6400_v54 = vld [vmem:[#allocation49_spill] sm:$0xff]  ;;  %v6408_v42 = vld [vmem:[#allocation15_spill] sm:$0xff] }
  0x81   : > { %1139 = vmatprep.mubr.f32.mxu0 %v4653_v27  ;;  %3574 = vmatpush3.msra.mxu0 %v6393_v5  ;;  %v6409_v2 = vand.u32 4294901760, %v6408_v42  ;;  %v6434_v40 = vld [vmem:[#allocation23_spill] sm:$0xff] }
  0x82   : > { %1367 = vmatmul.mubr.f32.vlgmr.msra.gmra.mxu1 %v6394_v35  ;;  %3575 = vmatprep.subr.mxu0 %v6396_v51  ;;  %v6402_v35 = vand.u32 4294901760, %v4653_v27  ;;  %v6413_v27 = vld [vmem:[#allocation17_spill] sm:$0xff]  ;;  %v6416_v51 = vand.u32 4294901760, %v4310_v19  ;;  %v6422_v19 = vand.u32 4294901760, %v4339_v21  ;;  %v6428_v21 = vand.u32 4294901760, %v4383_v55 }
  0x83   : > { %3650 = vmatpush3.msra.mxu1 %v4097_v4  ;;  %1374 = vmatprep.mubr.f32.mxu1 %v6397_v59  ;;  %v6403_v4 = vld [vmem:[#allocation54_spill] sm:$0xff]  ;;  %v6414_v5 = vand.u32 4294901760, %v6413_v27  ;;  %v6417_v59 = vand.u32 4294901760, %v6404_v13  ;;  %v6444_v27 = vld [vmem:[#allocation27_spill] sm:$0xff] }
  0x84   : > { %1142 = vmatmul.mubr.f32.gmra.mxu0 %v6398_v34  ;;  %3651 = vmatprep.subr.mxu1 %v6399_v25  ;;  %v6415_v0 = vand.u32 4294901760, %v6403_v4 }
  0x85   : > { %1148 = vmatprep.mubr.f32.mxu0 %v6400_v54  ;;  %3652 = vmatpush3.msra.mxu1 %v4110_v9  ;;  %v6407_v9 = vand.u32 4294901760, %v6398_v34  ;;  %v6420_v34 = vand.u32 4294901760, %v4322_v48  ;;  %v6426_v48 = vand.u32 4294901760, %v4356_v26  ;;  %v6435_v26 = vand.u32 4294901760, %v6434_v40 }
  0x86   : > { %1378 = vmatmul.mubr.f32.gmra.mxu1 %v6401_v61  ;;  %3653 = vmatprep.subr.mxu1 %v4112_v10  ;;  %v6410_v10 = vand.u32 4294901760, %v6400_v54  ;;  %v6467_v40 = vand.u32 4294901760, %v4542_v47  ;;  %v6471_v47 = vand.u32 4294901760, %v6371_v49  ;;  %v258_v49 = vld [vmem:[%s6013_s1 + $0x108] sm:$0xff] }
  0x87   : > { %1385 = vmatprep.mubr.f32.mxu1 %v6402_v35  ;;  %3654 = vmatpush3.msra.mxu1 %v4114_v11  ;;  %v6411_v11 = vld [vmem:[#allocation57_spill] sm:$0xff] }
  0x88   : > { %1151 = vmatmul.mubr.f32.gmra.mxu0 %v6403_v4  ;;  %3655 = vmatprep.subr.mxu1 %v4128_v15  ;;  %v6412_v15 = vld [vmem:[#allocation58_spill] sm:$0xff]  ;;  %v6421_v25 = vand.u32 4294901760, %v6411_v11  ;;  %v6430_v4 = vld [vmem:[#allocation8_spill] sm:$0xff] }
  0x89   : > { %1157 = vmatprep.mubr.f32.mxu0 %v6404_v13  ;;  %3576 = vmatpush3.msra.mxu0 %v6406_v3  ;;  %v6423_v54 = vand.u32 4294901760, %v6412_v15  ;;  %v6432_v13 = vld [vmem:[#allocation10_spill] sm:$0xff] }
  0x8a   : > { %1389 = vmatmul.mubr.f32.gmra.mxu1 %v6407_v9  ;;  %3577 = vmatprep.subr.mxu0 %v6409_v2  ;;  %v6437_v9 = vld [vmem:[#allocation25_spill] sm:$0xff]  ;;  %v6440_v2 = vld [vmem:[#allocation12_spill] sm:$0xff] }
  0x8b   : > { %1396 = vmatprep.mubr.f32.mxu1 %v6410_v10  ;;  %3656 = vmatpush3.msra.mxu1 %v4130_v16  ;;  %v6418_v16 = vld [vmem:[#allocation59_spill] sm:$0xff]  ;;  %v6438_v55 = vand.u32 4294901760, %v6437_v9  ;;  %v6441_v10 = vld [vmem:[#allocation73_spill] sm:$0xff] }
  0x8c   : > { %1160 = vmatmul.mubr.f32.gmra.mxu0 %v6411_v11  ;;  %3657 = vmatprep.subr.mxu1 %v4133_v17  ;;  %v6419_v17 = vld [vmem:[#allocation61_spill] sm:$0xff]  ;;  %v6427_v61 = vand.u32 4294901760, %v6418_v16  ;;  %v6442_v11 = vld [vmem:[#allocation14_spill] sm:$0xff] }
  0x8d   : > { %1166 = vmatprep.mubr.f32.mxu0 %v6412_v15  ;;  %3578 = vmatpush3.msra.mxu0 %v6414_v5  ;;  %v6429_v35 = vand.u32 4294901760, %v6419_v17  ;;  %v6443_v15 = vld [vmem:[#allocation74_spill] sm:$0xff]  ;;  %v6445_v5 = vand.u32 4294901760, %v6444_v27  ;;  %v6483_v27 = vand.u32 4294901760, %v4949_v37 }
  0x8e   : > { %1400 = vmatmul.mubr.f32.gmra.mxu1 %v6415_v0  ;;  %3579 = vmatprep.subr.mxu0 %v6416_v51  ;;  %v6447_v51 = vand.u32 4294901760, %v6350_v12  ;;  %v6455_v12 = vand.u32 4294901760, %v6357_v44 }
  0x8f   : > { %1407 = vmatprep.mubr.f32.mxu1 %v6417_v59  ;;  %3658 = vmatpush3.msra.mxu1 %v4155_v22  ;;  %v6424_v22 = vld [vmem:[#allocation64_spill] sm:$0xff] }
  0x90   : > { %1169 = vmatmul.mubr.f32.gmra.mxu0 %v6418_v16  ;;  %3659 = vmatprep.subr.mxu1 %v4161_v24  ;;  %v6425_v24 = vld [vmem:[#allocation65_spill] sm:$0xff]  ;;  %v6436_v3 = vand.u32 4294901760, %v6424_v22  ;;  %v6449_v16 = vld [vmem:[#allocation16_spill] sm:$0xff] }
  0x91   : > { %1175 = vmatprep.mubr.f32.mxu0 %v6419_v17  ;;  %3580 = vmatpush3.msra.mxu0 %v6420_v34  ;;  %v6439_v42 = vand.u32 4294901760, %v6425_v24  ;;  %v6450_v17 = vld [vmem:[#allocation76_spill] sm:$0xff]  ;;  %v6451_v34 = vld [vmem:[#allocation18_spill] sm:$0xff] }
  0x92   : > { %1411 = vmatmul.mubr.f32.gmra.mxu1 %v6421_v25  ;;  %3581 = vmatprep.subr.mxu0 %v6422_v19  ;;  %v6452_v25 = vld [vmem:[#allocation79_spill] sm:$0xff]  ;;  %v6453_v19 = vand.u32 4294901760, %v4471_v53  ;;  %v6461_v53 = vand.u32 4294901760, %v4500_v62  ;;  %v6462_v44 = vand.u32 4294901760, %v6450_v17 }
  0x93   : > { %1418 = vmatprep.mubr.f32.mxu1 %v6423_v54  ;;  %3660 = vmatpush3.msra.mxu1 %v4184_v30  ;;  %v6431_v30 = vld [vmem:[#allocation69_spill] sm:$0xff]  ;;  %v6454_v54 = vand.u32 4294901760, %v6441_v10 }
  0x94   : > { %1178 = vmatmul.mubr.f32.gmra.mxu0 %v6424_v22  ;;  %3661 = vmatprep.subr.mxu1 %v4190_v32  ;;  %v6433_v32 = vld [vmem:[#allocation70_spill] sm:$0xff]  ;;  %v6446_v0 = vand.u32 4294901760, %v6431_v30  ;;  %v6456_v22 = vand.u32 4294901760, %v6443_v15 }
  0x95   : > { %1184 = vmatprep.mubr.f32.mxu0 %v6425_v24  ;;  %3582 = vmatpush3.msra.mxu0 %v6426_v48  ;;  %v6448_v59 = vand.u32 4294901760, %v6433_v32  ;;  %v6457_v24 = vld [vmem:[#allocation19_spill] sm:$0xff]  ;;  %v6458_v48 = vld [vmem:[#allocation80_spill] sm:$0xff] }
  0x96   : > { %1422 = vmatmul.mubr.f32.gmra.mxu1 %v6427_v61  ;;  %3583 = vmatprep.subr.mxu0 %v6428_v21  ;;  %v6459_v61 = vld [vmem:[#allocation20_spill] sm:$0xff]  ;;  %v6460_v21 = vld [vmem:[#allocation81_spill] sm:$0xff] }
  0x97   : > { %1429 = vmatprep.mubr.f32.mxu1 %v6429_v35  ;;  %3662 = vmatpush3.msra.mxu1 %v6430_v4  ;;  %v260_v35 = vld [vmem:[%s6013_s1 + $0x118] sm:$0xff]  ;;  %v6463_v4 = vand.u32 4294901760, %v4523_v58  ;;  %v6469_v58 = vand.u32 4294901760, %v6366_v36 }
  0x98   : > { %1187 = vmatmul.mubr.f32.gmra.mxu0 %v6431_v30  ;;  %3663 = vmatprep.subr.mxu1 %v6432_v13  ;;  %v6464_v30 = vand.u32 4294901760, %v6452_v25  ;;  %v6465_v13 = vld [vmem:[#allocation83_spill] sm:$0xff]  ;;  %v5168_v62 = vand.u32 4294901760, %v260_v35 }
  0x99   : > { %1193 = vmatprep.mubr.f32.mxu0 %v6433_v32  ;;  %3584 = vmatpush3.msra.mxu0 %v6435_v26  ;;  %v6466_v32 = vld [vmem:[#allocation85_spill] sm:$0xff]  ;;  %v6468_v26 = vand.u32 4294901760, %v6458_v48  ;;  %v6472_v36 = vand.u32 4294901760, %v6465_v13 }
  0x9a   : > { %1433 = vmatmul.mubr.f32.gmra.mxu1 %v6436_v3  ;;  %3585 = vmatprep.subr.mxu0 %v6438_v55  ;;  %v6470_v3 = vand.u32 4294901760, %v6460_v21 }
  0x9b   : > { %1440 = vmatprep.mubr.f32.mxu1 %v6439_v42  ;;  %3664 = vmatpush3.msra.mxu1 %v6440_v2  ;;  %v6476_v42 = vand.u32 4294901760, %v4918_v60  ;;  %v6477_v2 = vand.u32 4294901760, %v4614_v1 }
  0x9c   : > { %1196 = vmatmul.mubr.f32.gmra.mxu0 %v6441_v10  ;;  %3665 = vmatprep.subr.mxu1 %v6442_v11  ;;  %v6478_v10 = vand.u32 4294901760, %v4923_v33  ;;  %v6479_v11 = vand.u32 4294901760, %v6373_v31  ;;  %v6481_v31 = vand.u32 4294901760, %v4934_v41 }
  0x9d   : > { %1202 = vmatprep.mubr.f32.mxu0 %v6443_v15  ;;  %3586 = vmatpush3.msra.mxu0 %v6445_v5  ;;  %v6482_v15 = vand.u32 4294901760, %v4639_v28  ;;  %v6484_v28 = vld [vmem:[#allocation33_spill] sm:$0xff] }
  0x9e   : > { %1444 = vmatmul.mubr.f32.gmra.mxu1 %v6446_v0  ;;  %3587 = vmatprep.subr.mxu0 %v6447_v51  ;;  %v6487_v0 = vld [vmem:[#allocation35_spill] sm:$0xff] }
  0x9f   : > { %1451 = vmatprep.mubr.f32.mxu1 %v6448_v59  ;;  %3666 = vmatpush3.msra.mxu1 %v6449_v16  ;;  %v6489_v59 = vand.u32 4294901760, %v4986_v8 }
  0xa0   : > { %1205 = vmatmul.mubr.f32.gmra.mxu0 %v6450_v17  ;;  %3667 = vmatprep.subr.mxu1 %v6451_v34  ;;  %v6491_v34 = vld [vmem:[#allocation45_spill] sm:$0xff] }
  0xa1   : > { %1211 = vmatprep.mubr.f32.mxu0 %v6452_v25  ;;  %3588 = vmatpush3.msra.mxu0 %v6453_v19  ;;  %v6492_v25 = vld [vmem:[#allocation46_spill] sm:$0xff] }
  0xa2   : > { %1455 = vmatmul.mubr.f32.gmra.mxu1 %v6454_v54  ;;  %3589 = vmatprep.subr.mxu0 %v6455_v12  ;;  %v6493_v54 = vld [vmem:[#allocation47_spill] sm:$0xff]  ;;  %v6494_v12 = vld [vmem:[#allocation50_spill] sm:$0xff] }
  0xa3   : > { %1462 = vmatprep.mubr.f32.mxu1 %v6456_v22  ;;  %3668 = vmatpush3.msra.mxu1 %v6457_v24  ;;  %v6495_v22 = vld [vmem:[#allocation51_spill] sm:$0xff]  ;;  %v6496_v24 = vld [vmem:[#allocation52_spill] sm:$0xff] }
  0xa4   : > { %1214 = vmatmul.mubr.f32.gmra.mxu0 %v6458_v48  ;;  %3669 = vmatprep.subr.mxu1 %v6459_v61  ;;  %v6497_v48 = vld [vmem:[#allocation53_spill] sm:$0xff]  ;;  %v6498_v61 = vld [vmem:[#allocation56_spill] sm:$0xff] }
  0xa5   : > { %1220 = vmatprep.mubr.f32.mxu0 %v6460_v21  ;;  %3590 = vmatpush3.msra.mxu0 %v6461_v53  ;;  %v6499_v21 = vld [vmem:[#allocation60_spill] sm:$0xff]  ;;  %v6500_v53 = vld [vmem:[#allocation62_spill] sm:$0xff] }
  0xa6   : > { %1466 = vmatmul.mubr.f32.gmra.mxu1 %v6462_v44  ;;  %3591 = vmatprep.subr.mxu0 %v6463_v4  ;;  %v6502_v44 = vld [vmem:[#allocation66_spill] sm:$0xff]  ;;  %v6503_v4 = vld [vmem:[#allocation67_spill] sm:$0xff] }
  0xa7   : > { %1473 = vmatprep.mubr.f32.mxu1 %v6464_v30  ;;  %3670 = vmatpush3.msra.mxu1 %v6360_v45  ;;  %v5183_v45 = vsub.f32 %v260_v35, %v5168_v62  ;;  %v6501_v35 = vld [vmem:[#allocation63_spill] sm:$0xff]  ;;  %v6504_v30 = vld [vmem:[#allocation68_spill] sm:$0xff] }
  0xa8   : > { %1223 = vmatmul.mubr.f32.gmra.mxu0 %v6465_v13  ;;  %3671 = vmatprep.subr.mxu1 %v6363_v7  ;;  %v259_v7 = vld [vmem:[%s6013_s1 + $0x110] sm:$0xff]  ;;  %v6505_v13 = vld [vmem:[#allocation71_spill] sm:$0xff] }
  0xa9   : > { %1229 = vmatprep.mubr.f32.mxu0 %v6466_v32  ;;  %3592 = vmatpush3.msra.mxu0 %v6467_v40  ;;  %v5204_v9 = vand.u32 4294901760, %v5183_v45  ;;  %v5206_v55 = vand.u32 4294901760, %v259_v7  ;;  %v6506_v40 = vld [vmem:[#allocation72_spill] sm:$0xff] }
  0xaa   : > { %1477 = vmatmul.mubr.f32.gmra.mxu1 %v6468_v26  ;;  %3593 = vmatprep.subr.mxu0 %v6469_v58  ;;  %v182_v26 = vld [vmem:[%s4465_s13 + $0x28] sm:$0xff] }
  0xab   : > { %1484 = vmatprep.mubr.f32.mxu1 %v6470_v3  ;;  %3672 = vmatpush3.msra.mxu1 %v4395_v63  ;;  %v6473_v63 = vand.u32 4294901760, %v4572_v6  ;;  %v6475_v6 = vand.u32 4294901760, %v4599_v50  ;;  %v2276_v50 = vsub.f32 %v5183_v45, %v5204_v9  ;;  %v6507_v58 = vld [vmem:[#allocation75_spill] sm:$0xff] }
  0xac   : > { %1232 = vmatmul.mubr.f32.gmra.mxu0 %v4918_v60  ;;  %3673 = vmatprep.subr.mxu1 %v6367_v46  ;;  %v6474_v46 = vand.u32 4294901760, %v6466_v32  ;;  %v5229_v60 = vsub.f32 %v259_v7, %v5206_v55  ;;  %v179_v32 = vld [vmem:[%s4465_s13 + $0x10] sm:$0xff]  ;;  %v185_v7 = vld [vmem:[%s4465_s13 + $0x40] sm:$0xff] }
  0xad   : > { %1238 = vmatprep.mubr.f32.mxu0 %v4923_v33  ;;  %3594 = vmatpush3.msra.mxu0 %v6471_v47  ;;  %v6480_v33 = vand.u32 4294901760, %v6374_v18  ;;  %v2277_v18 = vand.u32 4294901760, %v2276_v50  ;;  %v270_v3 = vsel %vm268_vm0, %v179_v32, 0  ;;  %v273_v47 = vsel %vm268_vm0, %v182_v26, 0 }
  0xae   : > { %1488 = vmatmul.mubr.f32.gmra.mxu1 %v6472_v36  ;;  %3595 = vmatprep.subr.mxu0 %v6473_v63  ;;  %v5249_v5 = vand.u32 4294901760, %v5229_v60  ;;  %v6508_v36 = vld [vmem:[#allocation77_spill] sm:$0xff]  ;;  %v6509_v63 = vld [vmem:[#allocation78_spill] sm:$0xff] }
  0xaf   : > { %1495 = vmatprep.mubr.f32.mxu1 %v6474_v46  ;;  %3674 = vmatpush3.msra.mxu1 %v6369_v39  ;;  %v257_v39 = vld [vmem:[%s6013_s1 + $0x100] sm:$0xff]  ;;  %v5331_v46 = vand.u32 4294901760, %v270_v3 }
  0xb0   : > { %1241 = vmatmul.mubr.f32.gmra.mxu0 %v4934_v41  ;;  %3675 = vmatprep.subr.mxu1 %v6372_v29  ;;  %v5218_v29 = vand.u32 4294901760, %v258_v49  ;;  %v5231_v1 = vand.u32 4294901760, %v257_v39  ;;  %v2283_v51 = vsub.f32 %v5229_v60, %v5249_v5 }
  0xb1   : > { %1247 = vmatprep.mubr.f32.mxu0 %v4949_v37  ;;  %3596 = vmatpush3.msra.mxu0 %v6475_v6  ;;  %v6485_v37 = vand.u32 4294901760, %v4964_v57  ;;  %v5335_v6 = vand.u32 4294901760, %v273_v47 }
  0xb2   : > { %1499 = vmatmul.mubr.f32.gmra.mxu1 %v6476_v42  ;;  %3597 = vmatprep.subr.mxu0 %v6477_v2  ;;  %v5252_v41 = vsub.f32 %v257_v39, %v5231_v1  ;;  %v2284_v16 = vand.u32 4294901760, %v2283_v51  ;;  %v276_v39 = vsel %vm268_vm0, %v185_v7, 0  ;;  %v191_v42 = vld [vmem:[%s4465_s13 + $0x70] sm:$0xff]  ;;  %v212_v7 = vld [vmem:[%s4465_s13 + $0x118] sm:$0xff] }
  0xb3   : > { %1506 = vmatprep.mubr.f32.mxu1 %v6478_v10  ;;  %3598 = vmatpush3.msra.mxu0 %v6479_v11  ;;  %v6510_v10 = vld [vmem:[#allocation82_spill] sm:$0xff]  ;;  %v5344_v11 = vsub.f32 %v270_v3, %v5331_v46  ;;  %v5346_v50 = vand.u32 4294901760, %v276_v39 }
  0xb4   : > { %1250 = vmatmul.mubr.f32.gmra.mxu0 %v4964_v57  ;;  %3676 = vmatpush3.msra.mxu1 %v4455_v43  ;;  %v5241_v43 = vsub.f32 %v258_v49, %v5218_v29  ;;  %v6488_v57 = vld [vmem:[#allocation39_spill] sm:$0xff]  ;;  %v188_v49 = vld [vmem:[%s4465_s13 + $0x58] sm:$0xff] }
  0xb5   : > { %1256 = vmatprep.mubr.f32.mxu0 %v4974_v23  ;;  %3599 = vmatprep.subr.mxu0 %v6480_v33  ;;  %v279_v2 = vsel %vm268_vm0, %v188_v49, 0  ;;  %v194_v33 = vld [vmem:[%s4465_s13 + $0x88] sm:$0xff]  ;;  %v5363_v51 = vsub.f32 %v276_v39, %v5346_v50 }
  0xb6   : > { %1510 = vmatmul.mubr.f32.gmra.mxu1 %v6481_v31  ;;  %3600 = vmatpush3.msra.mxu0 %v6482_v15  ;;  %v5351_v31 = vsub.f32 %v273_v47, %v5335_v6  ;;  %v282_v15 = vsel %vm268_vm0, %v191_v42, 0 }
  0xb7   : > { %1517 = vmatprep.mubr.f32.mxu1 %v6483_v27  ;;  %3677 = vmatprep.subr.mxu1 %v4474_v14  ;;  %v5260_v14 = vand.u32 4294901760, %v5241_v43  ;;  %v197_v27 = vld [vmem:[%s4465_s13 + $0xa0] sm:$0xff] }
  0xb8   : > { %1259 = vmatmul.mubr.f32.gmra.mxu0 %v4986_v8  ;;  %3678 = vmatpush3.msra.mxu1 %v4496_v38  ;;  %v6486_v38 = vand.u32 4294901760, %v4974_v23 }
  0xb9   : > { %1698 = vmatprep.mubr.f32.mxu0 %v6484_v28  ;;  %3679 = vmatprep.subr.mxu1 %v6375_v20  ;;  %v5269_v20 = vand.u32 4294901760, %v5252_v41  ;;  %v2290_v23 = vsub.f32 %v5241_v43, %v5260_v14 }
  0xba   : > { %1521 = vmatmul.mubr.f32.gmra.mxu1 %v6485_v37  ;;  %3849 = vmatprep.subr.mxu0 %v5168_v62  ;;  %v285_v37 = vsel %vm268_vm0, %v194_v33, 0  ;;  %v6517_v33 = vld [vmem:[#allocation30_spill] sm:$0xff] }
  0xbb   : > { %1528 = vmatprep.mubr.f32.mxu1 %v6486_v38  ;;  %3680 = vmatpush3.msra.mxu1 %v6376_v56  ;;  %v6490_v56 = vld [vmem:[#allocation41_spill] sm:$0xff]  ;;  %v2297_v17 = vsub.f32 %v5252_v41, %v5269_v20  ;;  %v2291_v8 = vand.u32 4294901760, %v2290_v23  ;;  %v6512_v38 = vld [vmem:[#allocation86_spill] sm:$0xff] }
  0xbc   : > { %1700 = vmatmul.mubr.f32.vlgmr.msra.gmra.mxu0 %v6487_v0  ;;  %3881 = vmatprep.subr.mxu1 %v2277_v18  ;;  %v200_v23 = vld [vmem:[%s4465_s13 + $0xb8] sm:$0xff] }
  0xbd   : > { %1705 = vmatprep.mubr.f32.mxu0 %v6488_v57  ;;  %3850 = vmatpush3.msra.mxu0 %v5168_v62  ;;  %v2298_v19 = vand.u32 4294901760, %v2297_v17 }
  0xbe   : > { %1532 = vmatmul.mubr.f32.gmra.mxu1 %v6489_v59  ;;  %3851 = vmatprep.subr.mxu0 %v5206_v55  ;;  %v288_v59 = vsel %vm268_vm0, %v197_v27, 0 }
  0xbf   : > { %1907 = vmatprep.mubr.f32.mxu1 %v6484_v28  ;;  %3852 = vmatpush3.msra.mxu0 %v5206_v55  ;;  %v6511_v28 = vld [vmem:[#allocation84_spill] sm:$0xff] }
  0xc0   : > { %1707 = vmatmul.mubr.f32.gmra.mxu0 %v6490_v56  ;;  %3853 = vmatprep.subr.mxu0 %v5218_v29 }
  0xc1   : > { %1712 = vmatprep.mubr.f32.mxu0 %v6491_v34  ;;  %3854 = vmatpush3.msra.mxu0 %v5218_v29 }
  0xc2   : > { %1909 = vmatmul.mubr.f32.vlgmr.msra.gmra.mxu1 %v6487_v0  ;;  %3855 = vmatprep.subr.mxu0 %v5231_v1  ;;  %v6231_v0 = vand.u32 4294901760, %v5344_v11 }
  0xc3   : > { %3882 = vmatpush3.msra.mxu1 %v2277_v18  ;;  %1914 = vmatprep.mubr.f32.mxu1 %v6488_v57  ;;  %v5356_v18 = vand.u32 4294901760, %v279_v2  ;;  %v5365_v57 = vand.u32 4294901760, %v282_v15 }
  0xc4   : > { %1714 = vmatmul.mubr.f32.gmra.mxu0 %v6492_v25  ;;  %3883 = vmatprep.subr.mxu1 %v2284_v16 }
  0xc5   : > { %1719 = vmatprep.mubr.f32.mxu0 %v6493_v54  ;;  %3884 = vmatpush3.msra.mxu1 %v2284_v16  ;;  %v203_v16 = vld [vmem:[%s4465_s13 + $0xd0] sm:$0xff]  ;;  %v5374_v17 = vsub.f32 %v279_v2, %v5356_v18 }
  0xc6   : > { %1916 = vmatmul.mubr.f32.gmra.mxu1 %v6490_v56  ;;  %3885 = vmatprep.subr.mxu1 %v2291_v8  ;;  %v6229_v56 = vand.u32 4294901760, %v5351_v31 }
  0xc7   : > { %1921 = vmatprep.mubr.f32.mxu1 %v6491_v34  ;;  %3886 = vmatpush3.msra.mxu1 %v2291_v8  ;;  %v5376_v34 = vand.u32 4294901760, %v285_v37  ;;  %v6513_v8 = vld [vmem:[#allocation87_spill] sm:$0xff] }
  0xc8   : > { %1721 = vmatmul.mubr.f32.gmra.mxu0 %v6494_v12  ;;  %3887 = vmatprep.subr.mxu1 %v2298_v19 }
  0xc9   : > { %1726 = vmatprep.mubr.f32.mxu0 %v6495_v22  ;;  %3856 = vmatpush3.msra.mxu0 %v5231_v1 }
  0xca   : > { %1923 = vmatmul.mubr.f32.gmra.mxu1 %v6492_v25  ;;  %3913 = vmatprep.subr.mxu0 %v5183_v45  ;;  %v5379_v25 = vand.u32 4294901760, %v288_v59 }
  0xcb   : > { %1928 = vmatprep.mubr.f32.mxu1 %v6493_v54  ;;  %3888 = vmatpush3.msra.mxu1 %v2298_v19  ;;  %v291_v19 = vsel %vm268_vm0, %v200_v23, 0  ;;  %v6514_v54 = vld [vmem:[#allocation88_spill] sm:$0xff] }
  0xcc   : > { %1728 = vmatmul.mubr.f32.gmra.mxu0 %v6496_v24  ;;  %3945 = vmatprep.subr.mxu1 %v5168_v62 }
  0xcd   : > { %1733 = vmatprep.mubr.f32.mxu0 %v6497_v48 }
  0xce   : > { %1930 = vmatmul.mubr.f32.gmra.mxu1 %v6494_v12  ;;  %v6225_v12 = vand.u32 4294901760, %v5363_v51 }
  0xcf   : > { %1935 = vmatprep.mubr.f32.mxu1 %v6495_v22  ;;  %v5388_v22 = vsub.f32 %v282_v15, %v5365_v57 }
  0xd0   : > { %1735 = vmatmul.mubr.f32.gmra.mxu0 %v6498_v61 }
  0xd1   : > { %1740 = vmatprep.mubr.f32.mxu0 %v6499_v21  ;;  %v6221_v3 = vand.u32 4294901760, %v5388_v22 }
  0xd2   : > { %1937 = vmatmul.mubr.f32.gmra.mxu1 %v6496_v24  ;;  %v294_v24 = vsel %vm268_vm0, %v203_v16, 0 }
  0xd3   : > { %1942 = vmatprep.mubr.f32.mxu1 %v6497_v48  ;;  %v206_v48 = vld [vmem:[%s4465_s13 + $0xe8] sm:$0xff]  ;;  %v2131_v23 = vsub.f32 %v5388_v22, %v6221_v3 }
  0xd4   : > { %1742 = vmatmul.mubr.f32.gmra.mxu0 %v6500_v53  ;;  %v297_v32 = vsel %vm268_vm0, %v206_v48, 0 }
  0xd5   : > { %1747 = vmatprep.mubr.f32.mxu0 %v6501_v35  ;;  %v5427_v2 = vand.u32 4294901760, %v297_v32 }
  0xd6   : > { %1944 = vmatmul.mubr.f32.gmra.mxu1 %v6498_v61  ;;  %v2101_v61 = vsub.f32 %v5351_v31, %v6229_v56 }
  0xd7   : > { %1949 = vmatprep.mubr.f32.mxu1 %v6499_v21  ;;  %v209_v21 = vld [vmem:[%s4465_s13 + $0x100] sm:$0xff] }
  0xd8   : > { %1749 = vmatmul.mubr.f32.gmra.mxu0 %v6502_v44  ;;  %v300_v47 = vsel %vm268_vm0, %v209_v21, 0 }
  0xd9   : > { %1754 = vmatprep.mubr.f32.mxu0 %v6503_v4 }
  0xda   : > { %1951 = vmatmul.mubr.f32.gmra.mxu1 %v6500_v53  ;;  %v6224_v53 = vand.u32 4294901760, %v5374_v17 }
  0xdb   : > { %1956 = vmatprep.mubr.f32.mxu1 %v6501_v35  ;;  %v5400_v35 = vsub.f32 %v285_v37, %v5376_v34  ;;  %v303_v37 = vsel %vm268_vm0, %v212_v7, 0 }
  0xdc   : > { %1756 = vmatmul.mubr.f32.gmra.mxu0 %v6504_v30  ;;  %v2121_v49 = vsub.f32 %v5374_v17, %v6224_v53  ;;  %v5452_v48 = vand.u32 4294901760, %v303_v37 }
  0xdd   : > { %1761 = vmatprep.mubr.f32.mxu0 %v6505_v13  ;;  %v6220_v39 = vand.u32 4294901760, %v5400_v35 }
  0xde   : > { %1958 = vmatmul.mubr.f32.gmra.mxu1 %v6502_v44  ;;  %v5402_v44 = vand.u32 4294901760, %v291_v19  ;;  %v2122_v21 = vand.u32 4294901760, %v2121_v49  ;;  %v224_v49 = vld [vmem:[%s4465_s13 + $0x178] sm:$0xff] }
  0xdf   : > { %1963 = vmatprep.mubr.f32.mxu1 %v6503_v4  ;;  %v6515_v4 = vld [vmem:[#allocation29_spill] sm:$0xff] }
  0xe0   : > { %1763 = vmatmul.mubr.f32.gmra.mxu0 %v6506_v40  ;;  %v5425_v42 = vsub.f32 %v291_v19, %v5402_v44  ;;  %v218_v19 = vld [vmem:[%s4465_s13 + $0x148] sm:$0xff] }
  0xe1   : > { %1768 = vmatprep.mubr.f32.mxu0 %v6507_v58  ;;  %v309_v7 = vsel %vm268_vm0, %v218_v19, 0 }
  0xe2   : > { %1965 = vmatmul.mubr.f32.gmra.mxu1 %v6504_v30  ;;  %v5406_v30 = vsub.f32 %v288_v59, %v5379_v25 }
  0xe3   : > { %1970 = vmatprep.mubr.f32.mxu1 %v6505_v13  ;;  %v5408_v13 = vand.u32 4294901760, %v294_v24 }
  0xe4   : > { %1770 = vmatmul.mubr.f32.gmra.mxu0 %v6508_v36  ;;  %v6219_v15 = vand.u32 4294901760, %v5406_v30 }
  0xe5   : > { %1775 = vmatprep.mubr.f32.mxu0 %v6509_v63  ;;  %v5433_v27 = vsub.f32 %v294_v24, %v5408_v13  ;;  %v5450_v24 = vsub.f32 %v297_v32, %v5427_v2 }
  0xe6   : > { %1972 = vmatmul.mubr.f32.gmra.mxu1 %v6506_v40  ;;  %v6516_v40 = vld [vmem:[#allocation89_spill] sm:$0xff] }
  0xe7   : > { %1977 = vmatprep.mubr.f32.mxu1 %v6507_v58  ;;  %v2111_v58 = vsub.f32 %v5363_v51, %v6225_v12 }
  0xe8   : > { %1777 = vmatmul.mubr.f32.gmra.mxu0 %v4866_v52 }
  0xe9   : > { %1782 = vmatprep.mubr.f32.mxu0 %v6510_v10  ;;  %v2112_v59 = vand.u32 4294901760, %v2111_v58  ;;  %v2132_v58 = vand.u32 4294901760, %v2131_v23 }
  0xea   : > { %1979 = vmatmul.mubr.f32.gmra.mxu1 %v6508_v36  ;;  %v2102_v36 = vand.u32 4294901760, %v2101_v61  ;;  %v221_v61 = vld [vmem:[%s4465_s13 + $0x160] sm:$0xff] }
  0xeb   : > { %1984 = vmatprep.mubr.f32.mxu1 %v6509_v63 }
  0xec   : > { %1784 = vmatmul.mubr.f32.gmra.mxu0 %v6511_v28 }
  0xed   : > { %1789 = vmatprep.mubr.f32.mxu0 %v6512_v38 }
  0xee   : > { %1986 = vmatmul.mubr.f32.gmra.mxu1 %v4866_v52  ;;  %v2091_v52 = vsub.f32 %v5344_v11, %v6231_v0 }
  0xef   : > { %1991 = vmatprep.mubr.f32.mxu1 %v6510_v10  ;;  %v215_v10 = vld [vmem:[%s4465_s13 + $0x130] sm:$0xff] }
  0xf0   : > { %1791 = vmatmul.mubr.f32.gmra.mxu0 %v6513_v8  ;;  %v2092_v26 = vand.u32 4294901760, %v2091_v52  ;;  %v6218_v52 = vand.u32 4294901760, %v5425_v42 }
  0xf1   : > { %1796 = vmatprep.mubr.f32.mxu0 %v6514_v54 }
  0xf2   : > { %1993 = vmatmul.mubr.f32.gmra.mxu1 %v6511_v28  ;;  %v5435_v28 = vand.u32 4294901760, %v300_v47 }
  0xf3   : > { %1998 = vmatprep.mubr.f32.mxu1 %v6512_v38 }
  0xf4   : > { %1798 = vmatmul.mubr.f32.gmra.mxu0 %v6515_v4 }
  0xf5   : > { %1803 = vmatprep.mubr.f32.mxu0 %v6516_v40 }
  0xf6   : > { %2000 = vmatmul.mubr.f32.gmra.mxu1 %v6513_v8  ;;  %v3281_v63 = vpop.f32.mrf.mxu0  ;;  %v306_v8 = vsel %vm268_vm0, %v215_v10, 0  ;;  %v2161_v10 = vsub.f32 %v5425_v42, %v6218_v52 }
  0xf7   : > { %2005 = vmatprep.mubr.f32.mxu1 %v6514_v54  ;;  %v2141_v54 = vsub.f32 %v5400_v35, %v6220_v39  ;;  %v5463_v32 = vand.u32 4294901760, %v306_v8 }
  0xf8   : > { %1805 = vmatmul.mubr.f32.gmra.mxu0 %v6517_v33  ;;  %v3282_v38 = vpop.f32.mrf.mxu0 }
  0xf9   : > { %3857 = vmatprep.mubr.f32.mxu0 %v2092_v26  ;;  %v3283_v16 = vadd.f32 %v3282_v38, %v3281_v63  ;;  %v5460_v26 = vsub.f32 %v300_v47, %v5435_v28  ;;  %v2142_v47 = vand.u32 4294901760, %v2141_v54  ;;  %v5477_v38 = vsub.f32 %v303_v37, %v5452_v48 }
  0xfa   : > { %2007 = vmatmul.mubr.f32.gmra.mxu1 %v6515_v4  ;;  %v2151_v4 = vsub.f32 %v5406_v30, %v6219_v15  ;;  %v5484_v54 = vand.u32 4294901760, %v309_v7 }
  0xfb   : > { %2012 = vmatprep.mubr.f32.mxu1 %v6516_v40  ;;  %v6217_v40 = vand.u32 4294901760, %v5433_v27  ;;  %v6223_v19 = vand.u32 4294901760, %v5460_v26 }
  0xfc   : > { %3858 = vmatmul.mubr.f32.vlgmr.msra.gmra.mxu0 %v2102_v36  ;;  %v312_v36 = vsel %vm268_vm0, %v221_v61, 0  ;;  %v5509_v15 = vsub.f32 %v309_v7, %v5484_v54 }
  0xfd   : > { %3860 = vmatprep.mubr.f32.mxu0 %v2112_v59  ;;  %3914 = vmatpush3.msra.mxu0 %v5183_v45  ;;  %v3284_v63 = vpop.f32.mrf.mxu0  ;;  %v6222_v45 = vand.u32 4294901760, %v5450_v24  ;;  %v2152_v59 = vand.u32 4294901760, %v2151_v4  ;;  %v2171_v23 = vsub.f32 %v5433_v27, %v6217_v40  ;;  %v5495_v4 = vand.u32 4294901760, %v312_v36 }
  0xfe   : > { %2014 = vmatmul.mubr.f32.gmra.mxu1 %v6517_v33  ;;  %3915 = vmatprep.subr.mxu0 %v5229_v60  ;;  %v315_v40 = vsel %vm268_vm0, %v224_v49, 0 }
  0xff   : > { %3889 = vmatprep.mubr.f32.mxu1 %v5331_v46  ;;  %3916 = vmatpush3.msra.mxu0 %v5229_v60  ;;  %v3285_v33 = vpop.f32.mrf.mxu0  ;;  %v5489_v60 = vld [vmem:[%s6014_s2] ss:$0 sm:$0xff]  ;;  %v5511_v39 = vand.u32 4294901760, %v315_v40  ;;  %v2172_v3 = vand.u32 4294901760, %v2171_v23 }
 0x100   : > { %3861 = vmatmul.mubr.f32.gmra.mxu0 %v2122_v21  ;;  %3917 = vmatprep.subr.mxu0 %v5241_v43  ;;  %v3286_v37 = vadd.f32 %v3285_v33, %v3284_v63  ;;  %v5492_v21 = vsub.f32 %v306_v8, %v5463_v32  ;;  %v2181_v8 = vsub.f32 %v5450_v24, %v6222_v45 }
 0x101   : > { %3863 = vmatprep.mubr.f32.mxu0 %v2132_v58  ;;  %v3361_v61 = vpop.f32.mrf.mxu1  ;;  %3918 = vmatpush3.msra.mxu0 %v5241_v43  ;;  %v2162_v58 = vand.u32 4294901760, %v2161_v10  ;;  %v6226_v43 = vand.u32 4294901760, %v5477_v38  ;;  %v426_v63 = vadd.f32 %v3283_v16, %v5489_v60  ;;  %v2191_v45 = vsub.f32 %v5460_v26, %v6223_v19 }
 0x102   : > { %3890 = vmatmul.mubr.f32.vlgmr.msra.gmra.mxu1 %v5335_v6  ;;  %3919 = vmatprep.subr.mxu0 %v5252_v41  ;;  %v6227_v16 = vand.u32 4294901760, %v5492_v21  ;;  %v2182_v23 = vand.u32 4294901760, %v2181_v8  ;;  %v5533_v12 = vsub.f32 %v315_v40, %v5511_v39 }
 0x103   : > { %3946 = vmatpush3.msra.mxu1 %v5168_v62  ;;  %v3362_v52 = vpop.f32.mrf.mxu1  ;;  %3892 = vmatprep.mubr.f32.mxu1 %v5346_v50  ;;  %v2201_v19 = vsub.f32 %v5477_v38, %v6226_v43 }
 0x104   : > { %v3287_v33 = vpop.f32.mrf.mxu0  ;;  %3864 = vmatmul.mubr.f32.gmra.mxu0 %v2142_v47  ;;  %v3363_v49 = vadd.f32 %v3362_v52, %v3361_v61  ;;  %3947 = vmatprep.subr.mxu1 %v5206_v55  ;;  %v5519_v52 = vsub.f32 %v312_v36, %v5495_v4  ;;  %v441_v36 = vadd.f32 %v3286_v37, %v5489_v60 }
 0x105   : > { %3866 = vmatprep.mubr.f32.mxu0 %v2152_v59  ;;  %v3364_v10 = vpop.f32.mrf.mxu1  ;;  %3948 = vmatpush3.msra.mxu1 %v5206_v55 }
 0x106   : > { %v3288_v47 = vpop.f32.mrf.mxu0  ;;  %v5521_v61 = vadd.f32 %v3363_v49, %v426_v63  ;;  %3893 = vmatmul.mubr.f32.gmra.mxu1 %v5356_v18  ;;  %3949 = vmatprep.subr.mxu1 %v5218_v29  ;;  %v6228_v49 = vand.u32 4294901760, %v5509_v15  ;;  %v6230_v43 = vand.u32 4294901760, %v5519_v52 }
 0x107   : > { %v3289_v7 = vadd.f32 %v3288_v47, %v3287_v33  ;;  %v3365_v59 = vpop.f32.mrf.mxu1  ;;  %3895 = vmatprep.mubr.f32.mxu1 %v5365_v57  ;;  %3950 = vmatpush3.msra.mxu1 %v5218_v29  ;;  %v2192_v33 = vand.u32 4294901760, %v2191_v45  ;;  %v2211_v47 = vsub.f32 %v5492_v21, %v6227_v16 }
 0x108   : > { %v3290_v53 = vpop.f32.mrf.mxu0  ;;  %3867 = vmatmul.mubr.f32.gmra.mxu0 %v2162_v58  ;;  %v3366_v63 = vadd.f32 %v3365_v59, %v3364_v10  ;;  %3951 = vmatprep.subr.mxu1 %v5231_v1 }
 0x109   : > { %3869 = vmatprep.mubr.f32.mxu0 %v2172_v3  ;;  %v3367_v8 = vpop.f32.mrf.mxu1  ;;  %3920 = vmatpush3.msra.mxu0 %v5252_v41  ;;  %v2202_v3 = vand.u32 4294901760, %v2201_v19  ;;  %v456_v45 = vadd.f32 %v3289_v7, %v5489_v60  ;;  %v2221_v41 = vsub.f32 %v5509_v15, %v6228_v49  ;;  %v2231_v19 = vsub.f32 %v5519_v52, %v6230_v43 }
 0x10a   : > { %v3291_v37 = vpop.f32.mrf.mxu0  ;;  %v5541_v58 = vadd.f32 %v3366_v63, %v441_v36  ;;  %3896 = vmatmul.mubr.f32.gmra.mxu1 %v5376_v34  ;;  %3977 = vmatprep.subr.mxu0 %v5204_v9  ;;  %v6232_v36 = vand.u32 4294901760, %v5533_v12  ;;  %v2212_v63 = vand.u32 4294901760, %v2211_v47 }
 0x10b   : > { %v3292_v40 = vadd.f32 %v3291_v37, %v3290_v53  ;;  %v3368_v10 = vpop.f32.mrf.mxu1  ;;  %3898 = vmatprep.mubr.f32.mxu1 %v5379_v25  ;;  %3952 = vmatpush3.msra.mxu1 %v5231_v1  ;;  %v2222_v56 = vand.u32 4294901760, %v2221_v41 }
 0x10c   : > { %v3293_v59 = vpop.f32.mrf.mxu0  ;;  %3870 = vmatmul.mubr.f32.gmra.mxu0 %v2182_v23  ;;  %v3369_v16 = vadd.f32 %v3368_v10, %v3367_v8  ;;  %4009 = vmatprep.subr.mxu1 %v5168_v62  ;;  %v2241_v47 = vsub.f32 %v5533_v12, %v6232_v36 }
 0x10d   : > { %3872 = vmatprep.mubr.f32.mxu0 %v2192_v33  ;;  %v3370_v53 = vpop.f32.mrf.mxu1  ;;  %v471_v10 = vadd.f32 %v3292_v40, %v5489_v60 }
 0x10e   : > { %v3294_v37 = vpop.f32.mrf.mxu0  ;;  %v5556_v7 = vadd.f32 %v3369_v16, %v456_v45  ;;  %3899 = vmatmul.mubr.f32.gmra.mxu1 %v5402_v44  ;;  %v2232_v16 = vand.u32 4294901760, %v2231_v19 }
 0x10f   : > { %v3295_v23 = vadd.f32 %v3294_v37, %v3293_v59  ;;  %v3371_v8 = vpop.f32.mrf.mxu1  ;;  %3901 = vmatprep.mubr.f32.mxu1 %v5408_v13 }
 0x110   : > { %v3296_v49 = vpop.f32.mrf.mxu0  ;;  %3873 = vmatmul.mubr.f32.gmra.mxu0 %v2202_v3  ;;  %v3372_v33 = vadd.f32 %v3371_v8, %v3370_v53  ;;  %v2242_v53 = vand.u32 4294901760, %v2241_v47 }
 0x111   : > { %3875 = vmatprep.mubr.f32.mxu0 %v2212_v63  ;;  %v3373_v43 = vpop.f32.mrf.mxu1  ;;  %v486_v40 = vadd.f32 %v3295_v23, %v5489_v60 }
 0x112   : > { %v3297_v45 = vpop.f32.mrf.mxu0  ;;  %v5564_v0 = vadd.f32 %v3372_v33, %v471_v10  ;;  %3902 = vmatmul.mubr.f32.gmra.mxu1 %v5427_v2 }
 0x113   : > { %v3298_v59 = vadd.f32 %v3297_v45, %v3296_v49  ;;  %v3374_v37 = vpop.f32.mrf.mxu1  ;;  %3904 = vmatprep.mubr.f32.mxu1 %v5435_v28 }
 0x114   : > { %v3299_v3 = vpop.f32.mrf.mxu0  ;;  %3876 = vmatmul.mubr.f32.gmra.mxu0 %v2222_v56  ;;  %v3375_v41 = vadd.f32 %v3374_v37, %v3373_v43 }
 0x115   : > { %3878 = vmatprep.mubr.f32.mxu0 %v2232_v16  ;;  %v3376_v8 = vpop.f32.mrf.mxu1  ;;  %v501_v49 = vadd.f32 %v3298_v59, %v5489_v60 }
 0x116   : > { %v3300_v63 = vpop.f32.mrf.mxu0  ;;  %v5569_v36 = vadd.f32 %v3375_v41, %v486_v40  ;;  %3905 = vmatmul.mubr.f32.gmra.mxu1 %v5452_v48 }
 0x117   : > { %v3301_v19 = vadd.f32 %v3300_v63, %v3299_v3  ;;  %v3377_v10 = vpop.f32.mrf.mxu1  ;;  %3907 = vmatprep.mubr.f32.mxu1 %v5463_v32 }
 0x118   : > { %v3302_v33 = vpop.f32.mrf.mxu0  ;;  %3879 = vmatmul.mubr.f32.gmra.mxu0 %v2242_v53  ;;  %v3378_v23 = vadd.f32 %v3377_v10, %v3376_v8 }
 0x119   : > { %3921 = vmatprep.mubr.f32.mxu0 %v5344_v11  ;;  %v3379_v56 = vpop.f32.mrf.mxu1  ;;  %v516_v37 = vadd.f32 %v3301_v19, %v5489_v60  ;;  %v6518_v19 = vand.u32 4294901760, %v5344_v11  ;;  %v6519_v11 = vand.u32 4294901760, %v5351_v31 }
 0x11a   : > { %v3303_v43 = vpop.f32.mrf.mxu0  ;;  %v5575_v47 = vadd.f32 %v3378_v23, %v501_v49  ;;  %3908 = vmatmul.mubr.f32.gmra.mxu1 %v5484_v54 }
 0x11b   : > { %v3304_v16 = vadd.f32 %v3303_v43, %v3302_v33  ;;  %v3380_v45 = vpop.f32.mrf.mxu1  ;;  %3910 = vmatprep.mubr.f32.mxu1 %v5495_v4 }
 0x11c   : > { %v3305_v40 = vpop.f32.mrf.mxu0  ;;  %3922 = vmatmul.mubr.f32.vlgmr.msra.gmra.mxu0 %v5351_v31  ;;  %v3381_v59 = vadd.f32 %v3380_v45, %v3379_v56 }
 0x11d   : > { %3924 = vmatprep.mubr.f32.mxu0 %v5363_v51  ;;  %v3382_v3 = vpop.f32.mrf.mxu1  ;;  %3978 = vmatpush3.msra.mxu0 %v5204_v9  ;;  %v531_v10 = vadd.f32 %v3304_v16, %v5489_v60  ;;  %v6520_v16 = vand.u32 4294901760, %v5363_v51 }
 0x11e   : > { %v3306_v41 = vpop.f32.mrf.mxu0  ;;  %v5583_v53 = vadd.f32 %v3381_v59, %v516_v37  ;;  %3911 = vmatmul.mubr.f32.gmra.mxu1 %v5511_v39  ;;  %3979 = vmatprep.subr.mxu0 %v5249_v5 }
 0x11f   : > { %v3307_v8 = vadd.f32 %v3306_v41, %v3305_v40  ;;  %v3383_v63 = vpop.f32.mrf.mxu1  ;;  %3953 = vmatprep.mubr.f32.mxu1 %v6518_v19  ;;  %3980 = vmatpush3.msra.mxu0 %v5249_v5  ;;  %v6522_v41 = vand.u32 4294901760, %v5388_v22 }
 0x120   : > { %v3308_v49 = vpop.f32.mrf.mxu0  ;;  %3925 = vmatmul.mubr.f32.gmra.mxu0 %v5374_v17  ;;  %v3384_v9 = vadd.f32 %v3383_v63, %v3382_v3  ;;  %3981 = vmatprep.subr.mxu0 %v5260_v14 }
 0x121   : > { %3927 = vmatprep.mubr.f32.mxu0 %v5388_v22  ;;  %v3385_v33 = vpop.f32.mrf.mxu1  ;;  %3982 = vmatpush3.msra.mxu0 %v5260_v14  ;;  %v546_v45 = vadd.f32 %v3307_v8, %v5489_v60  ;;  %v6523_v22 = vand.u32 4294901760, %v5400_v35 }
 0x122   : > { %v3309_v23 = vpop.f32.mrf.mxu0  ;;  %v5595_v56 = vadd.f32 %v3384_v9, %v531_v10  ;;  %3954 = vmatmul.mubr.f32.vlgmr.msra.gmra.mxu1 %v6519_v11  ;;  %3983 = vmatprep.subr.mxu0 %v5269_v20  ;;  %v6524_v9 = vand.u32 4294901760, %v5406_v30 }
 0x123   : > { %v3310_v5 = vadd.f32 %v3309_v23, %v3308_v49  ;;  %4010 = vmatpush3.msra.mxu1 %v5168_v62  ;;  %v3386_v43 = vpop.f32.mrf.mxu1  ;;  %3956 = vmatprep.mubr.f32.mxu1 %v6520_v16  ;;  %v6521_v62 = vand.u32 4294901760, %v5374_v17 }
 0x124   : > { %v3311_v37 = vpop.f32.mrf.mxu0  ;;  %3928 = vmatmul.mubr.f32.gmra.mxu0 %v5400_v35  ;;  %v3387_v14 = vadd.f32 %v3386_v43, %v3385_v33  ;;  %4011 = vmatprep.subr.mxu1 %v5206_v55  ;;  %v6525_v35 = vand.u32 4294901760, %v5425_v42 }
 0x125   : > { %3930 = vmatprep.mubr.f32.mxu0 %v5406_v30  ;;  %v3388_v31 = vpop.f32.mrf.mxu1  ;;  %4012 = vmatpush3.msra.mxu1 %v5206_v55  ;;  %v561_v8 = vadd.f32 %v3310_v5, %v5489_v60 }
 0x126   : > { %v3312_v40 = vpop.f32.mrf.mxu0  ;;  %v5608_v59 = vadd.f32 %v3387_v14, %v546_v45  ;;  %3957 = vmatmul.mubr.f32.gmra.mxu1 %v6521_v62  ;;  %4013 = vmatprep.subr.mxu1 %v5218_v29  ;;  %v6526_v45 = vand.u32 4294901760, %v5433_v27 }
 0x127   : > { %v3313_v51 = vadd.f32 %v3312_v40, %v3311_v37  ;;  %v3389_v3 = vpop.f32.mrf.mxu1  ;;  %3959 = vmatprep.mubr.f32.mxu1 %v6522_v41  ;;  %4014 = vmatpush3.msra.mxu1 %v5218_v29 }
 0x128   : > { %v3314_v63 = vpop.f32.mrf.mxu0  ;;  %3931 = vmatmul.mubr.f32.gmra.mxu0 %v5425_v42  ;;  %v3390_v55 = vadd.f32 %v3389_v3, %v3388_v31  ;;  %4015 = vmatprep.subr.mxu1 %v5231_v1  ;;  %v6527_v42 = vand.u32 4294901760, %v5450_v24 }
 0x129   : > { %3933 = vmatprep.mubr.f32.mxu0 %v5433_v27  ;;  %v3391_v17 = vpop.f32.mrf.mxu1  ;;  %3984 = vmatpush3.msra.mxu0 %v5269_v20  ;;  %v576_v33 = vadd.f32 %v3313_v51, %v5489_v60  ;;  %v6528_v27 = vand.u32 4294901760, %v5460_v26 }
 0x12a   : > { %v3315_v19 = vpop.f32.mrf.mxu0  ;;  %v5621_v10 = vadd.f32 %v3390_v55, %v561_v8  ;;  %3960 = vmatmul.mubr.f32.gmra.mxu1 %v6523_v22 }
 0x12b   : > { %v3316_v29 = vadd.f32 %v3315_v19, %v3314_v63  ;;  %v3392_v49 = vpop.f32.mrf.mxu1  ;;  %3962 = vmatprep.mubr.f32.mxu1 %v6524_v9  ;;  %4016 = vmatpush3.msra.mxu1 %v5231_v1 }
 0x12c   : > { %v3317_v23 = vpop.f32.mrf.mxu0  ;;  %3934 = vmatmul.mubr.f32.gmra.mxu0 %v5450_v24  ;;  %v3393_v11 = vadd.f32 %v3392_v49, %v3391_v17  ;;  %v6529_v24 = vand.u32 4294901760, %v5477_v38 }
 0x12d   : > { %3936 = vmatprep.mubr.f32.mxu0 %v5460_v26  ;;  %v3394_v20 = vpop.f32.mrf.mxu1  ;;  %v591_v1 = vadd.f32 %v3316_v29, %v5489_v60  ;;  %v6530_v26 = vand.u32 4294901760, %v5492_v21 }
 0x12e   : > { %v3318_v5 = vpop.f32.mrf.mxu0  ;;  %v5631_v43 = vadd.f32 %v3393_v11, %v576_v33  ;;  %3963 = vmatmul.mubr.f32.gmra.mxu1 %v6525_v35  ;;  %v6532_v35 = vand.u32 4294901760, %v5519_v52 }
 0x12f   : > { %v3319_v16 = vadd.f32 %v3318_v5, %v3317_v23  ;;  %v3395_v30 = vpop.f32.mrf.mxu1  ;;  %3965 = vmatprep.mubr.f32.mxu1 %v6526_v45 }
 0x130   : > { %v3320_v37 = vpop.f32.mrf.mxu0  ;;  %3937 = vmatmul.mubr.f32.gmra.mxu0 %v5477_v38  ;;  %v3396_v14 = vadd.f32 %v3395_v30, %v3394_v20  ;;  %v6531_v38 = vand.u32 4294901760, %v5509_v15 }
 0x131   : > { %3939 = vmatprep.mubr.f32.mxu0 %v5492_v21  ;;  %v3397_v31 = vpop.f32.mrf.mxu1  ;;  %v606_v41 = vadd.f32 %v3319_v16, %v5489_v60 }
 0x132   : > { %v3321_v40 = vpop.f32.mrf.mxu0  ;;  %v5640_v62 = vadd.f32 %v3396_v14, %v591_v1  ;;  %3966 = vmatmul.mubr.f32.gmra.mxu1 %v6527_v42  ;;  %v6533_v14 = vand.u32 4294901760, %v5533_v12 }
 0x133   : > { %v3322_v51 = vadd.f32 %v3321_v40, %v3320_v37  ;;  %v3398_v3 = vpop.f32.mrf.mxu1  ;;  %3968 = vmatprep.mubr.f32.mxu1 %v6528_v27 }
 0x134   : > { %v3323_v8 = vpop.f32.mrf.mxu0  ;;  %3940 = vmatmul.mubr.f32.gmra.mxu0 %v5509_v15  ;;  %v3399_v63 = vadd.f32 %v3398_v3, %v3397_v31 }
 0x135   : > { %3942 = vmatprep.mubr.f32.mxu0 %v5519_v52  ;;  %v3400_v55 = vpop.f32.mrf.mxu1  ;;  %v621_v49 = vadd.f32 %v3322_v51, %v5489_v60 }
 0x136   : > { %v3324_v17 = vpop.f32.mrf.mxu0  ;;  %v5649_v19 = vadd.f32 %v3399_v63, %v606_v41  ;;  %3969 = vmatmul.mubr.f32.gmra.mxu1 %v6529_v24 }
 0x137   : > { %v3325_v22 = vadd.f32 %v3324_v17, %v3323_v8  ;;  %v3401_v29 = vpop.f32.mrf.mxu1  ;;  %3971 = vmatprep.mubr.f32.mxu1 %v6530_v26 }
 0x138   : > { %v3326_v9 = vpop.f32.mrf.mxu0  ;;  %3943 = vmatmul.mubr.f32.gmra.mxu0 %v5533_v12  ;;  %v3402_v33 = vadd.f32 %v3401_v29, %v3400_v55 }
 0x139   : > { %3985 = vmatprep.mubr.f32.mxu0 %v5331_v46  ;;  %v636_v30 = vadd.f32 %v3325_v22, %v5489_v60 }
 0x13a   : > { %v3327_v23 = vpop.f32.mrf.mxu0  ;;  %v5658_v11 = vadd.f32 %v3402_v33, %v621_v49  ;;  %v3403_v20 = vpop.f32.mrf.mxu1  ;;  %3972 = vmatmul.mubr.f32.gmra.mxu1 %v6531_v38 }
 0x13b   : > { %v3328_v5 = vadd.f32 %v3327_v23, %v3326_v9  ;;  %3974 = vmatprep.mubr.f32.mxu1 %v6532_v35 }
 0x13c   : > { %v3441_v21 = vpop.f32.mrf.mxu0  ;;  %3986 = vmatmul.mubr.f32.vlgmr.msra.gmra.mxu0 %v5335_v6  ;;  %v3404_v16 = vpop.f32.mrf.mxu1 }
 0x13d   : > { %v3405_v45 = vadd.f32 %v3404_v16, %v3403_v20  ;;  %3988 = vmatprep.mubr.f32.mxu0 %v5346_v50  ;;  %v651_v42 = vadd.f32 %v3328_v5, %v5489_v60 }
 0x13e   : > { %v3442_v1 = vpop.f32.mrf.mxu0  ;;  %v3406_v37 = vpop.f32.mrf.mxu1  ;;  %3975 = vmatmul.mubr.f32.gmra.mxu1 %v6533_v14 }
 0x13f   : > { %v5669_v15 = vadd.f32 %v3405_v45, %v636_v30  ;;  %v3443_v31 = vadd.f32 %v3442_v1, %v3441_v21  ;;  %4017 = vmatprep.mubr.f32.mxu1 %v5331_v46 }
 0x140   : > { %v3444_v52 = vpop.f32.mrf.mxu0  ;;  %3989 = vmatmul.mubr.f32.gmra.mxu0 %v5356_v18  ;;  %v3407_v40 = vpop.f32.mrf.mxu1 }
 0x141   : > { %v1126_v51 = vadd.f32 %v3443_v31, %v5521_v61  ;;  %v3408_v3 = vadd.f32 %v3407_v40, %v3406_v37  ;;  %3991 = vmatprep.mubr.f32.mxu0 %v5365_v57 }
 0x142   : > { %v3445_v27 = vpop.f32.mrf.mxu0  ;;  %v3521_v41 = vpop.f32.mrf.mxu1  ;;  %4018 = vmatmul.mubr.f32.vlgmr.msra.gmra.mxu1 %v5335_v6 }
 0x143   : > { %v5677_v12 = vadd.f32 %v3408_v3, %v651_v42  ;;  %v3446_v8 = vadd.f32 %v3445_v27, %v3444_v52  ;;  %4020 = vmatprep.mubr.f32.mxu1 %v5346_v50 }
 0x144   : > { %v3447_v46 = vpop.f32.mrf.mxu0  ;;  %3992 = vmatmul.mubr.f32.gmra.mxu0 %v5376_v34  ;;  %v3522_v63 = vpop.f32.mrf.mxu1 }
 0x145   : > { %v1135_v60 = vadd.f32 %v3446_v8, %v5541_v58  ;;  %v3523_v55 = vadd.f32 %v3522_v63, %v3521_v41  ;;  %3994 = vmatprep.mubr.f32.mxu0 %v5379_v25 }
 0x146   : > { %v3448_v61 = vpop.f32.mrf.mxu0  ;;  %v3524_v17 = vpop.f32.mrf.mxu1  ;;  %4021 = vmatmul.mubr.f32.gmra.mxu1 %v5356_v18 }
 0x147   : > { %v3449_v24 = vadd.f32 %v3448_v61, %v3447_v46  ;;  %v5684_v6 = vadd.f32 %v3523_v55, %v1126_v51  ;;  %4023 = vmatprep.mubr.f32.mxu1 %v5365_v57 }
 0x148   : > { %v3450_v22 = vpop.f32.mrf.mxu0  ;;  %3995 = vmatmul.mubr.f32.gmra.mxu0 %v5402_v44  ;;  %v3525_v50 = vpop.f32.mrf.mxu1 }
 0x149   : > { %v1144_v29 = vadd.f32 %v3449_v24, %v5556_v7  ;;  %v3526_v26 = vadd.f32 %v3525_v50, %v3524_v17  ;;  %3997 = vmatprep.mubr.f32.mxu0 %v5408_v13 }
 0x14a   : > { %v3451_v58 = vpop.f32.mrf.mxu0  ;;  %v3527_v49 = vpop.f32.mrf.mxu1  ;;  %4024 = vmatmul.mubr.f32.gmra.mxu1 %v5376_v34 }
 0x14b   : > { %v3452_v9 = vadd.f32 %v3451_v58, %v3450_v22  ;;  %v5691_v18 = vadd.f32 %v3526_v26, %v1135_v60  ;;  %4026 = vmatprep.mubr.f32.mxu1 %v5379_v25 }
 0x14c   : > { %v3453_v33 = vpop.f32.mrf.mxu0  ;;  %3998 = vmatmul.mubr.f32.gmra.mxu0 %v5427_v2  ;;  %v3528_v57 = vpop.f32.mrf.mxu1 }
 0x14d   : > { %v1153_v23 = vadd.f32 %v3452_v9, %v5564_v0  ;;  %v3529_v20 = vadd.f32 %v3528_v57, %v3527_v49  ;;  %4000 = vmatprep.mubr.f32.mxu0 %v5435_v28 }
 0x14e   : > { %v3454_v7 = vpop.f32.mrf.mxu0  ;;  %v3530_v38 = vpop.f32.mrf.mxu1  ;;  %4027 = vmatmul.mubr.f32.gmra.mxu1 %v5402_v44 }
 0x14f   : > { %v3455_v5 = vadd.f32 %v3454_v7, %v3453_v33  ;;  %v5698_v34 = vadd.f32 %v3529_v20, %v1144_v29  ;;  %4029 = vmatprep.mubr.f32.mxu1 %v5408_v13 }
 0x150   : > { %v3456_v35 = vpop.f32.mrf.mxu0  ;;  %4001 = vmatmul.mubr.f32.gmra.mxu0 %v5452_v48  ;;  %v3531_v25 = vpop.f32.mrf.mxu1 }
 0x151   : > { %v1162_v21 = vadd.f32 %v3455_v5, %v5569_v36  ;;  %v3532_v16 = vadd.f32 %v3531_v25, %v3530_v38  ;;  %4003 = vmatprep.mubr.f32.mxu0 %v5463_v32 }
 0x152   : > { %v3457_v0 = vpop.f32.mrf.mxu0  ;;  %v3533_v30 = vpop.f32.mrf.mxu1  ;;  %4030 = vmatmul.mubr.f32.gmra.mxu1 %v5427_v2 }
 0x153   : > { %v3458_v45 = vadd.f32 %v3457_v0, %v3456_v35  ;;  %v5705_v44 = vadd.f32 %v3532_v16, %v1153_v23  ;;  %4032 = vmatprep.mubr.f32.mxu1 %v5435_v28 }
 0x154   : > { %v3459_v1 = vpop.f32.mrf.mxu0  ;;  %4004 = vmatmul.mubr.f32.gmra.mxu0 %v5484_v54  ;;  %v3534_v13 = vpop.f32.mrf.mxu1 }
 0x155   : > { %v1171_v37 = vadd.f32 %v3458_v45, %v5575_v47  ;;  %v3535_v14 = vadd.f32 %v3534_v13, %v3533_v30  ;;  %4006 = vmatprep.mubr.f32.mxu0 %v5495_v4 }
 0x156   : > { %v3460_v36 = vpop.f32.mrf.mxu0  ;;  %v3536_v31 = vpop.f32.mrf.mxu1  ;;  %4033 = vmatmul.mubr.f32.gmra.mxu1 %v5452_v48 }
 0x157   : > { %v3461_v52 = vadd.f32 %v3460_v36, %v3459_v1  ;;  %v5712_v2 = vadd.f32 %v3535_v14, %v1162_v21  ;;  %4035 = vmatprep.mubr.f32.mxu1 %v5463_v32 }
 0x158   : > { %v3462_v40 = vpop.f32.mrf.mxu0  ;;  %4007 = vmatmul.mubr.f32.gmra.mxu0 %v5511_v39  ;;  %v3537_v28 = vpop.f32.mrf.mxu1 }
 0x159   : > { %v1180_v42 = vadd.f32 %v3461_v52, %v5583_v53  ;;  %v3538_v51 = vadd.f32 %v3537_v28, %v3536_v31 }
 0x15a   : > { %v3463_v47 = vpop.f32.mrf.mxu0  ;;  %v3539_v3 = vpop.f32.mrf.mxu1  ;;  %4036 = vmatmul.mubr.f32.gmra.mxu1 %v5484_v54 }
 0x15b   : > { %v3464_v27 = vadd.f32 %v3463_v47, %v3462_v40  ;;  %v5718_v41 = vadd.f32 %v3538_v51, %v1171_v37  ;;  %4038 = vmatprep.mubr.f32.mxu1 %v5495_v4 }
 0x15c   : > { %v3465_v48 = vpop.f32.mrf.mxu0  ;;  %v3540_v8 = vpop.f32.mrf.mxu1 }
 0x15d   : > { %v1189_v32 = vadd.f32 %v3464_v27, %v5595_v56  ;;  %v3541_v46 = vadd.f32 %v3540_v8, %v3539_v3 }
 0x15e   : > { %v3466_v63 = vpop.f32.mrf.mxu0  ;;  %v3542_v60 = vpop.f32.mrf.mxu1  ;;  %4039 = vmatmul.mubr.f32.gmra.mxu1 %v5511_v39 }
 0x15f   : > { %v3467_v53 = vadd.f32 %v3466_v63, %v3465_v48  ;;  %v5723_v55 = vadd.f32 %v3541_v46, %v1180_v42 }
 0x160   : > { %v3468_v61 = vpop.f32.mrf.mxu0  ;;  %v3543_v17 = vpop.f32.mrf.mxu1 }
 0x161   : > { %v1198_v54 = vadd.f32 %v3467_v53, %v5608_v59  ;;  %v3544_v24 = vadd.f32 %v3543_v17, %v3542_v60 }
 0x162   : > { %v3469_v22 = vpop.f32.mrf.mxu0  ;;  %v3545_v50 = vpop.f32.mrf.mxu1 }
 0x163   : > { %v3470_v4 = vadd.f32 %v3469_v22, %v3468_v61  ;;  %v5726_v29 = vadd.f32 %v3544_v24, %v1189_v32 }
 0x164   : > { %v3471_v26 = vpop.f32.mrf.mxu0  ;;  %v3546_v56 = vpop.f32.mrf.mxu1 }
 0x165   : > { %v1207_v58 = vadd.f32 %v3470_v4, %v5621_v10  ;;  %v3547_v49 = vadd.f32 %v3546_v56, %v3545_v50 }
 0x166   : > { %v3472_v9 = vpop.f32.mrf.mxu0  ;;  %v3548_v39 = vpop.f32.mrf.mxu1 }
 0x167   : > { %v3473_v33 = vadd.f32 %v3472_v9, %v3471_v26  ;;  %v5729_v57 = vadd.f32 %v3547_v49, %v1198_v54 }
 0x168   : > { %v3474_v23 = vpop.f32.mrf.mxu0  ;;  %v3549_v20 = vpop.f32.mrf.mxu1 }
 0x169   : > { %v1216_v59 = vadd.f32 %v3473_v33, %v5631_v43  ;;  %v3550_v7 = vadd.f32 %v3549_v20, %v3548_v39 }
 0x16a   : > { %v3475_v38 = vpop.f32.mrf.mxu0  ;;  %v3551_v5 = vpop.f32.mrf.mxu1 }
 0x16b   : > { %v3476_v35 = vadd.f32 %v3475_v38, %v3474_v23  ;;  %v5732_v25 = vadd.f32 %v3550_v7, %v1207_v58 }
 0x16c   : > { %v3477_v21 = vpop.f32.mrf.mxu0  ;;  %v3552_v16 = vpop.f32.mrf.mxu1 }
 0x16d   : > { %v1225_v10 = vadd.f32 %v3476_v35, %v5640_v62  ;;  %v3553_v0 = vadd.f32 %v3552_v16, %v3551_v5 }
 0x16e   : > { %v3478_v30 = vpop.f32.mrf.mxu0  ;;  %v3554_v45 = vpop.f32.mrf.mxu1 }
 0x16f   : > { %v3479_v1 = vadd.f32 %v3478_v30, %v3477_v21  ;;  %v5735_v13 = vadd.f32 %v3553_v0, %v1216_v59 }
 0x170   : > { %v3480_v37 = vpop.f32.mrf.mxu0  ;;  %v3555_v14 = vpop.f32.mrf.mxu1 }
 0x171   : > { %v1234_v43 = vadd.f32 %v3479_v1, %v5649_v19  ;;  %v3556_v36 = vadd.f32 %v3555_v14, %v3554_v45 }
 0x172   : > { %v3481_v31 = vpop.f32.mrf.mxu0  ;;  %v3557_v52 = vpop.f32.mrf.mxu1 }
 0x173   : > { %v3482_v40 = vadd.f32 %v3481_v31, %v3480_v37  ;;  %v5738_v28 = vadd.f32 %v3556_v36, %v1225_v10 }
 0x174   : > { %v3483_v42 = vpop.f32.mrf.mxu0  ;;  %v3558_v51 = vpop.f32.mrf.mxu1 }
 0x175   : > { %v1243_v62 = vadd.f32 %v3482_v40, %v5658_v11  ;;  %v3559_v47 = vadd.f32 %v3558_v51, %v3557_v52 }
 0x176   : > { %v3484_v3 = vpop.f32.mrf.mxu0  ;;  %v3560_v27 = vpop.f32.mrf.mxu1 }
 0x177   : > { %v3485_v48 = vadd.f32 %v3484_v3, %v3483_v42  ;;  %v5741_v8 = vadd.f32 %v3559_v47, %v1234_v43 }
 0x178   : > { %v3486_v32 = vpop.f32.mrf.mxu0  ;;  %v3561_v46 = vpop.f32.mrf.mxu1 }
 0x179   : > { %v1252_v19 = vadd.f32 %v3485_v48, %v5669_v15  ;;  %v3562_v63 = vadd.f32 %v3561_v46, %v3560_v27 }
 0x17a   : > { %v3487_v60 = vpop.f32.mrf.mxu0  ;;  %v3563_v53 = vpop.f32.mrf.mxu1 }
 0x17b   : > { %v3488_v61 = vadd.f32 %v3487_v60, %v3486_v32  ;;  %v5744_v17 = vadd.f32 %v3562_v63, %v1243_v62 }
 0x17c   : > { %v3601_v54 = vpop.f32.mrf.mxu0  ;;  %v3564_v24 = vpop.f32.mrf.mxu1 }
 0x17d   : > { %v1261_v11 = vadd.f32 %v3488_v61, %v5677_v12  ;;  %v3565_v22 = vadd.f32 %v3564_v24, %v3563_v53 }
 0x17e   : > { %v3602_v50 = vpop.f32.mrf.mxu0  ;;  %v3566_v4 = vpop.f32.mrf.mxu1 }
 0x17f   : > { %v5747_v26 = vadd.f32 %v3565_v22, %v1252_v19  ;;  %v3603_v56 = vadd.f32 %v3602_v50, %v3601_v54 }
 0x180   : > { %v3604_v58 = vpop.f32.mrf.mxu0  ;;  %v3567_v49 = vpop.f32.mrf.mxu1 }
 0x181   : > { %v1702_v15 = vadd.f32 %v3603_v56, %v5684_v6  ;;  %v3568_v9 = vadd.f32 %v3567_v49, %v3566_v4 }
 0x182   : > { %v3605_v39 = vpop.f32.mrf.mxu0  ;;  %v3681_v33 = vpop.f32.mrf.mxu1 }
 0x183   : > { %v5750_v23 = vadd.f32 %v3568_v9, %v1261_v11  ;;  %v3606_v20 = vadd.f32 %v3605_v39, %v3604_v58 }
 0x184   : > { %v3607_v59 = vpop.f32.mrf.mxu0  ;;  %v3682_v7 = vpop.f32.mrf.mxu1 }
 0x185   : > { %v1709_v12 = vadd.f32 %v3606_v20, %v5691_v18  ;;  %v3683_v38 = vadd.f32 %v3682_v7, %v3681_v33 }
 0x186   : > { %v3608_v5 = vpop.f32.mrf.mxu0  ;;  %v3684_v35 = vpop.f32.mrf.mxu1 }
 0x187   : > { %v3609_v21 = vadd.f32 %v3608_v5, %v3607_v59  ;;  %v5753_v16 = vadd.f32 %v3683_v38, %v1702_v15 }
 0x188   : > { %v3610_v10 = vpop.f32.mrf.mxu0  ;;  %v3685_v0 = vpop.f32.mrf.mxu1 }
 0x189   : > { %v1716_v6 = vadd.f32 %v3609_v21, %v5698_v34  ;;  %v3686_v30 = vadd.f32 %v3685_v0, %v3684_v35 }
 0x18a   : > { %v3611_v45 = vpop.f32.mrf.mxu0  ;;  %v3687_v1 = vpop.f32.mrf.mxu1 }
 0x18b   : > { %v3612_v37 = vadd.f32 %v3611_v45, %v3610_v10  ;;  %v5756_v14 = vadd.f32 %v3686_v30, %v1709_v12 }
 0x18c   : > { %v3613_v43 = vpop.f32.mrf.mxu0  ;;  %v3688_v36 = vpop.f32.mrf.mxu1 }
 0x18d   : > { %v1723_v18 = vadd.f32 %v3612_v37, %v5705_v44  ;;  %v3689_v31 = vadd.f32 %v3688_v36, %v3687_v1 }
 0x18e   : > { %v3614_v52 = vpop.f32.mrf.mxu0  ;;  %v3690_v40 = vpop.f32.mrf.mxu1 }
 0x18f   : > { %v3615_v42 = vadd.f32 %v3614_v52, %v3613_v43  ;;  %v5759_v51 = vadd.f32 %v3689_v31, %v1716_v6 }
 0x190   : > { %v3616_v62 = vpop.f32.mrf.mxu0  ;;  %v3691_v47 = vpop.f32.mrf.mxu1 }
 0x191   : > { %v1730_v34 = vadd.f32 %v3615_v42, %v5712_v2  ;;  %v3692_v3 = vadd.f32 %v3691_v47, %v3690_v40 }
 0x192   : > { %v3617_v27 = vpop.f32.mrf.mxu0  ;;  %v3693_v48 = vpop.f32.mrf.mxu1 }
 0x193   : > { %v3618_v32 = vadd.f32 %v3617_v27, %v3616_v62  ;;  %v5762_v46 = vadd.f32 %v3692_v3, %v1723_v18 }
 0x194   : > { %v3619_v19 = vpop.f32.mrf.mxu0  ;;  %v3694_v63 = vpop.f32.mrf.mxu1 }
 0x195   : > { %v1737_v44 = vadd.f32 %v3618_v32, %v5718_v41  ;;  %v3695_v60 = vadd.f32 %v3694_v63, %v3693_v48 }
 0x196   : > { %v3620_v53 = vpop.f32.mrf.mxu0  ;;  %v3696_v61 = vpop.f32.mrf.mxu1 }
 0x197   : > { %v3621_v54 = vadd.f32 %v3620_v53, %v3619_v19  ;;  %v5765_v24 = vadd.f32 %v3695_v60, %v1730_v34 }
 0x198   : > { %v3622_v11 = vpop.f32.mrf.mxu0  ;;  %v3697_v22 = vpop.f32.mrf.mxu1 }
 0x199   : > { %v1744_v2 = vadd.f32 %v3621_v54, %v5723_v55  ;;  %v3698_v50 = vadd.f32 %v3697_v22, %v3696_v61 }
 0x19a   : > { %v3623_v4 = vpop.f32.mrf.mxu0  ;;  %v3699_v56 = vpop.f32.mrf.mxu1 }
 0x19b   : > { %v3624_v58 = vadd.f32 %v3623_v4, %v3622_v11  ;;  %v5768_v49 = vadd.f32 %v3698_v50, %v1737_v44 }
 0x19c   : > { %v3625_v15 = vpop.f32.mrf.mxu0  ;;  %v3700_v9 = vpop.f32.mrf.mxu1 }
 0x19d   : > { %v1751_v41 = vadd.f32 %v3624_v58, %v5726_v29  ;;  %v3701_v39 = vadd.f32 %v3700_v9, %v3699_v56 }
 0x19e   : > { %v3626_v33 = vpop.f32.mrf.mxu0  ;;  %v3702_v20 = vpop.f32.mrf.mxu1 }
 0x19f   : > { %v3627_v59 = vadd.f32 %v3626_v33, %v3625_v15  ;;  %v5771_v7 = vadd.f32 %v3701_v39, %v1744_v2 }
 0x1a0   : > { %v3628_v12 = vpop.f32.mrf.mxu0  ;;  %v3703_v38 = vpop.f32.mrf.mxu1 }
 0x1a1   : > { %v1758_v55 = vadd.f32 %v3627_v59, %v5729_v57  ;;  %v3704_v5 = vadd.f32 %v3703_v38, %v3702_v20 }
 0x1a2   : > { %v3629_v35 = vpop.f32.mrf.mxu0  ;;  %v3705_v21 = vpop.f32.mrf.mxu1 }
 0x1a3   : > { %v3630_v10 = vadd.f32 %v3629_v35, %v3628_v12  ;;  %v5774_v0 = vadd.f32 %v3704_v5, %v1751_v41 }
 0x1a4   : > { %v3631_v6 = vpop.f32.mrf.mxu0  ;;  %v3706_v30 = vpop.f32.mrf.mxu1 }
 0x1a5   : > { %v1765_v29 = vadd.f32 %v3630_v10, %v5732_v25  ;;  %v3707_v45 = vadd.f32 %v3706_v30, %v3705_v21 }
 0x1a6   : > { %v3632_v1 = vpop.f32.mrf.mxu0  ;;  %v3708_v37 = vpop.f32.mrf.mxu1 }
 0x1a7   : > { %v3633_v43 = vadd.f32 %v3632_v1, %v3631_v6  ;;  %v5777_v36 = vadd.f32 %v3707_v45, %v1758_v55 }
 0x1a8   : > { %v3634_v18 = vpop.f32.mrf.mxu0  ;;  %v3709_v31 = vpop.f32.mrf.mxu1 }
 0x1a9   : > { %v1772_v57 = vadd.f32 %v3633_v43, %v5735_v13  ;;  %v3710_v52 = vadd.f32 %v3709_v31, %v3708_v37 }
 0x1aa   : > { %v3635_v40 = vpop.f32.mrf.mxu0  ;;  %v3711_v42 = vpop.f32.mrf.mxu1 }
 0x1ab   : > { %v3636_v62 = vadd.f32 %v3635_v40, %v3634_v18  ;;  %v5780_v47 = vadd.f32 %v3710_v52, %v1765_v29 }
 0x1ac   : > { %v3637_v34 = vpop.f32.mrf.mxu0  ;;  %v3712_v3 = vpop.f32.mrf.mxu1 }
 0x1ad   : > { %v1779_v25 = vadd.f32 %v3636_v62, %v5738_v28  ;;  %v3713_v27 = vadd.f32 %v3712_v3, %v3711_v42 }
 0x1ae   : > { %v3638_v48 = vpop.f32.mrf.mxu0  ;;  %v3714_v32 = vpop.f32.mrf.mxu1 }
 0x1af   : > { %v3639_v19 = vadd.f32 %v3638_v48, %v3637_v34  ;;  %v5783_v63 = vadd.f32 %v3713_v27, %v1772_v57 }
 0x1b0   : > { %v3640_v44 = vpop.f32.mrf.mxu0  ;;  %v3715_v60 = vpop.f32.mrf.mxu1 }
 0x1b1   : > { %v1786_v13 = vadd.f32 %v3639_v19, %v5741_v8  ;;  %v3716_v53 = vadd.f32 %v3715_v60, %v3714_v32 }
 0x1b2   : > { %v3641_v61 = vpop.f32.mrf.mxu0  ;;  %v3717_v54 = vpop.f32.mrf.mxu1 }
 0x1b3   : > { %v3642_v11 = vadd.f32 %v3641_v61, %v3640_v44  ;;  %v5786_v22 = vadd.f32 %v3716_v53, %v1779_v25 }
 0x1b4   : > { %v3643_v2 = vpop.f32.mrf.mxu0  ;;  %v3718_v50 = vpop.f32.mrf.mxu1 }
 0x1b5   : > { %v1793_v28 = vadd.f32 %v3642_v11, %v5744_v17  ;;  %v3719_v4 = vadd.f32 %v3718_v50, %v3717_v54 }
 0x1b6   : > { %v3644_v56 = vpop.f32.mrf.mxu0  ;;  %v3720_v58 = vpop.f32.mrf.mxu1 }
 0x1b7   : > { %v3645_v15 = vadd.f32 %v3644_v56, %v3643_v2  ;;  %v5789_v9 = vadd.f32 %v3719_v4, %v1786_v13 }
 0x1b8   : > { %v3646_v41 = vpop.f32.mrf.mxu0  ;;  %v3721_v39 = vpop.f32.mrf.mxu1 }
 0x1b9   : > { %6534 = vst [vmem:[#allocation21_spill] sm:$0xff] %v5789_v9  ;;  %v1800_v8 = vadd.f32 %v3645_v15, %v5747_v26  ;;  %v3722_v33 = vadd.f32 %v3721_v39, %v3720_v58 }
 0x1ba   : > { %v3647_v20 = vpop.f32.mrf.mxu0  ;;  %v3723_v59 = vpop.f32.mrf.mxu1 }
 0x1bb   : > { %v3648_v12 = vadd.f32 %v3647_v20, %v3646_v41  ;;  %v5792_v38 = vadd.f32 %v3722_v33, %v1793_v28 }
 0x1bc   : > { %v5794_v55 = vpop.f32.mrf.mxu0  ;;  %v3724_v5 = vpop.f32.mrf.mxu1 }
 0x1bd   : > { %6535 = vst [vmem:[#allocation22_spill] sm:$0xff] %v5792_v38  ;;  %v1807_v17 = vadd.f32 %v3648_v12, %v5750_v23  ;;  %v3725_v35 = vadd.f32 %v3724_v5, %v3723_v59 }
 0x1be   : > { %v5797_v21 = vpop.f32.mrf.mxu0  ;;  %v3726_v10 = vpop.f32.mrf.mxu1 }
 0x1bf   : > { %v5799_v6 = vadd.f32 %v3725_v35, %v1800_v8 }
 0x1c0   : > { %v5801_v30 = vpop.f32.mrf.mxu0  ;;  %v3727_v26 = vpop.f32.mrf.mxu1 }
 0x1c1   : > { %6536 = vst [vmem:[#allocation36_spill] sm:$0xff] %v5799_v6  ;;  %v3728_v29 = vadd.f32 %v3727_v26, %v3726_v10 }
 0x1c2   : > { %v5803_v45 = vpop.f32.mrf.mxu0  ;;  %v3891_v1 = vpop.f32.mrf.mxu1 }
 0x1c3   : > { %v5805_v37 = vadd.f32 %v3728_v29, %v1807_v17 }
 0x1c4   : > { %v5807_v43 = vpop.f32.mrf.mxu0  ;;  %v2335_v18 = vpop.f32.mrf.mxu1 }
 0x1c5   : > { %6537 = vst [vmem:[#allocation24_spill] sm:$0xff] %v5805_v37 }
 0x1c6   : > { %v5809_v31 = vpop.f32.mrf.mxu0  ;;  %v5811_v23 = vpop.f32.mrf.mxu1 }
 0x1c8   : > { %v5813_v57 = vpop.f32.mrf.mxu0  ;;  %v5815_v52 = vpop.f32.mrf.mxu1 }
 0x1ca   : > { %v5817_v40 = vpop.f32.mrf.mxu0  ;;  %v5819_v42 = vpop.f32.mrf.mxu1 }
 0x1cc   : > { %v5821_v62 = vpop.f32.mrf.mxu0  ;;  %v5823_v34 = vpop.f32.mrf.mxu1 }
 0x1ce   : > { %v5825_v3 = vpop.f32.mrf.mxu0  ;;  %v5827_v25 = vpop.f32.mrf.mxu1 }
 0x1d0   : > { %v5829_v27 = vpop.f32.mrf.mxu0  ;;  %v5831_v48 = vpop.f32.mrf.mxu1 }
 0x1d2   : > { %v5833_v32 = vpop.f32.mrf.mxu0  ;;  %v5835_v19 = vpop.f32.mrf.mxu1 }
 0x1d4   : > { %v5837_v44 = vpop.f32.mrf.mxu0  ;;  %v5839_v60 = vpop.f32.mrf.mxu1 }
 0x1d5   : > { %6538 = vst [vmem:[#allocation26_spill] sm:$0xff] %v5837_v44 }
 0x1d6   : > { %v5841_v13 = vpop.f32.mrf.mxu0  ;;  %v5843_v53 = vpop.f32.mrf.mxu1 }
 0x1d7   : > { %6539 = vst [vmem:[#allocation37_spill] sm:$0xff] %v5841_v13 }
 0x1d8   : > { %v5845_v61 = vpop.f32.mrf.mxu0  ;;  %v5847_v54 = vpop.f32.mrf.mxu1 }
 0x1d9   : > { %6540 = vst [vmem:[#allocation28_spill] sm:$0xff] %v5845_v61  ;;  %6541 = vst [vmem:[#allocation42_spill] sm:$0xff] %v5847_v54 }
 0x1da   : > { %v5849_v11 = vpop.f32.mrf.mxu0  ;;  %v5851_v2 = vpop.f32.mrf.mxu1 }
 0x1db   : > { %6542 = vst [vmem:[#allocation44_spill] sm:$0xff] %v5849_v11  ;;  %6543 = vst [vmem:[#allocation31_spill] sm:$0xff] %v5851_v2 }
 0x1dc   : > { %v3923_v50 = vpop.f32.mrf.mxu0  ;;  %v5853_v28 = vpop.f32.mrf.mxu1 }
 0x1dd   : > { %6544 = vst [vmem:[#allocation32_spill] sm:$0xff] %v5853_v28 }
 0x1de   : > { %v2505_v4 = vpop.f32.mrf.mxu0  ;;  %v5855_v56 = vpop.f32.mrf.mxu1 }
 0x1df   : > { %6545 = vst [vmem:[#allocation34_spill] sm:$0xff] %v5855_v56 }
 0x1e0   : > { %v3926_v58 = vpop.f32.mrf.mxu0  ;;  %v5857_v15 = vpop.f32.mrf.mxu1 }
 0x1e1   : > { %6546 = vst [vmem:[#allocation3_spill] sm:$0xff] %v5857_v15 }
 0x1e2   : > { %v2519_v41 = vpop.f32.mrf.mxu0  ;;  %v3955_v39 = vpop.f32.mrf.mxu1 }
 0x1e4   : > { %v3929_v8 = vpop.f32.mrf.mxu0  ;;  %v2687_v33 = vpop.f32.mrf.mxu1 }
 0x1e6   : > { %v5859_v20 = vpop.f32.mrf.mxu0  ;;  %v3958_v59 = vpop.f32.mrf.mxu1 }
 0x1e8   : > { %v5861_v12 = vpop.f32.mrf.mxu0  ;;  %v2703_v5 = vpop.f32.mrf.mxu1 }
 0x1ea   : > { %v5863_v17 = vpop.f32.mrf.mxu0  ;;  %v3961_v35 = vpop.f32.mrf.mxu1 }
 0x1ec   : > { %v5865_v10 = vpop.f32.mrf.mxu0  ;;  %v5867_v26 = vpop.f32.mrf.mxu1 }
 0x1ee   : > { %v5869_v29 = vpop.f32.mrf.mxu0  ;;  %v5871_v15 = vpop.f32.mrf.mxu1 }
 0x1ef   : > { %6547 = vst [vmem:[#allocation38_spill] sm:$0xff] %v5869_v29 }
 0x1f0   : > { %v5873_v56 = vpop.f32.mrf.mxu0  ;;  %v5875_v11 = vpop.f32.mrf.mxu1 }
 0x1f1   : > { %6548 = vst [vmem:[#allocation40_spill] sm:$0xff] %v5873_v56  ;;  %v2105_v56 = vadd.f32 %v5794_v55, %v5756_v14  ;;  %v2115_v14 = vadd.f32 %v5803_v45, %v5759_v51 }
 0x1f2   : > { %v5877_v6 = vpop.f32.mrf.mxu0  ;;  %v5879_v28 = vpop.f32.mrf.mxu1 }
 0x1f3   : > { %6549 = vst [vmem:[#allocation4_spill] sm:$0xff] %v5877_v6  ;;  %6550 = vst [vmem:[#allocation5_spill] sm:$0xff] %v5879_v28  ;;  %v2342_v38 = vadd.f32 %v3891_v1, %v2105_v56 }
 0x1f4   : > { %v5881_v61 = vpop.f32.mrf.mxu0  ;;  %v5883_v37 = vpop.f32.mrf.mxu1 }
 0x1f5   : > { %6551 = vst [vmem:[#allocation6_spill] sm:$0xff] %v5881_v61  ;;  %6552 = vst [vmem:[#allocation43_spill] sm:$0xff] %v5883_v37  ;;  %v2095_v61 = vadd.f32 %v5797_v21, %v5753_v16  ;;  %v2145_v21 = vadd.f32 %v5807_v43, %v5768_v49  ;;  %v2165_v43 = vadd.f32 %v5813_v57, %v5774_v0 }
 0x1f6   : > { %v5885_v2 = vpop.f32.mrf.mxu0  ;;  %v5887_v13 = vpop.f32.mrf.mxu1 }
 0x1f7   : > { %6553 = vst [vmem:[#allocation7_spill] sm:$0xff] %v5885_v2  ;;  %6554 = vst [vmem:[#allocation9_spill] sm:$0xff] %v5887_v13  ;;  %v2125_v2 = vadd.f32 %v5801_v30, %v5762_v46  ;;  %v2348_v46 = vadd.f32 %v5815_v52, %v2115_v14  ;;  %v2366_v51 = vadd.f32 %v5819_v42, %v2145_v21 }
 0x1f8   : > { %v5889_v9 = vpop.f32.mrf.mxu0  ;;  %v5891_v54 = vpop.f32.mrf.mxu1  ;;  %v2378_v0 = vadd.f32 %v5827_v25, %v2165_v43  ;;  %v6561_v43 = vld [vmem:[#allocation26_spill] sm:$0xff] }
 0x1f9   : > { %6555 = vst [vmem:[#allocation11_spill] sm:$0xff] %v5889_v9  ;;  %6556 = vst [vmem:[#allocation48_spill] sm:$0xff] %v5891_v54  ;;  %v2336_v9 = vadd.f32 %v2335_v18, %v2095_v61  ;;  %v2513_v54 = vadd.f32 %v3923_v50, %v2342_v38  ;;  %v2354_v55 = vadd.f32 %v5811_v23, %v2125_v2 }
 0x1fa   : > { %v5895_v44 = vpop.f32.mrf.mxu0  ;;  %v5897_v6 = vpop.f32.mrf.mxu1  ;;  %v2135_v61 = vadd.f32 %v5809_v31, %v5765_v24  ;;  %v2520_v23 = vadd.f32 %v2519_v41, %v2348_v46  ;;  %v2541_v50 = vadd.f32 %v3929_v8, %v2366_v51  ;;  %v2195_v51 = vadd.f32 %v5833_v32, %v5783_v63  ;;  %v6563_v63 = vld [vmem:[#allocation40_spill] sm:$0xff] }
 0x1fb   : > { %6557 = vst [vmem:[#allocation2_spill] sm:$0xff] %v5895_v44  ;;  %v2506_v44 = vadd.f32 %v2505_v4, %v2336_v9  ;;  %v2696_v16 = vadd.f32 %v3955_v39, %v2513_v54  ;;  %v2527_v30 = vadd.f32 %v3926_v58, %v2354_v55 }
 0x1fc   : > { %v3987_v37 = vpop.f32.mrf.mxu0  ;;  %v5901_v28 = vpop.f32.mrf.mxu1  ;;  %v2360_v52 = vadd.f32 %v5823_v34, %v2135_v61  ;;  %v2728_v41 = vadd.f32 %v3961_v35, %v2541_v50  ;;  %v6562_v50 = vld [vmem:[#allocation42_spill] sm:$0xff] }
 0x1fd   : > { %v2688_v38 = vadd.f32 %v2687_v33, %v2506_v44  ;;  %v2897_v18 = vadd.f32 %v3987_v37, %v2696_v16  ;;  %v2712_v54 = vadd.f32 %v3958_v59, %v2527_v30  ;;  %v2704_v37 = vadd.f32 %v2703_v5, %v2520_v23 }
 0x1fe   : > { %v2890_v13 = vpop.f32.mrf.mxu0  ;;  %v5905_v29 = vpop.f32.mrf.mxu1  ;;  %v2534_v57 = vadd.f32 %v5859_v20, %v2360_v52  ;;  %v2185_v59 = vadd.f32 %v5821_v62, %v5780_v47  ;;  %v2175_v16 = vadd.f32 %v5825_v3, %v5777_v36  ;;  %v2205_v30 = vadd.f32 %v5829_v27, %v5786_v22  ;;  %v6558_v22 = vld [vmem:[#allocation38_spill] sm:$0xff] }
 0x1ff   : > { %v2891_v2 = vadd.f32 %v2890_v13, %v2688_v38  ;;  %v2155_v13 = vadd.f32 %v5817_v40, %v5771_v7  ;;  %v2555_v7 = vadd.f32 %v5861_v12, %v2378_v0  ;;  %v6565_v0 = vld [vmem:[#allocation21_spill] sm:$0xff] }
 0x200   : > { %v3990_v1 = vpop.f32.mrf.mxu0  ;;  %v5912_v56 = vpop.f32.mrf.mxu1  ;;  %v2720_v20 = vadd.f32 %v5867_v26, %v2534_v57  ;;  %v2390_v21 = vadd.f32 %v5835_v19, %v2185_v59  ;;  %v2384_v38 = vadd.f32 %v5839_v60, %v2175_v16  ;;  %v6566_v57 = vld [vmem:[#allocation37_spill] sm:$0xff]  ;;  %v6572_v16 = vld [vmem:[#allocation32_spill] sm:$0xff] }
 0x201   : > { %v2909_v31 = vadd.f32 %v3990_v1, %v2712_v54  ;;  %v2372_v5 = vadd.f32 %v5831_v48, %v2155_v13  ;;  %v2744_v12 = vadd.f32 %v5871_v15, %v2555_v7 }
 0x202   : > { %v2902_v45 = vpop.f32.mrf.mxu0  ;;  %v4019_v9 = vpop.f32.mrf.mxu1  ;;  %v2569_v36 = vadd.f32 %v5865_v10, %v2390_v21  ;;  %v2562_v27 = vadd.f32 %v6558_v22, %v2384_v38  ;;  %v6559_v10 = vld [vmem:[#allocation5_spill] sm:$0xff] }
 0x203   : > { %v3062_v49 = vadd.f32 %v4019_v9, %v2897_v18  ;;  %v2903_v39 = vadd.f32 %v2902_v45, %v2704_v37  ;;  %v2548_v47 = vadd.f32 %v5863_v17, %v2372_v5  ;;  %v2402_v45 = vadd.f32 %v5843_v53, %v2205_v30  ;;  %v6564_v37 = vld [vmem:[#allocation43_spill] sm:$0xff]  ;;  %v6569_v5 = vld [vmem:[#allocation9_spill] sm:$0xff] }
 0x204   : > { %v3993_v44 = vpop.f32.mrf.mxu0  ;;  %v3055_v24 = vpop.f32.mrf.mxu1  ;;  %v2760_v23 = vadd.f32 %v6559_v10, %v2569_v36  ;;  %v6575_v36 = vld [vmem:[#allocation36_spill] sm:$0xff]  ;;  %v6579_v10 = vld [vmem:[#allocation3_spill] sm:$0xff] }
 0x205   : > { %v3150_v42 = vmax.f32 %v3062_v49, 0.0  ;;  %v3056_v4 = vadd.f32 %v3055_v24, %v2891_v2  ;;  %v2921_v14 = vadd.f32 %v3993_v44, %v2728_v41  ;;  %v2736_v17 = vadd.f32 %v5875_v11, %v2548_v47  ;;  %v6560_v49 = vld [vmem:[#allocation22_spill] sm:$0xff] }
 0x206   : > { %v2914_v34 = vpop.f32.mrf.mxu0  ;;  %v4022_v58 = vpop.f32.mrf.mxu1  ;;  %v2225_v52 = vadd.f32 %v6561_v43, %v6560_v49  ;;  %v2396_v44 = vadd.f32 %v6562_v50, %v2195_v51  ;;  %v2583_v32 = vadd.f32 %v6563_v63, %v2402_v45  ;;  %v6573_v47 = vld [vmem:[#allocation6_spill] sm:$0xff] }
 0x207   : > { %3166 = vst.msk [vmem:[%s5925_s19 + $0x8] sm:$0xff] %vm268_vm0, %v3150_v42  ;;  %v3149_v8 = vmax.f32 %v3056_v4, 0.0  ;;  %v3074_v33 = vadd.f32 %v4022_v58, %v2909_v31  ;;  %v2915_v1 = vadd.f32 %v2914_v34, %v2720_v20  ;;  %v2752_v31 = vadd.f32 %v6564_v37, %v2562_v27  ;;  %v6567_v58 = vld [vmem:[#allocation31_spill] sm:$0xff] }
 0x208   : > { %v3996_v40 = vpop.f32.mrf.mxu0  ;;  %v3067_v25 = vpop.f32.mrf.mxu1  ;;  %v2215_v34 = vadd.f32 %v6566_v57, %v6565_v0  ;;  %v2414_v41 = vadd.f32 %v6567_v58, %v2225_v52  ;;  %v2776_v7 = vadd.f32 %v6569_v5, %v2583_v32 }
 0x209   : > { %3165 = vst.msk [vmem:[%s5925_s19] sm:$0xff] %vm268_vm0, %v3149_v8  ;;  %v3152_v35 = vmax.f32 %v3074_v33, 0.0  ;;  %v3068_v55 = vadd.f32 %v3067_v25, %v2903_v39  ;;  %v2933_v18 = vadd.f32 %v3996_v40, %v2744_v12  ;;  %v6568_v39 = vld [vmem:[#allocation4_spill] sm:$0xff] }
 0x20a   : > { %v2926_v62 = vpop.f32.mrf.mxu0  ;;  %v4025_v48 = vpop.f32.mrf.mxu1  ;;  %v2576_v8 = vadd.f32 %v6568_v39, %v2396_v44  ;;  %v2408_v21 = vadd.f32 %v6572_v16, %v2215_v34  ;;  %v6581_v44 = vld [vmem:[#allocation2_spill] sm:$0xff] }
 0x20b   : > { %3168 = vst.msk [vmem:[%s5925_s19 + $0x18] sm:$0xff] %vm268_vm0, %v3152_v35  ;;  %v3151_v26 = vmax.f32 %v3068_v55, 0.0  ;;  %v3086_v46 = vadd.f32 %v4025_v48, %v2921_v14  ;;  %v2927_v54 = vadd.f32 %v2926_v62, %v2736_v17  ;;  %v6570_v14 = vld [vmem:[#allocation24_spill] sm:$0xff]  ;;  %v2597_v62 = vadd.f32 %v6573_v47, %v2414_v41  ;;  %v6577_v17 = vld [vmem:[#allocation34_spill] sm:$0xff] }
 0x20c   : > { %v3999_v3 = vpop.f32.mrf.mxu0  ;;  %v3079_v19 = vpop.f32.mrf.mxu1  ;;  %v6571_v35 = vld [vmem:[#allocation28_spill] sm:$0xff] }
 0x20d   : > { %3167 = vst.msk [vmem:[%s5925_s19 + $0x10] sm:$0xff] %vm268_vm0, %v3151_v26  ;;  %v3154_v15 = vmax.f32 %v3086_v46, 0.0  ;;  %v3080_v61 = vadd.f32 %v3079_v19, %v2915_v1  ;;  %v2945_v42 = vadd.f32 %v3999_v3, %v2760_v23  ;;  %v2245_v55 = vadd.f32 %v6571_v35, %v6570_v14  ;;  %v6574_v1 = vld [vmem:[#allocation48_spill] sm:$0xff] }
 0x20e   : > { %v2938_v60 = vpop.f32.mrf.mxu0  ;;  %v4028_v9 = vpop.f32.mrf.mxu1  ;;  %v2768_v26 = vadd.f32 %v6574_v1, %v2576_v8  ;;  %v6576_v3 = vld [vmem:[#allocation44_spill] sm:$0xff]  ;;  %v2792_v22 = vadd.f32 %v5897_v6, %v2597_v62 }
 0x20f   : > { %3170 = vst.msk [vmem:[%s5925_s19 + $0x28] sm:$0xff] %vm268_vm0, %v3154_v15  ;;  %v3153_v11 = vmax.f32 %v3080_v61, 0.0  ;;  %v3098_v2 = vadd.f32 %v4028_v9, %v2933_v18  ;;  %v2939_v40 = vadd.f32 %v2938_v60, %v2752_v31  ;;  %v2235_v19 = vadd.f32 %v6576_v3, %v6575_v36  ;;  %v6578_v15 = vld [vmem:[#allocation7_spill] sm:$0xff] }
 0x210   : > { %v4002_v53 = vpop.f32.mrf.mxu0  ;;  %v3091_v24 = vpop.f32.mrf.mxu1  ;;  %v2426_v18 = vadd.f32 %v6577_v17, %v2245_v55  ;;  %v2590_v61 = vadd.f32 %v6578_v15, %v2408_v21 }
 0x211   : > { %3169 = vst.msk [vmem:[%s5925_s19 + $0x20] sm:$0xff] %vm268_vm0, %v3153_v11  ;;  %v3156_v4 = vmax.f32 %v3098_v2, 0.0  ;;  %v3092_v13 = vadd.f32 %v3091_v24, %v2927_v54  ;;  %v2957_v46 = vadd.f32 %v4002_v53, %v2776_v7  ;;  %v2420_v23 = vadd.f32 %v6579_v10, %v2235_v19  ;;  %v6580_v54 = vld [vmem:[#allocation11_spill] sm:$0xff] }
 0x212   : > { %v2950_v33 = vpop.f32.mrf.mxu0  ;;  %v4031_v59 = vpop.f32.mrf.mxu1  ;;  %v2611_v11 = vadd.f32 %v6580_v54, %v2426_v18  ;;  %v2784_v43 = vadd.f32 %v5901_v28, %v2590_v61 }
 0x213   : > { %3172 = vst.msk [vmem:[%s5925_s19 + $0x38] sm:$0xff] %vm268_vm0, %v3156_v4  ;;  %v3155_v25 = vmax.f32 %v3092_v13, 0.0  ;;  %v3110_v20 = vadd.f32 %v4031_v59, %v2945_v42  ;;  %v2951_v27 = vadd.f32 %v2950_v33, %v2768_v26  ;;  %v2604_v63 = vadd.f32 %v6581_v44, %v2420_v23 }
 0x214   : > { %v4005_v48 = vpop.f32.mrf.mxu0  ;;  %v3103_v12 = vpop.f32.mrf.mxu1  ;;  %v2808_v53 = vadd.f32 %v5905_v29, %v2611_v11 }
 0x215   : > { %3171 = vst.msk [vmem:[%s5925_s19 + $0x30] sm:$0xff] %vm268_vm0, %v3155_v25  ;;  %v3158_v30 = vmax.f32 %v3110_v20, 0.0  ;;  %v3104_v38 = vadd.f32 %v3103_v12, %v2939_v40  ;;  %v2969_v52 = vadd.f32 %v4005_v48, %v2792_v22  ;;  %v2800_v4 = vadd.f32 %v5912_v56, %v2604_v63 }
 0x216   : > { %v2962_v51 = vpop.f32.mrf.mxu0  ;;  %v4034_v45 = vpop.f32.mrf.mxu1 }
 0x217   : > { %3174 = vst.msk [vmem:[%s5925_s19 + $0x48] sm:$0xff] %vm268_vm0, %v3158_v30  ;;  %v3157_v60 = vmax.f32 %v3104_v38, 0.0  ;;  %v3122_v9 = vadd.f32 %v4034_v45, %v2957_v46  ;;  %v2963_v24 = vadd.f32 %v2962_v51, %v2784_v43 }
 0x218   : > { %v4008_v2 = vpop.f32.mrf.mxu0  ;;  %v3115_v49 = vpop.f32.mrf.mxu1 }
 0x219   : > { %3173 = vst.msk [vmem:[%s5925_s19 + $0x40] sm:$0xff] %vm268_vm0, %v3157_v60  ;;  %v3160_v50 = vmax.f32 %v3122_v9, 0.0  ;;  %v3116_v6 = vadd.f32 %v3115_v49, %v2951_v27  ;;  %v2981_v13 = vadd.f32 %v4008_v2, %v2808_v53 }
 0x21a   : > { %v4037_v32 = vpop.f32.mrf.mxu1  ;;  %v2974_v42 = vpop.f32.mrf.mxu0 }
 0x21b   : > { %3176 = vst.msk [vmem:[%s5925_s19 + $0x58] sm:$0xff] %vm268_vm0, %v3160_v50  ;;  %v3159_v37 = vmax.f32 %v3116_v6, 0.0  ;;  %v3134_v31 = vadd.f32 %v4037_v32, %v2969_v52  ;;  %v2975_v58 = vadd.f32 %v2974_v42, %v2800_v4 }
 0x21c   : > { %v3127_v28 = vpop.f32.mrf.mxu1 }
 0x21d   : > { %3175 = vst.msk [vmem:[%s5925_s19 + $0x50] sm:$0xff] %vm268_vm0, %v3159_v37  ;;  %v3162_v0 = vmax.f32 %v3134_v31, 0.0  ;;  %v3128_v57 = vadd.f32 %v3127_v28, %v2963_v24 }
 0x21e   : > { %v4040_v34 = vpop.f32.mrf.mxu1 }
 0x21f   : > { %3178 = vst.msk [vmem:[%s5925_s19 + $0x68] sm:$0xff] %vm268_vm0, %v3162_v0  ;;  %v3161_v29 = vmax.f32 %v3128_v57, 0.0  ;;  %v3146_v41 = vadd.f32 %v4040_v34, %v2981_v13 }
 0x220   : > { %v3139_v39 = vpop.f32.mrf.mxu1 }
 0x221   : > { %3177 = vst.msk [vmem:[%s5925_s19 + $0x60] sm:$0xff] %vm268_vm0, %v3161_v29  ;;  %v3164_v8 = vmax.f32 %v3146_v41, 0.0  ;;  %v3140_v33 = vadd.f32 %v3139_v39, %v2975_v58 }
 0x223   : > { %3180 = vst.msk [vmem:[%s5925_s19 + $0x78] sm:$0xff] %vm268_vm0, %v3164_v8  ;;  %v3163_v56 = vmax.f32 %v3140_v33, 0.0 }
 0x225   : > { %3179 = vst.msk [vmem:[%s5925_s19 + $0x70] sm:$0xff] %vm268_vm0, %v3163_v56 }
 0x226 PF: > { %s13_s12 = sadd.s32 1, %s4056_s12  }
 0x227   : > { %p10_p4 = scmp.ge.s32.totalorder %s13_s12, 4  }
 0x229   :  { %12 = sbr.rel (!%p10_p4) target bundleno = 1 (0x1), region = 62 }

// kernel: se_bottleneck_forward.7
= control target key start
LH: loop header
LB: loop body
LE: loop exit
PB: predicated region body
PF: predicated region fallthrough
CT: control target
= control target key end

     0   :  { %s2001_s15 = smov 0   ;;  %s2578_s0 = inlined_call_operand.vmem [shape: f32[4,64,128], index: 0, kind: input, shape index: {}, may-alias: {0,4}]   ;;  %s2579_s1 = inlined_call_operand.vmem [shape: f32[4,64,128], index: 1, kind: input, shape index: {}]   ;;  %s2580_s2 = inlined_call_operand.vmem [shape: f32[128,8], index: 2, kind: input, shape index: {}]   ;;  %s2581_s3 = inlined_call_operand.vmem [shape: f32[8,128], index: 3, kind: input, shape index: {}]   ;;  %s2582_s4 = inlined_call_operand.vmem [shape: f32[4,64,128], index: 4, kind: output, shape index: {}, may-alias: {0,4}]  }
   0x1 LB: > { %s1576_s16 = sadd.s32 4294967295, %s1971_s15   ;;  %p1580_p0 = scmp.ge.s32.totalorder %s1971_s15, 1  ;;  %s1971_s15 = sphi %s2001_s15, %s14_s15  }
   0x2   : > { %p176_p1 = scmp.lt.s32.totalorder %s1971_s15, 3 }
   0x4   : > { %p177_p2 = pnand %p1580_p0, %p176_p1 }
   0x6   : > { %180 = sbr.rel (%p177_p2) target bundleno = 602 (0x25a), region = 36 }
   0xb   : > { %v288_v0 = vld [vmem:[%s2580_s2 + $0x78] sm:$0xff]  ;;  %v287_v1 = vld [vmem:[%s2580_s2 + $0x70] sm:$0xff]  ;;  %v286_v2 = vld [vmem:[%s2580_s2 + $0x68] sm:$0xff]  ;;  %s2018_s23 = sshll.u32 %s1576_s16, 1  ;;  %v1973_v3 = vmov 0.0   ;;  %vm1974_vm0 = vmmov 0  }
   0xc   : > { %1710 = vmatprep.subr.mxu0 %v1973_v3  ;;  %1745 = vmatprep.subr.mxu1 %v1973_v3  ;;  %v2022_v4 = vand.u32 4294901760, %v288_v0  ;;  %v2024_v5 = vand.u32 4294901760, %v287_v1  ;;  %v2026_v6 = vand.u32 4294901760, %v286_v2  ;;  %v285_v7 = vld [vmem:[%s2580_s2 + $0x60] sm:$0xff]  ;;  %v284_v8 = vld [vmem:[%s2580_s2 + $0x58] sm:$0xff]  ;;  %v283_v9 = vld [vmem:[%s2580_s2 + $0x50] sm:$0xff] }
   0xd   : > { %v2037_v10 = vand.u32 4294901760, %v285_v7  ;;  %v2039_v11 = vand.u32 4294901760, %v284_v8  ;;  %v2041_v12 = vand.u32 4294901760, %v283_v9  ;;  %v282_v13 = vld [vmem:[%s2580_s2 + $0x48] sm:$0xff]  ;;  %v281_v14 = vld [vmem:[%s2580_s2 + $0x40] sm:$0xff]  ;;  %1742 = vmatprep.mubr.msk.f32.mxu0 %vm1974_vm0, %v1973_v3  ;;  %1777 = vmatprep.mubr.msk.f32.mxu1 %vm1974_vm0, %v1973_v3  ;;  %p211_p3 = scmp.lt.s32.totalorder %s2018_s23, 3 }
   0xe   : > { %1711 = vmatpush3.msra.mxu0 %v2022_v4  ;;  %v2055_v15 = vsub.f32 %v288_v0, %v2022_v4  ;;  %v2058_v16 = vsub.f32 %v287_v1, %v2024_v5  ;;  %v2061_v17 = vsub.f32 %v286_v2, %v2026_v6  ;;  %v2063_v18 = vand.u32 4294901760, %v282_v13  ;;  %v280_v34 = vld [vmem:[%s2580_s2 + $0x38] sm:$0xff]  ;;  %v279_v35 = vld [vmem:[%s2580_s2 + $0x30] sm:$0xff]  ;;  %v278_v36 = vld [vmem:[%s2580_s2 + $0x28] sm:$0xff] }
   0xf   : > { %1712 = vmatprep.subr.mxu0 %v1973_v3  ;;  %v2068_v19 = vsub.f32 %v285_v7, %v2037_v10  ;;  %v2071_v20 = vsub.f32 %v284_v8, %v2039_v11  ;;  %v2074_v21 = vsub.f32 %v283_v9, %v2041_v12  ;;  %v2076_v22 = vand.u32 4294901760, %v281_v14  ;;  %s2622_s23 = smov (!%p211_p3, %s2018_s23), 3  ;;  %v277_v42 = vld [vmem:[%s2580_s2 + $0x20] sm:$0xff]  ;;  %v276_v47 = vld [vmem:[%s2580_s2 + $0x18] sm:$0xff]  ;;  %v275_v54 = vld [vmem:[%s2580_s2 + $0x10] sm:$0xff] }
  0x10   : > { %v2597_v23 = vand.u32 4294901760, %v2055_v15  ;;  %1713 = vmatpush3.msra.mxu0 %v2024_v5  ;;  %v2596_v24 = vand.u32 4294901760, %v2058_v16  ;;  %v2594_v25 = vand.u32 4294901760, %v2061_v17  ;;  %v2086_v28 = vsub.f32 %v282_v13, %v2063_v18  ;;  %s2137_s19 = sshll.u32 %s2622_s23, 6  ;;  %v274_v60 = vld [vmem:[%s2580_s2 + $0x8] sm:$0xff]  ;;  %v273_v2 = vld [vmem:[%s2580_s2] sm:$0xff] }
  0x11   : > { %1714 = vmatprep.subr.mxu0 %v1973_v3  ;;  %v2592_v26 = vand.u32 4294901760, %v2068_v19  ;;  %v2591_v27 = vand.u32 4294901760, %v2071_v20  ;;  %v2589_v32 = vand.u32 4294901760, %v2074_v21  ;;  %v2104_v33 = vsub.f32 %v281_v14, %v2076_v22  ;;  %s2165_s24 = scalar_lea.vmem %s2578_s0, %s2137_s19  ;;  %s2519_s7 = scalar_lea.vmem %s2579_s1, %s2137_s19 }
  0x12   : > { %v389_v29 = vsub.f32 %v2055_v15, %v2597_v23  ;;  %v396_v30 = vsub.f32 %v2058_v16, %v2596_v24  ;;  %1715 = vmatpush3.msra.mxu0 %v2026_v6  ;;  %v403_v31 = vsub.f32 %v2061_v17, %v2594_v25  ;;  %v2587_v41 = vand.u32 4294901760, %v2086_v28  ;;  %v2194_v7 = vld [vmem:[%s2165_s24] sm:$0xff]  ;;  %v2204_v13 = vld [vmem:[%s2165_s24 + $0x8] sm:$0xff]  ;;  %s2557_s10 = scalar_lea.vmem %s2582_s4, %s2137_s19 }
  0x13   : > { %1716 = vmatprep.subr.mxu0 %v1973_v3  ;;  %v410_v39 = vsub.f32 %v2068_v19, %v2592_v26  ;;  %v417_v40 = vsub.f32 %v2071_v20, %v2591_v27  ;;  %v2128_v44 = vand.u32 4294901760, %v280_v34  ;;  %v2130_v45 = vand.u32 4294901760, %v279_v35  ;;  %v2207_v14 = vld [vmem:[%s2165_s24 + $0x40] sm:$0xff]  ;;  %v2308_v26 = vld [vmem:[%s2165_s24 + $0x38] sm:$0xff] }
  0x14   : > { %v390_v37 = vand.u32 4294901760, %v389_v29  ;;  %v397_v38 = vand.u32 4294901760, %v396_v30  ;;  %1717 = vmatpush3.msra.mxu0 %v2037_v10  ;;  %v404_v43 = vand.u32 4294901760, %v403_v31  ;;  %v2132_v46 = vand.u32 4294901760, %v278_v36  ;;  %v2210_v29 = vld [vmem:[%s2165_s24 + $0x48] sm:$0xff] }
  0x15   : > { %1718 = vmatprep.subr.mxu0 %v1973_v3  ;;  %v424_v48 = vsub.f32 %v2074_v21, %v2589_v32  ;;  %v2586_v49 = vand.u32 4294901760, %v2104_v33  ;;  %v411_v50 = vand.u32 4294901760, %v410_v39  ;;  %v2147_v51 = vsub.f32 %v280_v34, %v2128_v44  ;;  %v2228_v39 = vld [vmem:[%s2165_s24 + $0x50] sm:$0xff] }
  0x16   : > { %1746 = vmatpush3.msra.mxu1 %v390_v37  ;;  %1719 = vmatpush3.msra.mxu0 %v2039_v11  ;;  %v2150_v52 = vsub.f32 %v279_v35, %v2130_v45  ;;  %v2152_v53 = vand.u32 4294901760, %v277_v42  ;;  %v2159_v55 = vand.u32 4294901760, %v276_v47  ;;  %v418_v56 = vand.u32 4294901760, %v417_v40  ;;  %v2299_v32 = vld [vmem:[%s2165_s24 + $0x70] sm:$0xff] }
  0x17   : > { %1747 = vmatprep.subr.mxu1 %v1973_v3  ;;  %1720 = vmatprep.subr.mxu0 %v1973_v3  ;;  %v431_v57 = vsub.f32 %v2086_v28, %v2587_v41  ;;  %v2584_v58 = vand.u32 4294901760, %v2147_v51  ;;  %v2173_v59 = vsub.f32 %v278_v36, %v2132_v46  ;;  %v438_v61 = vsub.f32 %v2104_v33, %v2586_v49 }
  0x18   : > { %1748 = vmatpush3.msra.mxu1 %v397_v38  ;;  %1721 = vmatpush3.msra.mxu0 %v2041_v12  ;;  %v2183_v62 = vand.u32 4294901760, %v275_v54  ;;  %v425_v63 = vand.u32 4294901760, %v424_v48  ;;  %v2583_v0 = vand.u32 4294901760, %v2150_v52  ;;  %v2188_v1 = vsub.f32 %v277_v42, %v2152_v53  ;;  %v2225_v38 = vld [vmem:[%s2165_s24 + $0x10] sm:$0xff]  ;;  %2601 = vst [vmem:[#allocation2_spill] sm:$0xff] %v2299_v32 }
  0x19   : > { %1749 = vmatprep.subr.mxu1 %v1973_v3  ;;  %1722 = vmatprep.subr.mxu0 %v1973_v3  ;;  %v2199_v8 = vsub.f32 %v276_v47, %v2159_v55  ;;  %v2201_v9 = vand.u32 4294901760, %v274_v60  ;;  %v432_v30 = vand.u32 4294901760, %v431_v57  ;;  %v445_v31 = vsub.f32 %v2147_v51, %v2584_v58  ;;  %v2267_v58 = vld [vmem:[%s2165_s24 + $0x60] sm:$0xff] }
  0x1a   : > { %1750 = vmatpush3.msra.mxu1 %v404_v43  ;;  %1723 = vmatpush3.msra.mxu0 %v2063_v18  ;;  %v2585_v34 = vand.u32 4294901760, %v2173_v59  ;;  %v439_v35 = vand.u32 4294901760, %v438_v61  ;;  %v2220_v36 = vsub.f32 %v275_v54, %v2183_v62  ;;  %v2222_v37 = vand.u32 4294901760, %v273_v2  ;;  %v2246_v54 = vld [vmem:[%s2165_s24 + $0x18] sm:$0xff] }
  0x1b   : > { %1751 = vmatprep.subr.mxu1 %v1973_v3  ;;  %1724 = vmatprep.subr.mxu0 %v1973_v3  ;;  %v452_v40 = vsub.f32 %v2150_v52, %v2583_v0  ;;  %v2588_v42 = vand.u32 4294901760, %v2188_v1  ;;  %v247_v43 = vadd.f32 %v2204_v13, %v2194_v7  ;;  %v260_v47 = vadd.f32 %v2210_v29, %v2207_v14 }
  0x1c   : > { %1752 = vmatpush3.msra.mxu1 %v411_v50  ;;  %1725 = vmatpush3.msra.mxu0 %v2076_v22  ;;  %v2590_v48 = vand.u32 4294901760, %v2199_v8  ;;  %v2243_v50 = vsub.f32 %v274_v60, %v2201_v9  ;;  %v446_v57 = vand.u32 4294901760, %v445_v31  ;;  %v459_v61 = vsub.f32 %v2173_v59, %v2585_v34  ;;  %v2264_v31 = vld [vmem:[%s2165_s24 + $0x20] sm:$0xff] }
  0x1d   : > { %1753 = vmatprep.subr.mxu1 %v1973_v3  ;;  %1726 = vmatprep.subr.mxu0 %v1973_v3  ;;  %v261_v0 = vadd.f32 %v260_v47, %v2228_v39  ;;  %v2593_v60 = vand.u32 4294901760, %v2220_v36  ;;  %v453_v34 = vand.u32 4294901760, %v452_v40  ;;  %v2282_v40 = vld [vmem:[%s2165_s24 + $0x68] sm:$0xff]  ;;  %vm291_vm1 = vcmask 1041409  }
  0x1e   : > { %1754 = vmatpush3.msra.mxu1 %v418_v56  ;;  %1727 = vmatpush3.msra.mxu0 %v2128_v44  ;;  %v2249_v56 = vld [vmem:[%s2165_s24 + $0x58] sm:$0xff]  ;;  %v460_v41 = vand.u32 4294901760, %v459_v61  ;;  %v2296_v61 = vld [vmem:[%s2165_s24 + $0x30] sm:$0xff]  ;;  %vm937_vm2 = vcmask 64512  }
  0x1f   : > { %1755 = vmatprep.subr.mxu1 %v1973_v3  ;;  %1728 = vmatprep.subr.mxu0 %v1973_v3  ;;  %v262_v49 = vadd.f32 %v261_v0, %v2249_v56 }
  0x20   : > { %1756 = vmatpush3.msra.mxu1 %v425_v63  ;;  %1729 = vmatpush3.msra.mxu0 %v2130_v45  ;;  %v248_v63 = vadd.f32 %v247_v43, %v2225_v38  ;;  %v466_v43 = vsub.f32 %v2188_v1, %v2588_v42 }
  0x21   : > { %1757 = vmatprep.subr.mxu1 %v1973_v3  ;;  %1730 = vmatprep.subr.mxu0 %v1973_v3  ;;  %v263_v42 = vadd.f32 %v262_v49, %v2267_v58 }
  0x22   : > { %1758 = vmatpush3.msra.mxu1 %v432_v30  ;;  %1731 = vmatpush3.msra.mxu0 %v2132_v46  ;;  %v2261_v30 = vsub.f32 %v273_v2, %v2222_v37  ;;  %v249_v47 = vadd.f32 %v248_v63, %v2246_v54  ;;  %v2595_v2 = vand.u32 4294901760, %v2243_v50  ;;  %v473_v63 = vsub.f32 %v2199_v8, %v2590_v48 }
  0x23   : > { %1759 = vmatprep.subr.mxu1 %v1973_v3  ;;  %1732 = vmatprep.subr.mxu0 %v1973_v3  ;;  %v467_v48 = vand.u32 4294901760, %v466_v43  ;;  %v264_v27 = vadd.f32 %v263_v42, %v2282_v40 }
  0x24   : > { %1760 = vmatpush3.msra.mxu1 %v439_v35  ;;  %1733 = vmatpush3.msra.mxu0 %v2152_v53  ;;  %v2279_v35 = vld [vmem:[%s2165_s24 + $0x28] sm:$0xff]  ;;  %v250_v0 = vadd.f32 %v249_v47, %v2264_v31  ;;  %v2598_v47 = vand.u32 4294901760, %v2261_v30  ;;  %v474_v25 = vand.u32 4294901760, %v473_v63 }
  0x25   : > { %1761 = vmatprep.subr.mxu1 %v1973_v3  ;;  %1734 = vmatprep.subr.mxu0 %v1973_v3  ;;  %v265_v42 = vadd.f32 %v264_v27, %v2299_v32 }
  0x26   : > { %1762 = vmatpush3.msra.mxu1 %v446_v57  ;;  %1735 = vmatpush3.msra.mxu0 %v2159_v55  ;;  %v480_v57 = vsub.f32 %v2220_v36, %v2593_v60  ;;  %v251_v49 = vadd.f32 %v250_v0, %v2279_v35  ;;  %v2311_v60 = vld [vmem:[%s2165_s24 + $0x78] sm:$0xff] }
  0x27   : > { %1763 = vmatprep.subr.mxu1 %v1973_v3  ;;  %1736 = vmatprep.subr.mxu0 %v1973_v3  ;;  %2602 = vst [vmem:[#allocation3_spill] sm:$0xff] %v2311_v60 }
  0x28   : > { %1764 = vmatpush3.msra.mxu1 %v453_v34  ;;  %1737 = vmatpush3.msra.mxu0 %v2183_v62  ;;  %v487_v34 = vsub.f32 %v2243_v50, %v2595_v2  ;;  %v252_v43 = vadd.f32 %v251_v49, %v2296_v61  ;;  %v481_v0 = vand.u32 4294901760, %v480_v57  ;;  %v266_v2 = vadd.f32 %v265_v42, %v2311_v60 }
  0x29   : > { %1765 = vmatprep.subr.mxu1 %v1973_v3  ;;  %1738 = vmatprep.subr.mxu0 %v1973_v3 }
  0x2a   : > { %1766 = vmatpush3.msra.mxu1 %v460_v41  ;;  %1739 = vmatpush3.msra.mxu0 %v2201_v9  ;;  %v494_v41 = vsub.f32 %v2261_v30, %v2598_v47  ;;  %v253_v63 = vadd.f32 %v252_v43, %v2308_v26  ;;  %v488_v27 = vand.u32 4294901760, %v487_v34  ;;  %v267_v24 = vrot.slane %v266_v2, 4 }
  0x2b   : > { %1767 = vmatprep.subr.mxu1 %v1973_v3  ;;  %1740 = vmatprep.subr.mxu0 %v1973_v3 }
  0x2c   : > { %1768 = vmatpush3.msra.mxu1 %v467_v48  ;;  %1741 = vmatpush3.msra.mxu0 %v2222_v37  ;;  %v254_v49 = vrot.slane %v253_v63, 4  ;;  %v495_v48 = vand.u32 4294901760, %v494_v41  ;;  %v268_v23 = vadd.f32 %v267_v24, %v266_v2 }
  0x2d   : > { %1769 = vmatprep.subr.mxu1 %v1973_v3  ;;  %1780 = vmatprep.subr.mxu0 %v1973_v3 }
  0x2e   : > { %1770 = vmatpush3.msra.mxu1 %v474_v25  ;;  %v255_v57 = vadd.f32 %v254_v49, %v253_v63  ;;  %v269_v47 = vrot.slane %v268_v23, 2 }
  0x2f   : > { %1771 = vmatprep.subr.mxu1 %v1973_v3 }
  0x30   : > { %1772 = vmatpush3.msra.mxu1 %v481_v0  ;;  %v256_v43 = vrot.slane %v255_v57, 2  ;;  %v270_v60 = vadd.f32 %v269_v47, %v268_v23 }
  0x31   : > { %1773 = vmatprep.subr.mxu1 %v1973_v3 }
  0x32   : > { %1774 = vmatpush3.msra.mxu1 %v488_v27  ;;  %v257_v42 = vadd.f32 %v256_v43, %v255_v57  ;;  %v271_v34 = vrot.slane %v270_v60, 1 }
  0x33   : > { %1775 = vmatprep.subr.mxu1 %v1973_v3 }
  0x34   : > { %1776 = vmatpush3.msra.mxu1 %v495_v48  ;;  %v258_v25 = vrot.slane %v257_v42, 1  ;;  %v272_v0 = vadd.f32 %v271_v34, %v270_v60 }
  0x35   : > { %1815 = vmatprep.subr.mxu1 %v1973_v3 }
  0x36   : > { %v259_v32 = vadd.f32 %v258_v25, %v257_v42 }
  0x38   : > { %v292_v41 = vsel %vm291_vm1, %v272_v0, %v259_v32 }
  0x39   : > { %v2333_v63 = vand.u32 4294901760, %v292_v41 }
  0x3b   : > { %v2336_v24 = vsub.f32 %v292_v41, %v2333_v63  ;;  %1778 = vmatmul.mubr.f32.vlgmr.msra.gmra.mxu1 %v2333_v63 }
  0x3c   : > { %1816 = vmatpush3.msra.mxu1 %v2022_v4  ;;  %1847 = vmatprep.mubr.msk.f32.mxu1 %vm1974_vm0, %v1973_v3 }
  0x3d   : > { %v377_v23 = vand.u32 4294901760, %v2336_v24  ;;  %1817 = vmatprep.subr.mxu1 %v1973_v3 }
  0x3e   : > { %1818 = vmatpush3.msra.mxu1 %v2024_v5 }
  0x3f   : > { %v378_v32 = vsub.f32 %v2336_v24, %v377_v23  ;;  %1819 = vmatprep.subr.mxu1 %v1973_v3 }
  0x40   : > { %1820 = vmatpush3.msra.mxu1 %v2026_v6 }
  0x41   : > { %v379_v60 = vand.u32 4294901760, %v378_v32  ;;  %1821 = vmatprep.subr.mxu1 %v1973_v3 }
  0x42   : > { %1822 = vmatpush3.msra.mxu1 %v2037_v10 }
  0x43   : > { %1743 = vmatmul.mubr.f32.vlgmr.msra.gmra.mxu0 %v379_v60  ;;  %1823 = vmatprep.subr.mxu1 %v1973_v3 }
  0x44   : > { %1781 = vmatpush3.msra.mxu0 %v2055_v15  ;;  %1824 = vmatpush3.msra.mxu1 %v2039_v11 }
  0x45   : > { %1782 = vmatprep.subr.mxu0 %v1973_v3  ;;  %1825 = vmatprep.subr.mxu1 %v1973_v3 }
  0x46   : > { %1783 = vmatpush3.msra.mxu0 %v2058_v16  ;;  %1826 = vmatpush3.msra.mxu1 %v2041_v12 }
  0x47   : > { %1784 = vmatprep.subr.mxu0 %v1973_v3  ;;  %1827 = vmatprep.subr.mxu1 %v1973_v3 }
  0x48   : > { %1785 = vmatpush3.msra.mxu0 %v2061_v17  ;;  %1828 = vmatpush3.msra.mxu1 %v2063_v18 }
  0x49   : > { %1786 = vmatprep.subr.mxu0 %v1973_v3  ;;  %1829 = vmatprep.subr.mxu1 %v1973_v3 }
  0x4a   : > { %1787 = vmatpush3.msra.mxu0 %v2068_v19  ;;  %1830 = vmatpush3.msra.mxu1 %v2076_v22 }
  0x4b   : > { %1788 = vmatprep.subr.mxu0 %v1973_v3  ;;  %1831 = vmatprep.subr.mxu1 %v1973_v3 }
  0x4c   : > { %1789 = vmatpush3.msra.mxu0 %v2071_v20  ;;  %1832 = vmatpush3.msra.mxu1 %v2128_v44 }
  0x4d   : > { %1790 = vmatprep.subr.mxu0 %v1973_v3  ;;  %1833 = vmatprep.subr.mxu1 %v1973_v3 }
  0x4e   : > { %1791 = vmatpush3.msra.mxu0 %v2074_v21  ;;  %1834 = vmatpush3.msra.mxu1 %v2130_v45 }
  0x4f   : > { %1792 = vmatprep.subr.mxu0 %v1973_v3  ;;  %1835 = vmatprep.subr.mxu1 %v1973_v3 }
  0x50   : > { %1793 = vmatpush3.msra.mxu0 %v2086_v28  ;;  %1836 = vmatpush3.msra.mxu1 %v2132_v46 }
  0x51   : > { %1794 = vmatprep.subr.mxu0 %v1973_v3  ;;  %1837 = vmatprep.subr.mxu1 %v1973_v3 }
  0x52   : > { %1795 = vmatpush3.msra.mxu0 %v2104_v33  ;;  %1838 = vmatpush3.msra.mxu1 %v2152_v53 }
  0x53   : > { %1796 = vmatprep.subr.mxu0 %v1973_v3  ;;  %1839 = vmatprep.subr.mxu1 %v1973_v3 }
  0x54   : > { %1797 = vmatpush3.msra.mxu0 %v2147_v51  ;;  %1840 = vmatpush3.msra.mxu1 %v2159_v55 }
  0x55   : > { %1798 = vmatprep.subr.mxu0 %v1973_v3  ;;  %1841 = vmatprep.subr.mxu1 %v1973_v3 }
  0x56   : > { %1799 = vmatpush3.msra.mxu0 %v2150_v52  ;;  %1842 = vmatpush3.msra.mxu1 %v2183_v62 }
  0x57   : > { %1800 = vmatprep.subr.mxu0 %v1973_v3  ;;  %1843 = vmatprep.subr.mxu1 %v1973_v3 }
  0x58   : > { %1801 = vmatpush3.msra.mxu0 %v2173_v59  ;;  %1844 = vmatpush3.msra.mxu1 %v2201_v9 }
  0x59   : > { %1802 = vmatprep.subr.mxu0 %v1973_v3  ;;  %1845 = vmatprep.subr.mxu1 %v1973_v3 }
  0x5a   : > { %1803 = vmatpush3.msra.mxu0 %v2188_v1  ;;  %1812 = vmatprep.mubr.msk.f32.mxu0 %vm1974_vm0, %v1973_v3 }
  0x5b   : > { %1804 = vmatprep.subr.mxu0 %v1973_v3  ;;  %1846 = vmatpush3.msra.mxu1 %v2222_v37 }
  0x5c   : > { %1805 = vmatpush3.msra.mxu0 %v2199_v8  ;;  %1885 = vmatprep.subr.mxu1 %v1973_v3 }
  0x5d   : > { %1806 = vmatprep.subr.mxu0 %v1973_v3  ;;  %1848 = vmatmul.mubr.f32.vlgmr.msra.gmra.mxu1 %v377_v23 }
  0x5e   : > { %1807 = vmatpush3.msra.mxu0 %v2220_v36  ;;  %1886 = vmatpush3.msra.mxu1 %v2022_v4  ;;  %v2603_v4 = vand.u32 4294901760, %v2055_v15  ;;  %v2609_v15 = vand.u32 4294901760, %v2086_v28  ;;  %v2617_v28 = vand.u32 4294901760, %v2243_v50 }
  0x5f   : > { %1808 = vmatprep.subr.mxu0 %v1973_v3  ;;  %1887 = vmatprep.subr.mxu1 %v1973_v3 }
  0x60   : > { %1809 = vmatpush3.msra.mxu0 %v2243_v50  ;;  %1888 = vmatpush3.msra.mxu1 %v2024_v5  ;;  %v2604_v5 = vand.u32 4294901760, %v2058_v16  ;;  %v2610_v16 = vand.u32 4294901760, %v2104_v33  ;;  %v2618_v33 = vand.u32 4294901760, %v2261_v30 }
  0x61   : > { %1810 = vmatprep.subr.mxu0 %v1973_v3  ;;  %1889 = vmatprep.subr.mxu1 %v1973_v3 }
  0x62   : > { %1811 = vmatpush3.msra.mxu0 %v2261_v30  ;;  %1890 = vmatpush3.msra.mxu1 %v2026_v6  ;;  %v2605_v6 = vand.u32 4294901760, %v2061_v17  ;;  %v2611_v17 = vand.u32 4294901760, %v2147_v51 }
  0x63   : > { %1813 = vmatmul.mubr.f32.vlgmr.msra.gmra.mxu0 %v2336_v24  ;;  %1850 = vmatprep.subr.mxu0 %v1973_v3 }
  0x64   : > { %1851 = vmatpush3.msra.mxu0 %v2603_v4  ;;  %1891 = vmatprep.subr.mxu1 %v1973_v3 }
  0x65   : > { %1852 = vmatprep.subr.mxu0 %v1973_v3  ;;  %1892 = vmatpush3.msra.mxu1 %v2037_v10  ;;  %v2606_v10 = vand.u32 4294901760, %v2068_v19  ;;  %v2613_v19 = vand.u32 4294901760, %v2173_v59 }
  0x66   : > { %1853 = vmatpush3.msra.mxu0 %v2604_v5  ;;  %1893 = vmatprep.subr.mxu1 %v1973_v3 }
  0x67   : > { %1854 = vmatprep.subr.mxu0 %v1973_v3  ;;  %1894 = vmatpush3.msra.mxu1 %v2039_v11  ;;  %v2607_v11 = vand.u32 4294901760, %v2071_v20  ;;  %v2614_v20 = vand.u32 4294901760, %v2188_v1 }
  0x68   : > { %1855 = vmatpush3.msra.mxu0 %v2605_v6  ;;  %1895 = vmatprep.subr.mxu1 %v1973_v3 }
  0x69   : > { %1856 = vmatprep.subr.mxu0 %v1973_v3  ;;  %1896 = vmatpush3.msra.mxu1 %v2041_v12  ;;  %v2608_v12 = vand.u32 4294901760, %v2074_v21  ;;  %v2615_v21 = vand.u32 4294901760, %v2199_v8 }
  0x6a   : > { %1857 = vmatpush3.msra.mxu0 %v2606_v10  ;;  %1897 = vmatprep.subr.mxu1 %v1973_v3 }
  0x6b   : > { %1858 = vmatprep.subr.mxu0 %v1973_v3  ;;  %1898 = vmatpush3.msra.mxu1 %v2063_v18  ;;  %v2612_v18 = vand.u32 4294901760, %v2150_v52 }
  0x6c   : > { %1859 = vmatpush3.msra.mxu0 %v2607_v11  ;;  %1899 = vmatprep.subr.mxu1 %v1973_v3 }
  0x6d   : > { %1860 = vmatprep.subr.mxu0 %v1973_v3  ;;  %1900 = vmatpush3.msra.mxu1 %v2076_v22  ;;  %v2616_v22 = vand.u32 4294901760, %v2220_v36 }
  0x6e   : > { %1861 = vmatpush3.msra.mxu0 %v2608_v12  ;;  %1901 = vmatprep.subr.mxu1 %v1973_v3 }
  0x6f   : > { %1862 = vmatprep.subr.mxu0 %v1973_v3  ;;  %1902 = vmatpush3.msra.mxu1 %v2128_v44  ;;  %v936_v44 = vld [vmem:[%s2581_s3] sm:$0xff] }
  0x70   : > { %1863 = vmatpush3.msra.mxu0 %v2609_v15  ;;  %1903 = vmatprep.subr.mxu1 %v1973_v3 }
  0x71   : > { %1864 = vmatprep.subr.mxu0 %v1973_v3  ;;  %1904 = vmatpush3.msra.mxu1 %v2130_v45  ;;  %v972_v45 = vand.u32 4294901760, %v936_v44 }
  0x72   : > { %1865 = vmatpush3.msra.mxu0 %v2610_v16  ;;  %1905 = vmatprep.subr.mxu1 %v1973_v3 }
  0x73   : > { %1866 = vmatprep.subr.mxu0 %v1973_v3  ;;  %1906 = vmatpush3.msra.mxu1 %v2132_v46  ;;  %v1049_v46 = vsub.f32 %v936_v44, %v972_v45  ;;  %v1975_v44 = vmov 1966171168  }
  0x74   : > { %1867 = vmatpush3.msra.mxu0 %v2611_v17  ;;  %1907 = vmatprep.subr.mxu1 %v1973_v3 }
  0x75   : > { %1868 = vmatprep.subr.mxu0 %v1973_v3  ;;  %1908 = vmatpush3.msra.mxu1 %v2152_v53  ;;  %v1050_v51 = vand.u32 4294901760, %v1049_v46 }
  0x76   : > { %1869 = vmatpush3.msra.mxu0 %v2612_v18  ;;  %1909 = vmatprep.subr.mxu1 %v1973_v3 }
  0x77   : > { %1870 = vmatprep.subr.mxu0 %v1973_v3  ;;  %1910 = vmatpush3.msra.mxu1 %v2159_v55  ;;  %v1051_v52 = vsub.f32 %v1049_v46, %v1050_v51 }
  0x78   : > { %1871 = vmatpush3.msra.mxu0 %v2613_v19  ;;  %1911 = vmatprep.subr.mxu1 %v1973_v3 }
  0x79   : > { %1872 = vmatprep.subr.mxu0 %v1973_v3  ;;  %1912 = vmatpush3.msra.mxu1 %v2183_v62  ;;  %v1052_v53 = vand.u32 4294901760, %v1051_v52 }
  0x7a   : > { %1873 = vmatpush3.msra.mxu0 %v2614_v20  ;;  %1913 = vmatprep.subr.mxu1 %v1973_v3 }
  0x7b   : > { %1874 = vmatprep.subr.mxu0 %v1973_v3  ;;  %1914 = vmatpush3.msra.mxu1 %v2201_v9 }
  0x7c   : > { %1875 = vmatpush3.msra.mxu0 %v2615_v21  ;;  %1915 = vmatprep.subr.mxu1 %v1973_v3 }
  0x7d   : > { %1876 = vmatprep.subr.mxu0 %v1973_v3  ;;  %1882 = vmatprep.mubr.msk.f32.mxu0 %vm1974_vm0, %v1973_v3 }
  0x7e   : > { %1877 = vmatpush3.msra.mxu0 %v2616_v22  ;;  %1916 = vmatpush3.msra.mxu1 %v2222_v37 }
  0x7f   : > { %1878 = vmatprep.subr.mxu0 %v1973_v3  ;;  %1917 = vmatprep.mubr.msk.f32.mxu1 %vm1974_vm0, %v1973_v3 }
  0x80   : > { %1879 = vmatpush3.msra.mxu0 %v2617_v28  ;;  %1918 = vmatmul.mubr.f32.vlgmr.msra.gmra.mxu1 %v2333_v63 }
  0x81   : > { %1880 = vmatprep.subr.mxu0 %v1973_v3  ;;  %1925 = vmatprep.subr.mxu1 %v1973_v3 }
  0x82   : > { %1881 = vmatpush3.msra.mxu0 %v2618_v33  ;;  %1927 = vmatprep.mubr.msk.f32.mxu1 %vm1974_vm0, %v1973_v3 }
  0x83   : > { %1883 = vmatmul.mubr.f32.vlgmr.msra.gmra.mxu0 %v2333_v63  ;;  %1920 = vmatprep.subr.mxu0 %v1973_v3 }
  0x84   : > { %1922 = vmatprep.mubr.msk.f32.mxu0 %vm1974_vm0, %v1973_v3  ;;  %1921 = vmatpush3.msra.mxu0 %v972_v45 }
  0x85   : > { %1930 = vmatprep.subr.mxu0 %v1973_v3  ;;  %1926 = vmatpush3.msra.mxu1 %v1052_v53 }
  0x86   : > { %1935 = vmatprep.subr.mxu1 %v1973_v3 }
  0xfb   : > { %v532_v55 = vpop.f32.mrf.mxu1 }
  0xfd   : > { %v1779_v59 = vpop.f32.mrf.mxu1 }
 0x103   : > { %v381_v62 = vpop.f32.mrf.mxu0 }
 0x104   : > { %v533_v50 = vadd.f32 %v532_v55, %v381_v62 }
 0x105   : > { %v1744_v1 = vpop.f32.mrf.mxu0 }
 0x11d   : > { %v725_v8 = vpop.f32.mrf.mxu1 }
 0x11f   : > { %v1849_v9 = vpop.f32.mrf.mxu1 }
 0x123   : > { %v636_v36 = vpop.f32.mrf.mxu0 }
 0x124   : > { %v637_v30 = vadd.f32 %v636_v36, %v533_v50 }
 0x125   : > { %v1814_v37 = vpop.f32.mrf.mxu0 }
 0x126   : > { %v726_v47 = vadd.f32 %v725_v8, %v637_v30 }
 0x140   : > { %v931_v2 = vpop.f32.mrf.mxu1 }
 0x142   : > { %v1919_v27 = vpop.f32.mrf.mxu1 }
 0x143   : > { %v844_v49 = vpop.f32.mrf.mxu0  ;;  %v1443_v27 = vld [vmem:[%s2519_s7 + $0x8] sm:$0xff] }
 0x144   : > { %v845_v48 = vadd.f32 %v844_v49, %v726_v47  ;;  %v1442_v47 = vld [vmem:[%s2519_s7] sm:$0xff]  ;;  %v1444_v49 = vld [vmem:[%s2519_s7 + $0x10] sm:$0xff] }
 0x145   : > { %v1884_v57 = vpop.f32.mrf.mxu0 }
 0x146   : > { %v932_v43 = vadd.f32 %v931_v2, %v845_v48 }
 0x148   : > { %v935_v42 = vmax.f32 %v932_v43, 0.0 }
 0x14a   : > { %v939_v25 = vsel %vm937_vm2, %v935_v42, 0 }
 0x14b   : > { %v1007_v34 = vand.u32 4294901760, %v939_v25 }
 0x14d   : > { %v1008_v0 = vsub.f32 %v939_v25, %v1007_v34  ;;  %1928 = vmatmul.mubr.f32.vlgmr.msra.gmra.mxu1 %v1007_v34  ;;  %v1447_v25 = vld [vmem:[%s2519_s7 + $0x28] sm:$0xff] }
 0x14e   : > { %1936 = vmatpush3.msra.mxu1 %v972_v45  ;;  %1937 = vmatprep.mubr.msk.f32.mxu1 %vm1974_vm0, %v1973_v3 }
 0x14f   : > { %v1009_v41 = vand.u32 4294901760, %v1008_v0  ;;  %1945 = vmatprep.subr.mxu1 %v1973_v3 }
 0x151   : > { %1938 = vmatmul.mubr.f32.vlgmr.msra.gmra.mxu1 %v1009_v41  ;;  %v1010_v63 = vsub.f32 %v1008_v0, %v1009_v41 }
 0x152   : > { %1946 = vmatpush3.msra.mxu1 %v972_v45  ;;  %1947 = vmatprep.mubr.msk.f32.mxu1 %vm1974_vm0, %v1973_v3  ;;  %v1395_v45 = vunpack.c.l.s4 %v1975_v44 }
 0x153   : > { %v1011_v24 = vand.u32 4294901760, %v1010_v63 }
 0x155   : > { %1923 = vmatmul.mubr.f32.vlgmr.msra.gmra.mxu0 %v1011_v24  ;;  %1948 = vmatmul.mubr.f32.vlgmr.msra.gmra.mxu1 %v1007_v34 }
 0x156   : > { %1931 = vmatpush3.msra.mxu0 %v1049_v46  ;;  %1932 = vmatprep.mubr.msk.f32.mxu0 %vm1974_vm0, %v1973_v3  ;;  %v1397_v46 = vlaneseq }
 0x157   : > { %1940 = vmatprep.subr.mxu0 %v1973_v3 }
 0x158   : > { %v1398_v52 = vshrl.u32 %v1397_v46, 7 }
 0x159   : > { %1933 = vmatmul.mubr.f32.vlgmr.msra.gmra.mxu0 %v1008_v0  ;;  %v1449_v0 = vld [vmem:[%s2519_s7 + $0x38] sm:$0xff] }
 0x15a   : > { %1941 = vmatpush3.msra.mxu0 %v1050_v51  ;;  %1942 = vmatprep.mubr.msk.f32.mxu0 %vm1974_vm0, %v1973_v3  ;;  %v1396_v51 = vunpack.c.0.s8 %v1395_v45  ;;  %v1418_v62 = vsub.s32 0, %v1398_v52 }
 0x15c   : > { %v1399_v53 = vsub.s32 %v1396_v51, %v1398_v52 }
 0x15d   : > { %1943 = vmatmul.mubr.f32.vlgmr.msra.gmra.mxu0 %v1007_v34 }
 0x20d   : > { %v1089_v23 = vpop.f32.mrf.mxu1 }
 0x20f   : > { %v1929_v32 = vpop.f32.mrf.mxu1 }
 0x210   : > { %v1451_v32 = vld [vmem:[%s2519_s7 + $0x48] sm:$0xff] }
 0x211   : > { %v1237_v60 = vpop.f32.mrf.mxu1 }
 0x213   : > { %v1939_v4 = vpop.f32.mrf.mxu1 }
 0x214   : > { %v2620_v4 = vld [vmem:[#allocation3_spill] sm:$0xff] }
 0x215   : > { %v1013_v5 = vpop.f32.mrf.mxu0  ;;  %v1383_v6 = vpop.f32.mrf.mxu1 }
 0x216   : > { %v1090_v12 = vadd.f32 %v1089_v23, %v1013_v5  ;;  %v2619_v23 = vld [vmem:[#allocation2_spill] sm:$0xff] }
 0x217   : > { %v1924_v10 = vpop.f32.mrf.mxu0  ;;  %v1949_v11 = vpop.f32.mrf.mxu1 }
 0x219   : > { %v1163_v15 = vpop.f32.mrf.mxu0 }
 0x21a   : > { %v1164_v16 = vadd.f32 %v1163_v15, %v1090_v12  ;;  %v1457_v15 = vld [vmem:[%s2519_s7 + $0x78] sm:$0xff] }
 0x21b   : > { %v1934_v17 = vpop.f32.mrf.mxu0 }
 0x21c   : > { %v1238_v18 = vadd.f32 %v1237_v60, %v1164_v16  ;;  %v1452_v60 = vld [vmem:[%s2519_s7 + $0x50] sm:$0xff] }
 0x21d   : > { %v1311_v19 = vpop.f32.mrf.mxu0 }
 0x21e   : > { %v1312_v20 = vadd.f32 %v1311_v19, %v1238_v18 }
 0x21f   : > { %v1944_v21 = vpop.f32.mrf.mxu0 }
 0x220   : > { %v1384_v22 = vadd.f32 %v1383_v6, %v1312_v20  ;;  %v1456_v6 = vld [vmem:[%s2519_s7 + $0x70] sm:$0xff] }
 0x222   : > { %v1590_v28 = vmul.f32 -1.442695, %v1384_v22 }
 0x224   : > { %1961 = vpow2.f32 %v1590_v28 }
 0x231   : > { %v1962_v3 = vpop.eup %1961 }
 0x232   : > { %v1390_v33 = vadd.f32 1.0, %v1962_v3 }
 0x234   : > { %1963 = vrcp.f32 %v1390_v33 }
 0x241   : > { %v1964_v55 = vpop.eup %1963 }
 0x242   : > { %v1400_v59 = vrot.slane %v1964_v55, %v1399_v53 }
 0x244   : > { %v1401_v1 = vcombine.high %v1400_v59, %v1400_v59  ;;  %v1408_v8 = vrot.slane %v1400_v59, %v1399_v53 }
 0x246   : > { %v1415_v9 = vrot.slane %v1401_v1, %v1399_v53  ;;  %v1419_v36 = vrot.slane %v1408_v8, %v1418_v62 }
 0x248   : > { %v1423_v37 = vrot.slane %v1415_v9, %v1418_v62  ;;  %v1426_v50 = vmul.f32 %v1419_v36, %v2194_v7  ;;  %v1427_v30 = vmul.f32 %v1419_v36, %v2204_v13  ;;  %v1428_v2 = vmul.f32 %v1419_v36, %v2225_v38  ;;  %v1445_v7 = vld [vmem:[%s2519_s7 + $0x18] sm:$0xff]  ;;  %v1446_v13 = vld [vmem:[%s2519_s7 + $0x20] sm:$0xff] }
 0x249   : > { %v1429_v48 = vmul.f32 %v1419_v36, %v2246_v54  ;;  %v1430_v57 = vmul.f32 %v1419_v36, %v2264_v31  ;;  %v1431_v43 = vmul.f32 %v1419_v36, %v2279_v35  ;;  %v1432_v42 = vmul.f32 %v1419_v36, %v2296_v61  ;;  %v1448_v35 = vld [vmem:[%s2519_s7 + $0x30] sm:$0xff]  ;;  %v1450_v61 = vld [vmem:[%s2519_s7 + $0x40] sm:$0xff] }
 0x24a   : > { %v1433_v38 = vmul.f32 %v1419_v36, %v2308_v26  ;;  %v1434_v34 = vmul.f32 %v1423_v37, %v2207_v14  ;;  %v1435_v54 = vmul.f32 %v1423_v37, %v2210_v29  ;;  %v1436_v31 = vmul.f32 %v1423_v37, %v2228_v39  ;;  %v1453_v14 = vld [vmem:[%s2519_s7 + $0x58] sm:$0xff]  ;;  %v1454_v29 = vld [vmem:[%s2519_s7 + $0x60] sm:$0xff]  ;;  %v1455_v39 = vld [vmem:[%s2519_s7 + $0x68] sm:$0xff] }
 0x24b   : > { %v1437_v41 = vmul.f32 %v1423_v37, %v2249_v56  ;;  %v1438_v63 = vmul.f32 %v1423_v37, %v2267_v58  ;;  %v1439_v24 = vmul.f32 %v1423_v37, %v2282_v40  ;;  %v1440_v26 = vmul.f32 %v1423_v37, %v2619_v23 }
 0x24c   : > { %v1441_v5 = vmul.f32 %v1423_v37, %v2620_v4  ;;  %v1458_v10 = vadd.f32 %v1442_v47, %v1426_v50  ;;  %v1459_v11 = vadd.f32 %v1443_v27, %v1427_v30  ;;  %v1460_v12 = vadd.f32 %v1444_v49, %v1428_v2 }
 0x24d   : > { %v1461_v56 = vadd.f32 %v1445_v7, %v1429_v48  ;;  %v1462_v16 = vadd.f32 %v1446_v13, %v1430_v57  ;;  %v1463_v58 = vadd.f32 %v1447_v25, %v1431_v43  ;;  %v1464_v17 = vadd.f32 %v1448_v35, %v1432_v42 }
 0x24e   : > { %v1465_v40 = vadd.f32 %v1449_v0, %v1433_v38  ;;  %v1466_v18 = vadd.f32 %v1450_v61, %v1434_v34  ;;  %v1467_v19 = vadd.f32 %v1451_v32, %v1435_v54  ;;  %v1468_v20 = vadd.f32 %v1452_v60, %v1436_v31 }
 0x24f   : > { %v1469_v21 = vadd.f32 %v1453_v14, %v1437_v41  ;;  %v1470_v22 = vadd.f32 %v1454_v29, %v1438_v63  ;;  %v1471_v28 = vadd.f32 %v1455_v39, %v1439_v24  ;;  %v1472_v3 = vadd.f32 %v1456_v6, %v1440_v26 }
 0x250   : > { %v1473_v33 = vadd.f32 %v1457_v15, %v1441_v5  ;;  %v1474_v44 = vmax.f32 %v1458_v10, 0.0  ;;  %v1475_v45 = vmax.f32 %v1459_v11, 0.0  ;;  %v1476_v46 = vmax.f32 %v1460_v12, 0.0 }
 0x251   : > { %v1477_v51 = vmax.f32 %v1461_v56, 0.0  ;;  %v1478_v52 = vmax.f32 %v1462_v16, 0.0  ;;  %v1479_v53 = vmax.f32 %v1463_v58, 0.0  ;;  %v1480_v55 = vmax.f32 %v1464_v17, 0.0 }
 0x252   : > { %v1481_v59 = vmax.f32 %v1465_v40, 0.0  ;;  %v1482_v62 = vmax.f32 %v1466_v18, 0.0  ;;  %v1483_v1 = vmax.f32 %v1467_v19, 0.0  ;;  %v1484_v8 = vmax.f32 %v1468_v20, 0.0  ;;  %1490 = vst [vmem:[%s2557_s10] sm:$0xff] %v1474_v44  ;;  %1491 = vst [vmem:[%s2557_s10 + $0x8] sm:$0xff] %v1475_v45 }
 0x253   : > { %1492 = vst [vmem:[%s2557_s10 + $0x10] sm:$0xff] %v1476_v46  ;;  %v1485_v9 = vmax.f32 %v1469_v21, 0.0  ;;  %v1486_v36 = vmax.f32 %v1470_v22, 0.0  ;;  %v1487_v37 = vmax.f32 %v1471_v28, 0.0  ;;  %v1488_v50 = vmax.f32 %v1472_v3, 0.0  ;;  %1493 = vst [vmem:[%s2557_s10 + $0x18] sm:$0xff] %v1477_v51 }
 0x254   : > { %1494 = vst [vmem:[%s2557_s10 + $0x20] sm:$0xff] %v1478_v52  ;;  %1495 = vst [vmem:[%s2557_s10 + $0x28] sm:$0xff] %v1479_v53  ;;  %v1489_v30 = vmax.f32 %v1473_v33, 0.0 }
 0x255   : > { %1496 = vst [vmem:[%s2557_s10 + $0x30] sm:$0xff] %v1480_v55  ;;  %1497 = vst [vmem:[%s2557_s10 + $0x38] sm:$0xff] %v1481_v59 }
 0x256   : > { %1498 = vst [vmem:[%s2557_s10 + $0x40] sm:$0xff] %v1482_v62  ;;  %1499 = vst [vmem:[%s2557_s10 + $0x48] sm:$0xff] %v1483_v1 }
 0x257   : > { %1500 = vst [vmem:[%s2557_s10 + $0x50] sm:$0xff] %v1484_v8  ;;  %1501 = vst [vmem:[%s2557_s10 + $0x58] sm:$0xff] %v1485_v9 }
 0x258   : > { %1502 = vst [vmem:[%s2557_s10 + $0x60] sm:$0xff] %v1486_v36  ;;  %1503 = vst [vmem:[%s2557_s10 + $0x68] sm:$0xff] %v1487_v37 }
 0x259   : > { %1504 = vst [vmem:[%s2557_s10 + $0x70] sm:$0xff] %v1488_v50  ;;  %1505 = vst [vmem:[%s2557_s10 + $0x78] sm:$0xff] %v1489_v30 }
 0x25a PF: > { %s14_s15 = sadd.s32 1, %s1971_s15  }
 0x25b   : > { %p11_p4 = scmp.ge.s32.totalorder %s14_s15, 4  }
 0x25d   :  { %13 = sbr.rel (!%p11_p4) target bundleno = 1 (0x1), region = 69 }

</bundles_post_ra>
